<compile_context>
chip_gen: v5e
topology: v5e:2x2
jax: 0.10.0
libtpu: 0.0.40
codegen_flags: <defaults>
</compile_context>

<pallas_src>
import functools

import jax
import jax.numpy as jnp
from jax.experimental import pallas as pl
from jax.experimental.pallas import tpu as pltpu

EPS = 1e-5


def _vmem_capacity_bytes():
    """Physical VMEM of the local TPU (128 MiB on v5e/v6e, 64 MiB on v7x)."""
    try:
        return int(pltpu.get_tpu_info().vmem_capacity_bytes)
    except Exception:
        return 64 * 1024 * 1024          # conservative (v7x-sized) fallback


_VMEM_CAP = _vmem_capacity_bytes()
_VMEM_LIMIT = int(_VMEM_CAP * 3 // 4)          # ~96 MiB v5e/v6e, ~48 MiB v7x
_BIG_VMEM = _VMEM_CAP >= 100 * 1024 * 1024     # v5e/v6e -> deeper weight buffering


def _pick_tile(dim, target):
    """Largest lane-aligned (multiple of 128) divisor of `dim` that is <= target.

    Falls back to the full dim (block == whole array, always legal) when no
    aligned divisor exists; for large odd dims that costs VMEM, so keep feature
    dims multiples of 128.
    """
    if dim <= target:
        return dim
    t = (target // 128) * 128
    while t >= 128:
        if dim % t == 0:
            return t
        t -= 128
    return dim


def _col_mean(h):
    """Mean over the batch (sublane) axis via a ones-row matmul on the MXU.

    Keeps the BN epilogue off the XLU/VPU, which would otherwise make full
    un-pipelined passes over the f32 tile after the last matmul.
    """
    n = h.shape[0]
    ones = jnp.full((1, n), 1.0 / n, dtype=jnp.float32)
    return jnp.dot(ones, h, preferred_element_type=jnp.float32)     # [1, H]


# --------------------------------------------------------------------------
# Fused 2-layer MLP kernel, both SimSiam views in one call.
#
#   h      = ReLU(BN_affine(x[v] @ w1))      (per-view batch statistics)
#   out[v] = BN_noaffine(h @ w2)             if final_bn  (projector layer3)
#   out[v] = h @ w2 + b2                     otherwise    (predictor layer2)
#
# Grid: single "arbitrary" axis tiling layer-1's contraction dim K.  All weight
# BlockSpecs have constant block indices -> each weight is DMA'd once for both
# views; w2's DMA overlaps the K loop.  The hidden activation stays in VMEM.
#
# NOTE: BN statistics are exact because every block holds the full batch of
# each view; tiling the batch axis in the future requires a cross-tile stats
# reduction or it silently becomes per-tile BN.
# --------------------------------------------------------------------------
def _fused_mlp_kernel(x_ref, w1_ref, g1_ref, be1_ref, w2_ref, b2_ref,
                      out_ref, acc_ref, *, final_bn):
    k = pl.program_id(0)
    nviews = x_ref.shape[0]

    @pl.when(k == 0)
    def _init():
        acc_ref[...] = jnp.zeros_like(acc_ref)

    w1 = w1_ref[...]
    for v in range(nviews):                      # static unroll over the 2 views
        acc_ref[v] += jnp.dot(x_ref[v], w1, preferred_element_type=jnp.float32)

    @pl.when(k == pl.num_programs(0) - 1)
    def _finalize():
        w2 = w2_ref[...]
        g1 = g1_ref[...]
        be1 = be1_ref[...]
        for v in range(nviews):
            h = acc_ref[v]                                        # f32 [B, H]
            # Training-mode BN: biased batch statistics, eps=1e-5.  The Linear
            # bias is omitted: BN over the batch axis cancels it exactly.
            mu = _col_mean(h)
            hc = h - mu                                           # centered once
            var = _col_mean(hc * hc)
            scale = g1 * jax.lax.rsqrt(var + EPS)                 # gamma folded
            hb = jnp.maximum(hc * scale + be1, 0.0).astype(jnp.bfloat16)
            z = jnp.dot(hb, w2, preferred_element_type=jnp.float32)   # [B, N]
            if final_bn:
                zmu = _col_mean(z)
                zc = z - zmu
                zvar = _col_mean(zc * zc)
                out_ref[v] = (zc * jax.lax.rsqrt(zvar + EPS)).astype(out_ref.dtype)
            else:
                out_ref[v] = (z + b2_ref[...]).astype(out_ref.dtype)


def fused_mlp_pair(x_pair, w1, gamma1, beta1, w2, b2=None, *,
                   final_bn, out_dtype, tk=256):
    """Fused Linear->BN->ReLU->Linear(->BN | +bias) on a view pair x:[V,B,K]."""
    V, B, K = x_pair.shape
    H = w1.shape[1]
    N = w2.shape[1]
    tk = _pick_tile(K, tk)
    nk = K // tk

    x_pair = x_pair.astype(jnp.bfloat16)
    w1 = w1.astype(jnp.bfloat16)
    w2 = w2.astype(jnp.bfloat16)
    if b2 is None:
        b2 = jnp.zeros((1, N), jnp.float32)      # unused when final_bn=True

    # Layer-1 weight stream: 3-deep buffering on 128-MiB-VMEM chips (v5e/v6e)
    # to hide the per-step weight DMA; default double-buffering on v7x (64 MiB).
    w1_spec = pl.BlockSpec((tk, H), lambda k: (k, 0))
    if _BIG_VMEM and nk >= 3:
        try:
            w1_spec = pl.BlockSpec((tk, H), lambda k: (k, 0),
                                   pipeline_mode=pl.Buffered(3))
        except Exception:
            pass                                  # older API: keep default depth

    kernel = functools.partial(_fused_mlp_kernel, final_bn=final_bn)
    return pl.pallas_call(
        kernel,
        out_shape=jax.ShapeDtypeStruct((V, B, N), out_dtype),
        grid=(nk,),
        in_specs=[
            pl.BlockSpec((V, B, tk), lambda k: (0, 0, k)),   # both views / step
            w1_spec,
            pl.BlockSpec((1, H), lambda k: (0, 0)),
            pl.BlockSpec((1, H), lambda k: (0, 0)),
            pl.BlockSpec((H, N), lambda k: (0, 0)),          # resident, one DMA
            pl.BlockSpec((1, N), lambda k: (0, 0)),
        ],
        out_specs=pl.BlockSpec((V, B, N), lambda k: (0, 0, 0)),
        scratch_shapes=[pltpu.VMEM((V, B, H), jnp.float32)],
        compiler_params=pltpu.CompilerParams(
            dimension_semantics=("arbitrary",),
            vmem_limit_bytes=_VMEM_LIMIT),
    )(x_pair, w1, gamma1.astype(jnp.float32), beta1.astype(jnp.float32),
      w2, b2.astype(jnp.float32))


# --------------------------------------------------------------------------
# Module-level forwards (SimSiam heads).
# --------------------------------------------------------------------------
def projection_mlp_pair(x_pair, w1, g1, be1, w3, *, tk=256):
    """ProjectionMLP(num_layers=2) on both views."""
    return fused_mlp_pair(x_pair, w1, g1, be1, w3, None,
                          final_bn=True, out_dtype=jnp.bfloat16, tk=tk)


def prediction_mlp_pair(z_pair, w1, g1, be1, w2, b2, *, tk=256):
    """PredictionMLP on both views (final Linear keeps its bias)."""
    return fused_mlp_pair(z_pair, w1, g1, be1, w2, b2,
                          final_bn=False, out_dtype=jnp.float32, tk=tk)


def simsiam_heads_forward(f1, f2, proj_params, pred_params, *, tk=256):
    """SimSiam.forward(im1, im2) given backbone features f_i = backbone(im_i)."""
    x_pair = jnp.stack([f1, f2], axis=0)                        # [2, B, FEAT]
    z_pair = projection_mlp_pair(x_pair, *proj_params, tk=tk)   # bf16 [2,B,EMB]
    p_pair = prediction_mlp_pair(z_pair, *pred_params, tk=tk)   # f32  [2,B,EMB]
    return {"z1": z_pair[0], "z2": z_pair[1], "p1": p_pair[0], "p2": p_pair[1]}


# --------------------------------------------------------------------------
# Pure-JAX references (PyTorch semantics, Linear biases INCLUDED, mimicking the
# kernel's bf16 matmul inputs so tolerances stay tight).
# --------------------------------------------------------------------------
def _q(a):
    return a.astype(jnp.bfloat16).astype(jnp.float32)


def _ref_linear_bn_relu(x, w, b, g, be):
    h = _q(x) @ _q(w) + b
    mu = h.mean(0, keepdims=True)
    hc = h - mu
    var = (hc * hc).mean(0, keepdims=True)        # biased variance
    return jnp.maximum(hc * (g * jax.lax.rsqrt(var + EPS)) + be, 0.0)


def _ref_projection_mlp(x, w1, b1, g1, be1, w3, b3):
    h = _ref_linear_bn_relu(x, w1, b1, g1, be1)
    z = _q(h) @ _q(w3) + b3
    mu = z.mean(0, keepdims=True)
    zc = z - mu
    var = (zc * zc).mean(0, keepdims=True)
    return zc * jax.lax.rsqrt(var + EPS)


def _ref_prediction_mlp(z, w1, b1, g1, be1, w2, b2):
    h = _ref_linear_bn_relu(z, w1, b1, g1, be1)
    return _q(h) @ _q(w2) + b2


if __name__ == "__main__":
    # Small, lane-dense shapes consistent with the module
    # (real model: backbone feat 512, embedding 2048, predictor hidden 512).
    B = 16            # batch: multiple of 8 sublanes per view
    FEAT = 256        # backbone feature dim
    EMB = 512         # embedding_size (projector hidden == out)
    PRED_HID = EMB // 4

    key = jax.random.PRNGKey(0)
    ks = jax.random.split(key, 14)

    def uinit(k, shape, fan_in):
        lim = 1.0 / (fan_in ** 0.5)
        return jax.random.uniform(k, shape, minval=-lim, maxval=lim,
                                  dtype=jnp.float32)

    f1 = jax.random.normal(ks[0], (B, FEAT), dtype=jnp.float32)
    f2 = jax.random.normal(ks[1], (B, FEAT), dtype=jnp.float32)

    # Projector: ProjectionMLP(FEAT, EMB, num_layers=2).
    pw1 = uinit(ks[2], (FEAT, EMB), FEAT)
    pb1 = uinit(ks[3], (1, EMB), FEAT)      # cancelled by BN; reference only
    pg1 = 1.0 + 0.1 * jax.random.normal(ks[4], (1, EMB), dtype=jnp.float32)
    pbe1 = 0.1 * jax.random.normal(ks[5], (1, EMB), dtype=jnp.float32)
    pw3 = uinit(ks[6], (EMB, EMB), EMB)
    pb3 = uinit(ks[7], (1, EMB), EMB)       # cancelled by BN; reference only

    # Predictor: PredictionMLP(EMB).
    qw1 = uinit(ks[8], (EMB, PRED_HID), EMB)
    qb1 = uinit(ks[9], (1, PRED_HID), EMB)  # cancelled by BN; reference only
    qg1 = 1.0 + 0.1 * jax.random.normal(ks[10], (1, PRED_HID), dtype=jnp.float32)
    qbe1 = 0.1 * jax.random.normal(ks[11], (1, PRED_HID), dtype=jnp.float32)
    qw2 = uinit(ks[12], (PRED_HID, EMB), PRED_HID)
    qb2 = uinit(ks[13], (1, EMB), PRED_HID)  # NOT cancelled (no BN follows)

    out = simsiam_heads_forward(
        f1, f2,
        proj_params=(pw1, pg1, pbe1, pw3),
        pred_params=(qw1, qg1, qbe1, qw2, qb2),
        tk=128)   # small K tile so the demo exercises multi-step grids
    out = jax.block_until_ready(out)

    z1_ref = _ref_projection_mlp(f1, pw1, pb1, pg1, pbe1, pw3, pb3)
    z2_ref = _ref_projection_mlp(f2, pw1, pb1, pg1, pbe1, pw3, pb3)
    p1_ref = _ref_prediction_mlp(z1_ref, qw1, qb1, qg1, qbe1, qw2, qb2)
    p2_ref = _ref_prediction_mlp(z2_ref, qw1, qb1, qg1, qbe1, qw2, qb2)

    assert out["z1"].shape == (B, EMB) and out["p1"].shape == (B, EMB)
    for name, got, ref in (("z1", out["z1"], z1_ref), ("z2", out["z2"], z2_ref),
                           ("p1", out["p1"], p1_ref), ("p2", out["p2"], p2_ref)):
        assert got.shape == ref.shape
        assert jnp.allclose(got.astype(jnp.float32), ref,
                            atol=2e-2, rtol=2e-2), f"mismatch in {name}"

    print("KERNEL_OK")
</pallas_src>

<mosaic_0001>
module attributes {stable_mosaic.version = 11 : i64} {
  func.func @_fused_mlp_kernel(%arg0: i32, %arg1: memref<2x16x128xbf16, #tpu.memory_space<vmem>>, %arg2: memref<128x512xbf16, #tpu.memory_space<vmem>>, %arg3: memref<1x512xf32, #tpu.memory_space<vmem>>, %arg4: memref<1x512xf32, #tpu.memory_space<vmem>>, %arg5: memref<512x512xbf16, #tpu.memory_space<vmem>>, %arg6: memref<1x512xf32, #tpu.memory_space<vmem>>, %arg7: memref<2x16x512xbf16, #tpu.memory_space<vmem>>, %arg8: memref<2x16x512xf32, #tpu.memory_space<vmem>>) attributes {dimension_semantics = [#tpu.dimension_semantics<arbitrary>], iteration_bounds = array<i64: 2>, scalar_prefetch = 0 : i64, scratch_operands = 1 : i64, tpu.core_type = #tpu.core_type<tc>, window_params = [{transform_indices = @transform_0, window_bounds = array<i64: 2, 16, 128>}, {transform_indices = @transform_1, window_bounds = array<i64: 128, 512>}, {pipeline_mode = #tpu.pipeline_mode<synchronous>, transform_indices = @transform_2, window_bounds = array<i64: 1, 512>}, {pipeline_mode = #tpu.pipeline_mode<synchronous>, transform_indices = @transform_3, window_bounds = array<i64: 1, 512>}, {pipeline_mode = #tpu.pipeline_mode<synchronous>, transform_indices = @transform_4, window_bounds = array<i64: 512, 512>}, {pipeline_mode = #tpu.pipeline_mode<synchronous>, transform_indices = @transform_5, window_bounds = array<i64: 1, 512>}, {pipeline_mode = #tpu.pipeline_mode<synchronous>, transform_indices = @transform_6, window_bounds = array<i64: 2, 16, 512>}]} {
    %c0_i32 = arith.constant 0 : i32
    %0 = arith.cmpi eq, %arg0, %c0_i32 : i32
    %1 = arith.extui %0 : i1 to i32
    %c0_i32_0 = arith.constant 0 : i32
    %2 = arith.cmpi ne, %1, %c0_i32_0 : i32
    scf.if %2 {
      %cst_21 = arith.constant 0.000000e+00 : f32
      %25 = vector.broadcast %cst_21 : f32 to vector<2x16x512xf32>
      %c0_22 = arith.constant 0 : index
      %c0_23 = arith.constant 0 : index
      %c0_24 = arith.constant 0 : index
      %26 = vector.load %arg8[%c0_22, %c0_23, %c0_24] : memref<2x16x512xf32, #tpu.memory_space<vmem>>, vector<2x16x512xf32>
      tpu.vector_store %arg8[%c0_22, %c0_23, %c0_24], %25 {strides = array<i32>} : memref<2x16x512xf32, #tpu.memory_space<vmem>>, vector<2x16x512xf32>,
    } else {
    }
    %c0 = arith.constant 0 : index
    %c0_1 = arith.constant 0 : index
    %3 = vector.load %arg2[%c0, %c0_1] : memref<128x512xbf16, #tpu.memory_space<vmem>>, vector<128x512xbf16>
    %c0_2 = arith.constant 0 : index
    %c0_3 = arith.constant 0 : index
    %c0_4 = arith.constant 0 : index
    %4 = vector.load %arg8[%c0_2, %c0_3, %c0_4] : memref<2x16x512xf32, #tpu.memory_space<vmem>>, vector<1x16x512xf32>
    %5 = vector.shape_cast %4 : vector<1x16x512xf32> to vector<16x512xf32>
    %c0_5 = arith.constant 0 : index
    %c0_6 = arith.constant 0 : index
    %c0_7 = arith.constant 0 : index
    %6 = vector.load %arg1[%c0_5, %c0_6, %c0_7] : memref<2x16x128xbf16, #tpu.memory_space<vmem>>, vector<1x16x128xbf16>
    %7 = vector.shape_cast %6 : vector<1x16x128xbf16> to vector<16x128xbf16>
    %cst = arith.constant dense<0.000000e+00> : vector<16x512xf32>
    %8 = tpu.matmul %7, %3, %cst {dimension_numbers = #tpu.dot_dimension_numbers<[1], [0], [0], [1], [0, 0, 1, 1], [], []>} : vector<16x128xbf16>, vector<128x512xbf16>, vector<16x512xf32> -> vector<16x512xf32>
    %9 = arith.addf %5, %8 : vector<16x512xf32>
    %c0_8 = arith.constant 0 : index
    %c0_9 = arith.constant 0 : index
    %c0_10 = arith.constant 0 : index
    %10 = vector.load %arg8[%c0_8, %c0_9, %c0_10] : memref<2x16x512xf32, #tpu.memory_space<vmem>>, vector<1x16x512xf32>
    %11 = vector.shape_cast %10 : vector<1x16x512xf32> to vector<16x512xf32>
    %12 = vector.shape_cast %9 : vector<16x512xf32> to vector<1x16x512xf32>
    tpu.vector_store %arg8[%c0_8, %c0_9, %c0_10], %12 {strides = array<i32>} : memref<2x16x512xf32, #tpu.memory_space<vmem>>, vector<1x16x512xf32>,
    %c1 = arith.constant 1 : index
    %c0_11 = arith.constant 0 : index
    %c0_12 = arith.constant 0 : index
    %13 = vector.load %arg8[%c1, %c0_11, %c0_12] : memref<2x16x512xf32, #tpu.memory_space<vmem>>, vector<1x16x512xf32>
    %14 = vector.shape_cast %13 : vector<1x16x512xf32> to vector<16x512xf32>
    %c1_13 = arith.constant 1 : index
    %c0_14 = arith.constant 0 : index
    %c0_15 = arith.constant 0 : index
    %15 = vector.load %arg1[%c1_13, %c0_14, %c0_15] : memref<2x16x128xbf16, #tpu.memory_space<vmem>>, vector<1x16x128xbf16>
    %16 = vector.shape_cast %15 : vector<1x16x128xbf16> to vector<16x128xbf16>
    %cst_16 = arith.constant dense<0.000000e+00> : vector<16x512xf32>
    %17 = tpu.matmul %16, %3, %cst_16 {dimension_numbers = #tpu.dot_dimension_numbers<[1], [0], [0], [1], [0, 0, 1, 1], [], []>} : vector<16x128xbf16>, vector<128x512xbf16>, vector<16x512xf32> -> vector<16x512xf32>
    %18 = arith.addf %14, %17 : vector<16x512xf32>
    %c1_17 = arith.constant 1 : index
    %c0_18 = arith.constant 0 : index
    %c0_19 = arith.constant 0 : index
    %19 = vector.load %arg8[%c1_17, %c0_18, %c0_19] : memref<2x16x512xf32, #tpu.memory_space<vmem>>, vector<1x16x512xf32>
    %20 = vector.shape_cast %19 : vector<1x16x512xf32> to vector<16x512xf32>
    %21 = vector.shape_cast %18 : vector<16x512xf32> to vector<1x16x512xf32>
    tpu.vector_store %arg8[%c1_17, %c0_18, %c0_19], %21 {strides = array<i32>} : memref<2x16x512xf32, #tpu.memory_space<vmem>>, vector<1x16x512xf32>,
    %c1_i32 = arith.constant 1 : i32
    %22 = arith.cmpi eq, %arg0, %c1_i32 : i32
    %23 = arith.extui %22 : i1 to i32
    %c0_i32_20 = arith.constant 0 : i32
    %24 = arith.cmpi ne, %23, %c0_i32_20 : i32
    scf.if %24 {
      %c0_21 = arith.constant 0 : index
      %c0_22 = arith.constant 0 : index
      %25 = vector.load %arg5[%c0_21, %c0_22] : memref<512x512xbf16, #tpu.memory_space<vmem>>, vector<512x512xbf16>
      %c0_23 = arith.constant 0 : index
      %c0_24 = arith.constant 0 : index
      %26 = vector.load %arg3[%c0_23, %c0_24] : memref<1x512xf32, #tpu.memory_space<vmem>>, vector<1x512xf32>
      %c0_25 = arith.constant 0 : index
      %c0_26 = arith.constant 0 : index
      %27 = vector.load %arg4[%c0_25, %c0_26] : memref<1x512xf32, #tpu.memory_space<vmem>>, vector<1x512xf32>
      %c0_27 = arith.constant 0 : index
      %c0_28 = arith.constant 0 : index
      %c0_29 = arith.constant 0 : index
      %28 = vector.load %arg8[%c0_27, %c0_28, %c0_29] : memref<2x16x512xf32, #tpu.memory_space<vmem>>, vector<1x16x512xf32>
      %29 = vector.shape_cast %28 : vector<1x16x512xf32> to vector<16x512xf32>
      %cst_30 = arith.constant 6.250000e-02 : f32
      %30 = vector.broadcast %cst_30 : f32 to vector<1x16xf32>
      %cst_31 = arith.constant dense<0.000000e+00> : vector<1x512xf32>
      %31 = tpu.matmul %30, %29, %cst_31 {dimension_numbers = #tpu.dot_dimension_numbers<[1], [0], [0], [1], [0, 0, 1, 1], [], []>} : vector<1x16xf32>, vector<16x512xf32>, vector<1x512xf32> -> vector<1x512xf32>
      %32 = vector.broadcast %31 : vector<1x512xf32> to vector<16x512xf32>
      %33 = arith.subf %29, %32 : vector<16x512xf32>
      %34 = arith.mulf %33, %33 : vector<16x512xf32>
      %cst_32 = arith.constant 6.250000e-02 : f32
      %35 = vector.broadcast %cst_32 : f32 to vector<1x16xf32>
      %cst_33 = arith.constant dense<0.000000e+00> : vector<1x512xf32>
      %36 = tpu.matmul %35, %34, %cst_33 {dimension_numbers = #tpu.dot_dimension_numbers<[1], [0], [0], [1], [0, 0, 1, 1], [], []>} : vector<1x16xf32>, vector<16x512xf32>, vector<1x512xf32> -> vector<1x512xf32>
      %cst_34 = arith.constant 9.99999974E-6 : f32
      %37 = vector.broadcast %cst_34 : f32 to vector<1x512xf32>
      %38 = arith.addf %36, %37 : vector<1x512xf32>
      %39 = math.rsqrt %38 : vector<1x512xf32>
      %40 = arith.mulf %26, %39 : vector<1x512xf32>
      %41 = vector.broadcast %40 : vector<1x512xf32> to vector<16x512xf32>
      %42 = arith.mulf %33, %41 : vector<16x512xf32>
      %43 = vector.broadcast %27 : vector<1x512xf32> to vector<16x512xf32>
      %44 = arith.addf %42, %43 : vector<16x512xf32>
      %cst_35 = arith.constant 0.000000e+00 : f32
      %45 = vector.broadcast %cst_35 : f32 to vector<16x512xf32>
      %46 = arith.maximumf %44, %45 : vector<16x512xf32>
      %47 = arith.truncf %46 : vector<16x512xf32> to vector<16x512xbf16>
      %cst_36 = arith.constant dense<0.000000e+00> : vector<16x512xf32>
      %48 = tpu.matmul %47, %25, %cst_36 {dimension_numbers = #tpu.dot_dimension_numbers<[1], [0], [0], [1], [0, 0, 1, 1], [], []>} : vector<16x512xbf16>, vector<512x512xbf16>, vector<16x512xf32> -> vector<16x512xf32>
      %cst_37 = arith.constant 6.250000e-02 : f32
      %49 = vector.broadcast %cst_37 : f32 to vector<1x16xf32>
      %cst_38 = arith.constant dense<0.000000e+00> : vector<1x512xf32>
      %50 = tpu.matmul %49, %48, %cst_38 {dimension_numbers = #tpu.dot_dimension_numbers<[1], [0], [0], [1], [0, 0, 1, 1], [], []>} : vector<1x16xf32>, vector<16x512xf32>, vector<1x512xf32> -> vector<1x512xf32>
      %51 = vector.broadcast %50 : vector<1x512xf32> to vector<16x512xf32>
      %52 = arith.subf %48, %51 : vector<16x512xf32>
      %53 = arith.mulf %52, %52 : vector<16x512xf32>
      %cst_39 = arith.constant 6.250000e-02 : f32
      %54 = vector.broadcast %cst_39 : f32 to vector<1x16xf32>
      %cst_40 = arith.constant dense<0.000000e+00> : vector<1x512xf32>
      %55 = tpu.matmul %54, %53, %cst_40 {dimension_numbers = #tpu.dot_dimension_numbers<[1], [0], [0], [1], [0, 0, 1, 1], [], []>} : vector<1x16xf32>, vector<16x512xf32>, vector<1x512xf32> -> vector<1x512xf32>
      %cst_41 = arith.constant 9.99999974E-6 : f32
      %56 = vector.broadcast %cst_41 : f32 to vector<1x512xf32>
      %57 = arith.addf %55, %56 : vector<1x512xf32>
      %58 = math.rsqrt %57 : vector<1x512xf32>
      %59 = vector.broadcast %58 : vector<1x512xf32> to vector<16x512xf32>
      %60 = arith.mulf %52, %59 : vector<16x512xf32>
      %61 = arith.truncf %60 : vector<16x512xf32> to vector<16x512xbf16>
      %c0_42 = arith.constant 0 : index
      %c0_43 = arith.constant 0 : index
      %c0_44 = arith.constant 0 : index
      %62 = vector.load %arg7[%c0_42, %c0_43, %c0_44] : memref<2x16x512xbf16, #tpu.memory_space<vmem>>, vector<1x16x512xbf16>
      %63 = vector.shape_cast %62 : vector<1x16x512xbf16> to vector<16x512xbf16>
      %64 = vector.shape_cast %61 : vector<16x512xbf16> to vector<1x16x512xbf16>
      tpu.vector_store %arg7[%c0_42, %c0_43, %c0_44], %64 {strides = array<i32>} : memref<2x16x512xbf16, #tpu.memory_space<vmem>>, vector<1x16x512xbf16>,
      %c1_45 = arith.constant 1 : index
      %c0_46 = arith.constant 0 : index
      %c0_47 = arith.constant 0 : index
      %65 = vector.load %arg8[%c1_45, %c0_46, %c0_47] : memref<2x16x512xf32, #tpu.memory_space<vmem>>, vector<1x16x512xf32>
      %66 = vector.shape_cast %65 : vector<1x16x512xf32> to vector<16x512xf32>
      %cst_48 = arith.constant 6.250000e-02 : f32
      %67 = vector.broadcast %cst_48 : f32 to vector<1x16xf32>
      %cst_49 = arith.constant dense<0.000000e+00> : vector<1x512xf32>
      %68 = tpu.matmul %67, %66, %cst_49 {dimension_numbers = #tpu.dot_dimension_numbers<[1], [0], [0], [1], [0, 0, 1, 1], [], []>} : vector<1x16xf32>, vector<16x512xf32>, vector<1x512xf32> -> vector<1x512xf32>
      %69 = vector.broadcast %68 : vector<1x512xf32> to vector<16x512xf32>
      %70 = arith.subf %66, %69 : vector<16x512xf32>
      %71 = arith.mulf %70, %70 : vector<16x512xf32>
      %cst_50 = arith.constant 6.250000e-02 : f32
      %72 = vector.broadcast %cst_50 : f32 to vector<1x16xf32>
      %cst_51 = arith.constant dense<0.000000e+00> : vector<1x512xf32>
      %73 = tpu.matmul %72, %71, %cst_51 {dimension_numbers = #tpu.dot_dimension_numbers<[1], [0], [0], [1], [0, 0, 1, 1], [], []>} : vector<1x16xf32>, vector<16x512xf32>, vector<1x512xf32> -> vector<1x512xf32>
      %cst_52 = arith.constant 9.99999974E-6 : f32
      %74 = vector.broadcast %cst_52 : f32 to vector<1x512xf32>
      %75 = arith.addf %73, %74 : vector<1x512xf32>
      %76 = math.rsqrt %75 : vector<1x512xf32>
      %77 = arith.mulf %26, %76 : vector<1x512xf32>
      %78 = vector.broadcast %77 : vector<1x512xf32> to vector<16x512xf32>
      %79 = arith.mulf %70, %78 : vector<16x512xf32>
      %80 = vector.broadcast %27 : vector<1x512xf32> to vector<16x512xf32>
      %81 = arith.addf %79, %80 : vector<16x512xf32>
      %cst_53 = arith.constant 0.000000e+00 : f32
      %82 = vector.broadcast %cst_53 : f32 to vector<16x512xf32>
      %83 = arith.maximumf %81, %82 : vector<16x512xf32>
      %84 = arith.truncf %83 : vector<16x512xf32> to vector<16x512xbf16>
      %cst_54 = arith.constant dense<0.000000e+00> : vector<16x512xf32>
      %85 = tpu.matmul %84, %25, %cst_54 {dimension_numbers = #tpu.dot_dimension_numbers<[1], [0], [0], [1], [0, 0, 1, 1], [], []>} : vector<16x512xbf16>, vector<512x512xbf16>, vector<16x512xf32> -> vector<16x512xf32>
      %cst_55 = arith.constant 6.250000e-02 : f32
      %86 = vector.broadcast %cst_55 : f32 to vector<1x16xf32>
      %cst_56 = arith.constant dense<0.000000e+00> : vector<1x512xf32>
      %87 = tpu.matmul %86, %85, %cst_56 {dimension_numbers = #tpu.dot_dimension_numbers<[1], [0], [0], [1], [0, 0, 1, 1], [], []>} : vector<1x16xf32>, vector<16x512xf32>, vector<1x512xf32> -> vector<1x512xf32>
      %88 = vector.broadcast %87 : vector<1x512xf32> to vector<16x512xf32>
      %89 = arith.subf %85, %88 : vector<16x512xf32>
      %90 = arith.mulf %89, %89 : vector<16x512xf32>
      %cst_57 = arith.constant 6.250000e-02 : f32
      %91 = vector.broadcast %cst_57 : f32 to vector<1x16xf32>
      %cst_58 = arith.constant dense<0.000000e+00> : vector<1x512xf32>
      %92 = tpu.matmul %91, %90, %cst_58 {dimension_numbers = #tpu.dot_dimension_numbers<[1], [0], [0], [1], [0, 0, 1, 1], [], []>} : vector<1x16xf32>, vector<16x512xf32>, vector<1x512xf32> -> vector<1x512xf32>
      %cst_59 = arith.constant 9.99999974E-6 : f32
      %93 = vector.broadcast %cst_59 : f32 to vector<1x512xf32>
      %94 = arith.addf %92, %93 : vector<1x512xf32>
      %95 = math.rsqrt %94 : vector<1x512xf32>
      %96 = vector.broadcast %95 : vector<1x512xf32> to vector<16x512xf32>
      %97 = arith.mulf %89, %96 : vector<16x512xf32>
      %98 = arith.truncf %97 : vector<16x512xf32> to vector<16x512xbf16>
      %c1_60 = arith.constant 1 : index
      %c0_61 = arith.constant 0 : index
      %c0_62 = arith.constant 0 : index
      %99 = vector.load %arg7[%c1_60, %c0_61, %c0_62] : memref<2x16x512xbf16, #tpu.memory_space<vmem>>, vector<1x16x512xbf16>
      %100 = vector.shape_cast %99 : vector<1x16x512xbf16> to vector<16x512xbf16>
      %101 = vector.shape_cast %98 : vector<16x512xbf16> to vector<1x16x512xbf16>
      tpu.vector_store %arg7[%c1_60, %c0_61, %c0_62], %101 {strides = array<i32>} : memref<2x16x512xbf16, #tpu.memory_space<vmem>>, vector<1x16x512xbf16>,
    } else {
    }
    return
  }
  func.func @transform_0(%arg0: i32) -> (i32, i32, i32) {
    %c0_i32 = arith.constant 0 : i32
    %c0_i32_0 = arith.constant 0 : i32
    %c0_i32_1 = arith.constant 0 : i32
    return %c0_i32, %c0_i32_0, %arg0 : i32, i32, i32
  }
  func.func @transform_1(%arg0: i32) -> (i32, i32) {
    %c0_i32 = arith.constant 0 : i32
    %c0_i32_0 = arith.constant 0 : i32
    return %arg0, %c0_i32 : i32, i32
  }
  func.func @transform_2(%arg0: i32) -> (i32, i32) {
    %c0_i32 = arith.constant 0 : i32
    %c0_i32_0 = arith.constant 0 : i32
    %c0_i32_1 = arith.constant 0 : i32
    return %c0_i32, %c0_i32_0 : i32, i32
  }
  func.func @transform_3(%arg0: i32) -> (i32, i32) {
    %c0_i32 = arith.constant 0 : i32
    %c0_i32_0 = arith.constant 0 : i32
    %c0_i32_1 = arith.constant 0 : i32
    return %c0_i32, %c0_i32_0 : i32, i32
  }
  func.func @transform_4(%arg0: i32) -> (i32, i32) {
    %c0_i32 = arith.constant 0 : i32
    %c0_i32_0 = arith.constant 0 : i32
    %c0_i32_1 = arith.constant 0 : i32
    return %c0_i32, %c0_i32_0 : i32, i32
  }
  func.func @transform_5(%arg0: i32) -> (i32, i32) {
    %c0_i32 = arith.constant 0 : i32
    %c0_i32_0 = arith.constant 0 : i32
    %c0_i32_1 = arith.constant 0 : i32
    return %c0_i32, %c0_i32_0 : i32, i32
  }
  func.func @transform_6(%arg0: i32) -> (i32, i32, i32) {
    %c0_i32 = arith.constant 0 : i32
    %c0_i32_0 = arith.constant 0 : i32
    %c0_i32_1 = arith.constant 0 : i32
    %c0_i32_2 = arith.constant 0 : i32
    return %c0_i32, %c0_i32_0, %c0_i32_1 : i32, i32, i32
  }
}

</mosaic_0001>

<bundles_post_ra>
// kernel: tpu_custom_call.1
= control target key start
LH: loop header
LB: loop body
LE: loop exit
PB: predicated region body
PF: predicated region fallthrough
CT: control target
= control target key end

     0   :  { %s5580_s0 = inlined_call_operand.hbm [shape: bf16[2,16,256], index: 0, kind: input, shape index: {}]   ;;  %s5581_s1 = inlined_call_operand.hbm [shape: bf16[256,512], index: 1, kind: input, shape index: {}]   ;;  %s5582_s2 = inlined_call_operand.hbm [shape: f32[1,512], index: 2, kind: input, shape index: {}]   ;;  %s5583_s3 = inlined_call_operand.hbm [shape: f32[1,512], index: 3, kind: input, shape index: {}]   ;;  %s5584_s4 = inlined_call_operand.hbm [shape: bf16[512,512], index: 4, kind: input, shape index: {}]   ;;  %s5585_s5 = inlined_call_operand.vmem [shape: f32[1,512], index: 5, kind: input, shape index: {}]   ;;  %s5586_s6 = inlined_call_operand.hbm [shape: bf16[2,16,512], index: 6, kind: output, shape index: {}]  }
   0x1   :  { %5698 = sst [smem:[#allocation121_spill]] %s5580_s0 }
   0x2   :  { %5699 = sst [smem:[#allocation122_spill]] %s5582_s2 }
   0x3   :  { %5700 = sst [smem:[#allocation123_spill]] %s5583_s3 }
   0x4   :  { %11 = vsyncpa [#allocation4], 0 }
   0x5   :  { %13 = vsyncpa [#allocation4 + $0x1], 0 }
   0x6   :  { %14 = vsyncpa [#allocation7], 0 }
   0x7   :  { %16 = vsyncpa [#allocation7 + $0x1], 0 }
   0x8   :  { %17 = vsyncpa [#allocation10], 0 }
   0x9   :  { %18 = vsyncpa [#allocation5], 0  ;;  %s4395_s21 = smov 0   ;;  %s4397_s22 = smov 0  }
   0xa   :  { %s4399_s23 = smov 0   ;;  %s4401_s24 = smov 0  }
   0xb LB: > { %s4414_s5 = sadd.s32 4294967295, %s4345_s24   ;;  %s4417_s25 = sadd.s32 1, %s4345_s24   ;;  %s4345_s24 = sphi %s4401_s24, %s5923_s24   ;;  %s4341_s23 = sphi %s4399_s23, %s5922_s23   ;;  %s4337_s22 = sphi %s4397_s22, %s5921_s22   ;;  %s4333_s21 = sphi %s4395_s21, %s5920_s21  }
   0xc   : > { %s28_s26 = ssub.s32 %s4345_s24, %s4417_s25  ;;  %s31_s27 = sadd.s32 1, %s4341_s23 }
   0xd   : > { %p29_p0 = scmp.eq.s32.totalorder %s28_s26, 0  ;;  %p38_p1 = scmp.ne.s32.totalorder %s4341_s23, %s4337_s22 }
   0xe   : > { %p39_p2 = scmp.eq.s32.totalorder %s4345_s24, 0  ;;  %p44_p3 = scmp.ne.s32.totalorder %s4337_s22, %s4333_s21 }
   0xf   : > { %s4427_s28 = scalar_select %p29_p0, %s4341_s23, %s31_s27  }
  0x10   : > { %p4429_p4 = por %p39_p2, %p38_p1  ;;  %p45_p5 = scmp.eq.s32.totalorder %s4414_s5, 0 }
  0x11   : > { %p3124_p6 = scmp.ge.s32.totalorder %s4345_s24, 1  ;;  %p186_p7 = scmp.lt.s32.totalorder %s4345_s24, 3 }
  0x12   : > { %p4438_p8 = por %p45_p5, %p44_p3  ;;  %p3125_p9 = scmp.ne.s32.totalorder %s4414_s5, 0 }
  0x13   : > { %p4443_p10 = pnand %p3124_p6, %p186_p7  ;;  %s5704_s2 = sld [smem:[#allocation122_spill]] }
  0x14   : > { %s4347_s11 = smov [#allocation8]   ;;  %p4033_p13 = scmp.lt.s32.totalorder %s4345_s24, 2 }
  0x15   : > { %p4013_p11 = pneg %p4443_p10  ;;  %s200_s12 = sshll.u32 %s4347_s11, 4  ;;  %s201_s12 = int_to_ptr.vmem [resolvable:$true] %s200_s12 }
  0x16   : > { %s5706_s3 = sld [smem:[#allocation123_spill]]  ;;  %p4464_p0 = pnand %p4033_p13, %p4429_p4 }
  0x17   : > { %p4454_p12 = pnand %p4013_p11, %p45_p5  ;;  %s4348_s18 = smov [#allocation9]  }
  0x18   : > { %s212_s19 = sshll.u32 %s4348_s18, 4  ;;  %s221_s26 = sshll.u32 %s5584_s4, 4  ;;  %s213_s19 = int_to_ptr.vmem [resolvable:$true] %s212_s19  ;;  %s222_s26 = int_to_ptr.hbm [resolvable:$true] %s221_s26 }
  0x19   : > { %s198_s10 = sshll.u32 %s5704_s2, 4  ;;  %s4349_s27 = smov [#allocation11]   ;;  %s199_s10 = int_to_ptr.hbm [resolvable:$true] %s198_s10 }
  0x1a   : > { %4016 = dma.hbm_to_vmem [thread:$0]  (!%p4454_p12), %s199_s10, 64, %s201_s12, [#allocation7]  }
  0x1b   : > { %s223_s29 = sshll.u32 %s4349_s27, 4  ;;  %s4476_s8 = sand.u32 1, %s4341_s23   ;;  %s224_s29 = int_to_ptr.vmem [resolvable:$true] %s223_s29 }
  0x1c   : > { %s210_s16 = sshll.u32 %s5706_s3, 4  ;;  %s5587_s9 = smov 256   ;;  %s211_s16 = int_to_ptr.hbm [resolvable:$true] %s210_s16 }
  0x1d   : > { %4019 = dma.hbm_to_vmem [thread:$0]  (!%p4454_p12), %s211_s16, 64, %s213_s19, [#allocation10]  }
  0x1e   : > { %s5588_s10 = smov 16   ;;  %s3129_s11 = sshll.u32 %s4476_s8, 4 }
  0x1f   : > { %4022 = dma.hbm_to_vmem [thread:$0]  (!%p4454_p12), %s222_s26, 16384, %s224_s29, [#allocation10], %s5587_s9, %s5587_s9, %s5588_s10  }
  0x20   : > { %s3130_s12 = sshll.u32 %s4345_s24, 2  ;;  %s5708_s0 = sld [smem:[#allocation121_spill]] }
  0x21   : > { %s244_s18 = scalar_lea.vmem [#allocation3], %s3129_s11  ;;  %s241_s21 = scalar_lea.sflag [#allocation4], %s4476_s8 }
  0x22   : > { %s251_s19 = sshll.u32 %s244_s18, 4  ;;  %p4211_p2 = pneg %p4464_p0  ;;  %s252_s19 = int_to_ptr.vmem [resolvable:$true] %s251_s19 }
  0x26   : > { %s248_s16 = scalar_lea.hbm %s5708_s0, %s3130_s12  ;;  %s4214_s12 = scalar_lea.hbm %s5708_s0, 32 }
  0x27   : > { %s249_s20 = sshll.u32 %s248_s16, 4  ;;  %s250_s20 = int_to_ptr.hbm [resolvable:$true] %s249_s20 }
  0x28   : > { %s4207_s27 = sshra.s32 %s250_s20, 4  ;;  %s4208_s27 = int_to_ptr.hbm [resolvable:$true] %s4207_s27 }
  0x29   : > { %s4209_s13 = scalar_lea.hbm %s4208_s27, 16  ;;  %p4215_p6 = scmp.lt.s32.totalorder %s4208_s27, %s5708_s0 }
  0x2a   : > { %p4210_p1 = scmp.ne.s32.totalorder %s4208_s27, %s4209_s13  ;;  %p4216_p7 = scmp.lt.s32.totalorder %s4214_s12, %s4209_s13 }
  0x2c   : > { %p4212_p3 = pnand %p4211_p2, %p4210_p1  ;;  %p4217_p11 = por %p4216_p7, %p4215_p6 }
  0x2e   : > { %p4213_p4 = pneg %p4212_p3 }
  0x30   : > { %p4218_p12 = pnand %p4217_p11, %p4213_p4 }
  0x32   : > { %4221 = shalt.err (!%p4218_p12)
}
  0x33   : > { %s4352_s15 = smov 128   ;;  %s4353_s16 = smov 64  }
  0x34   : > { %s4354_s18 = smov 4   ;;  %s261_s26 = sand.u32 1, %s4345_s24  }
  0x35   : > { %4026 = dma.hbm_to_vmem [thread:$0]  (!%p4464_p0), %s250_s20, 256, %s252_s19, %s241_s21, %s4352_s15, %s4353_s16, %s4354_s18  }
  0x36   : > { %s3131_s29 = sshll.u32 %s4476_s8, 8  ;;  %s3830_s9 = sshll.u32 %s4345_s24, 8 }
  0x37   : > { %s265_s10 = scalar_lea.vmem [#allocation6], %s3131_s29  ;;  %s271_s12 = scalar_lea.hbm %s5581_s1, %s3830_s9 }
  0x38   : > { %s274_s11 = sshll.u32 %s265_s10, 4  ;;  %s272_s14 = sshll.u32 %s271_s12, 4  ;;  %s275_s11 = int_to_ptr.vmem [resolvable:$true] %s274_s11  ;;  %s273_s14 = int_to_ptr.hbm [resolvable:$true] %s272_s14 }
  0x39   : > { %s262_s0 = scalar_lea.sflag [#allocation7], %s261_s26  ;;  %s4237_s2 = sshra.s32 %s273_s14, 4  ;;  %s4238_s2 = int_to_ptr.hbm [resolvable:$true] %s4237_s2 }
  0x3a   : > { %s4239_s3 = scalar_lea.hbm %s4238_s2, 256  ;;  %s4244_s10 = scalar_lea.hbm %s5581_s1, 512 }
  0x3b   : > { %p4240_p13 = scmp.ne.s32.totalorder %s4238_s2, %s4239_s3  ;;  %p4245_p4 = scmp.lt.s32.totalorder %s4238_s2, %s5581_s1 }
  0x3c   : > { %p4246_p6 = scmp.lt.s32.totalorder %s4244_s10, %s4239_s3 }
  0x3d   : > { %p4242_p1 = pnand %p4240_p13, %p4211_p2 }
  0x3e   : > { %p4247_p7 = por %p4246_p6, %p4245_p4 }
  0x3f   : > { %p4243_p3 = pneg %p4242_p1 }
  0x41   : > { %p4248_p11 = pnand %p4247_p7, %p4243_p3 }
  0x43   : > { %4251 = shalt.err (!%p4248_p11)
}
  0x44   : > { %s5709_s9 = smov 16   ;;  %s5710_s21 = smov 256  }
  0x45   : > { %4029 = dma.hbm_to_vmem [thread:$0]  (!%p4464_p0), %s273_s14, 4096, %s275_s11, %s262_s0, %s5710_s21, %s5710_s21, %s5709_s9  }
  0x46   : > { %286 = sbr.rel (%p4443_p10) target bundleno = 1823 (0x71f), region = 44  ;;  %s288_s15 = sand.u32 (!%p4443_p10), 1, %s4337_s22  }
  0x47   : > { %s3136_s16 = sshll.u32 (!%p4443_p10), %s288_s15, 4  ;;  %s289_s18 = scalar_lea.sflag (!%p4443_p10), [#allocation4], %s288_s15 }
  0x48   : > { %s4525_s26 = scalar_lea.vmem (!%p4443_p10), [#allocation3], %s3136_s16 }
  0x4b   : > { %4312 = dma.done.wait (%p4438_p8), %s289_s18, 256  }
  0x4c   : > { %4314 = vsyncadd (%p4438_p8), %s289_s18, 4294967040  ;;  %s298_s2 = sand.u32 1, %s4414_s5   ;;  %s3137_s3 = sshll.u32 %s288_s15, 8 }
  0x4d   : > { %s299_s0 = scalar_lea.sflag [#allocation7], %s298_s2  ;;  %s4532_s17 = scalar_lea.vmem [#allocation6], %s3137_s3 }
  0x4e   : > { %4316 = dma.done.wait (%p4438_p8), %s299_s0, 4096  }
  0x4f   : > { %4318 = vsyncadd (%p4438_p8), %s299_s0, 4294963200 }
  0x50   : > { %4320 = dma.done.wait (%p45_p5), [#allocation7], 64  }
  0x51   : > { %4322 = vsyncadd (%p45_p5), [#allocation7], 4294967232 }
  0x52   : > { %4324 = dma.done.wait (%p45_p5), [#allocation10], 16448  }
  0x53   : > { %4326 = vsyncadd (%p45_p5), [#allocation10], 4294950848  ;;  %351 = sbr.rel (%p3125_p9) target bundleno = 105 (0x69), region = 68 }
  0x58   : > { %v4355_v0 = vmov 0.0  }
  0x59   : > { %352 = vst [vmem:[#allocation2 + $0x30] sm:$0xff] %v4355_v0 }
  0x5a   : > { %353 = vst [vmem:[#allocation2] sm:$0xff] %v4355_v0 }
  0x5b   : > { %354 = vst [vmem:[#allocation2 + $0x58] sm:$0xff] %v4355_v0 }
  0x5c   : > { %355 = vst [vmem:[#allocation2 + $0x18] sm:$0xff] %v4355_v0 }
  0x5d   : > { %356 = vst [vmem:[#allocation2 + $0x50] sm:$0xff] %v4355_v0 }
  0x5e   : > { %357 = vst [vmem:[#allocation2 + $0x68] sm:$0xff] %v4355_v0 }
  0x5f   : > { %358 = vst [vmem:[#allocation2 + $0x8] sm:$0xff] %v4355_v0 }
  0x60   : > { %359 = vst [vmem:[#allocation2 + $0x48] sm:$0xff] %v4355_v0 }
  0x61   : > { %360 = vst [vmem:[#allocation2 + $0x40] sm:$0xff] %v4355_v0 }
  0x62   : > { %361 = vst [vmem:[#allocation2 + $0x20] sm:$0xff] %v4355_v0 }
  0x63   : > { %362 = vst [vmem:[#allocation2 + $0x10] sm:$0xff] %v4355_v0 }
  0x64   : > { %363 = vst [vmem:[#allocation2 + $0x38] sm:$0xff] %v4355_v0 }
  0x65   : > { %364 = vst [vmem:[#allocation2 + $0x60] sm:$0xff] %v4355_v0 }
  0x66   : > { %365 = vst [vmem:[#allocation2 + $0x70] sm:$0xff] %v4355_v0 }
  0x67   : > { %366 = vst [vmem:[#allocation2 + $0x78] sm:$0xff] %v4355_v0 }
  0x68   : > { %367 = vst [vmem:[#allocation2 + $0x28] sm:$0xff] %v4355_v0 }
  0x69 PF: > { %v3260_v1 = vld [vmem:[%s4532_s17 + $0xe0] sm:$0xf]  ;;  %v3861_v2 = vld [vmem:[%s4532_s17 + $0xec] sm:$0xf0]  ;;  %v3859_v3 = vld [vmem:[%s4532_s17 + $0xe4] sm:$0xf] }
  0x6a   : > { %v4551_v4 = vor.u32 %v3861_v2, %v3260_v1  ;;  %v3262_v5 = vld [vmem:[%s4532_s17 + $0xf0] sm:$0xf0]  ;;  %v3268_v6 = vld [vmem:[%s4532_s17 + $0xe8] sm:$0xf]  ;;  %v3862_v7 = vld [vmem:[%s4532_s17 + $0xf4] sm:$0xf0] }
  0x6b   : > { %v4556_v8 = vor.u32 %v3859_v3, %v3262_v5  ;;  %v4558_v9 = vor.u32 %v3862_v7, %v3268_v6  ;;  %v3860_v10 = vld [vmem:[%s4532_s17 + $0xec] sm:$0xf]  ;;  %v3270_v11 = vld [vmem:[%s4532_s17 + $0xf8] sm:$0xf0]  ;;  %v3244_v12 = vld [vmem:[%s4532_s17 + $0xc0] sm:$0xf] }
  0x6c   : > { %576 = vmatpush.bf16.msra.mxu0 %v4551_v4  ;;  %v4564_v13 = vor.u32 %v3860_v10, %v3270_v11  ;;  %v3857_v14 = vld [vmem:[%s4532_s17 + $0xcc] sm:$0xf0]  ;;  %v3855_v15 = vld [vmem:[%s4532_s17 + $0xc4] sm:$0xf]  ;;  %v3246_v16 = vld [vmem:[%s4532_s17 + $0xd0] sm:$0xf0] }
  0x6d   : > { %590 = vmatpush.bf16.msra.mxu1 %v4556_v8  ;;  %604 = vmatpush.bf16.msra.mxu2 %v4558_v9  ;;  %v4571_v17 = vor.u32 %v3857_v14, %v3244_v12  ;;  %v4573_v18 = vor.u32 %v3855_v15, %v3246_v16  ;;  %v3252_v19 = vld [vmem:[%s4532_s17 + $0xc8] sm:$0xf]  ;;  %v3858_v20 = vld [vmem:[%s4532_s17 + $0xd4] sm:$0xf0]  ;;  %v3856_v21 = vld [vmem:[%s4532_s17 + $0xcc] sm:$0xf] }
  0x6e   : > { %618 = vmatpush.bf16.msra.mxu3 %v4564_v13  ;;  %v4579_v22 = vor.u32 %v3858_v20, %v3252_v19  ;;  %v3254_v23 = vld [vmem:[%s4532_s17 + $0xd8] sm:$0xf0]  ;;  %v3228_v24 = vld [vmem:[%s4532_s17 + $0xa0] sm:$0xf]  ;;  %v3853_v25 = vld [vmem:[%s4532_s17 + $0xac] sm:$0xf0] }
  0x6f   : > { %v4584_v26 = vor.u32 %v3856_v21, %v3254_v23  ;;  %v3851_v27 = vld [vmem:[%s4532_s17 + $0xa4] sm:$0xf]  ;;  %v3230_v28 = vld [vmem:[%s4532_s17 + $0xb0] sm:$0xf0]  ;;  %v3236_v29 = vld [vmem:[%s4532_s17 + $0xa8] sm:$0xf]  ;;  %v4590_v30 = vor.u32 %v3853_v25, %v3228_v24 }
  0x70   : > { %577 = vmatpush.bf16.msra.mxu0 %v4571_v17  ;;  %v3854_v31 = vld [vmem:[%s4532_s17 + $0xb4] sm:$0xf0]  ;;  %v3852_v32 = vld [vmem:[%s4532_s17 + $0xac] sm:$0xf]  ;;  %v3238_v33 = vld [vmem:[%s4532_s17 + $0xb8] sm:$0xf0]  ;;  %v4597_v34 = vor.u32 %v3851_v27, %v3230_v28 }
  0x71   : > { %591 = vmatpush.bf16.msra.mxu1 %v4573_v18  ;;  %605 = vmatpush.bf16.msra.mxu2 %v4579_v22  ;;  %v4599_v35 = vor.u32 %v3854_v31, %v3236_v29  ;;  %v3212_v36 = vld [vmem:[%s4532_s17 + $0x80] sm:$0xf]  ;;  %v3849_v37 = vld [vmem:[%s4532_s17 + $0x8c] sm:$0xf0]  ;;  %v3847_v38 = vld [vmem:[%s4532_s17 + $0x84] sm:$0xf]  ;;  %v4605_v39 = vor.u32 %v3852_v32, %v3238_v33 }
  0x72   : > { %619 = vmatpush.bf16.msra.mxu3 %v4584_v26  ;;  %v3214_v40 = vld [vmem:[%s4532_s17 + $0x90] sm:$0xf0]  ;;  %v3220_v41 = vld [vmem:[%s4532_s17 + $0x88] sm:$0xf]  ;;  %v3850_v42 = vld [vmem:[%s4532_s17 + $0x94] sm:$0xf0]  ;;  %v4613_v45 = vor.u32 %v3849_v37, %v3212_v36 }
  0x73   : > { %v3848_v43 = vld [vmem:[%s4532_s17 + $0x8c] sm:$0xf]  ;;  %v3222_v44 = vld [vmem:[%s4532_s17 + $0x98] sm:$0xf0]  ;;  %v4617_v46 = vor.u32 %v3847_v38, %v3214_v40  ;;  %v4619_v47 = vor.u32 %v3850_v42, %v3220_v41  ;;  %v3196_v48 = vld [vmem:[%s4532_s17 + $0x60] sm:$0xf] }
  0x74   : > { %578 = vmatpush.bf16.msra.mxu0 %v4590_v30  ;;  %v3845_v49 = vld [vmem:[%s4532_s17 + $0x6c] sm:$0xf0]  ;;  %v3843_v50 = vld [vmem:[%s4532_s17 + $0x64] sm:$0xf]  ;;  %v4625_v51 = vor.u32 %v3848_v43, %v3222_v44  ;;  %v3198_v52 = vld [vmem:[%s4532_s17 + $0x70] sm:$0xf0] }
  0x75   : > { %592 = vmatpush.bf16.msra.mxu1 %v4597_v34  ;;  %606 = vmatpush.bf16.msra.mxu2 %v4599_v35  ;;  %v3204_v53 = vld [vmem:[%s4532_s17 + $0x68] sm:$0xf]  ;;  %v3846_v54 = vld [vmem:[%s4532_s17 + $0x74] sm:$0xf0]  ;;  %v3844_v55 = vld [vmem:[%s4532_s17 + $0x6c] sm:$0xf]  ;;  %v4633_v57 = vor.u32 %v3845_v49, %v3196_v48  ;;  %v4637_v58 = vor.u32 %v3843_v50, %v3198_v52 }
  0x76   : > { %620 = vmatpush.bf16.msra.mxu3 %v4605_v39  ;;  %v3206_v56 = vld [vmem:[%s4532_s17 + $0x78] sm:$0xf0]  ;;  %v4639_v59 = vor.u32 %v3846_v54, %v3204_v53  ;;  %v3180_v60 = vld [vmem:[%s4532_s17 + $0x40] sm:$0xf]  ;;  %v3841_v61 = vld [vmem:[%s4532_s17 + $0x4c] sm:$0xf0] }
  0x77   : > { %v3839_v62 = vld [vmem:[%s4532_s17 + $0x44] sm:$0xf]  ;;  %v4645_v63 = vor.u32 %v3844_v55, %v3206_v56  ;;  %v3182_v0 = vld [vmem:[%s4532_s17 + $0x50] sm:$0xf0]  ;;  %v3188_v1 = vld [vmem:[%s4532_s17 + $0x48] sm:$0xf]  ;;  %v4653_v6 = vor.u32 %v3841_v61, %v3180_v60 }
  0x78   : > { %579 = vmatpush.bf16.msra.mxu0 %v4613_v45  ;;  %v3842_v2 = vld [vmem:[%s4532_s17 + $0x54] sm:$0xf0]  ;;  %v3840_v3 = vld [vmem:[%s4532_s17 + $0x4c] sm:$0xf]  ;;  %v3190_v5 = vld [vmem:[%s4532_s17 + $0x58] sm:$0xf0]  ;;  %v4657_v7 = vor.u32 %v3839_v62, %v3182_v0 }
  0x79   : > { %593 = vmatpush.bf16.msra.mxu1 %v4617_v46  ;;  %607 = vmatpush.bf16.msra.mxu2 %v4619_v47  ;;  %v4659_v10 = vor.u32 %v3842_v2, %v3188_v1  ;;  %v3164_v11 = vld [vmem:[%s4532_s17 + $0x20] sm:$0xf]  ;;  %v3837_v12 = vld [vmem:[%s4532_s17 + $0x2c] sm:$0xf0]  ;;  %v3835_v14 = vld [vmem:[%s4532_s17 + $0x24] sm:$0xf]  ;;  %v3193_v15 = vor.u32 %v3840_v3, %v3190_v5 }
  0x7a   : > { %621 = vmatpush.bf16.msra.mxu3 %v4625_v51  ;;  %v3166_v16 = vld [vmem:[%s4532_s17 + $0x30] sm:$0xf0]  ;;  %v3172_v19 = vld [vmem:[%s4532_s17 + $0x28] sm:$0xf]  ;;  %v3838_v20 = vld [vmem:[%s4532_s17 + $0x34] sm:$0xf0]  ;;  %v3165_v24 = vor.u32 %v3837_v12, %v3164_v11 }
  0x7b   : > { %v3836_v21 = vld [vmem:[%s4532_s17 + $0x2c] sm:$0xf]  ;;  %v3174_v23 = vld [vmem:[%s4532_s17 + $0x38] sm:$0xf0]  ;;  %v3169_v25 = vor.u32 %v3835_v14, %v3166_v16  ;;  %v3173_v27 = vor.u32 %v3838_v20, %v3172_v19  ;;  %v3148_v28 = vld [vmem:[%s4532_s17] sm:$0xf] }
  0x7c   : > { %580 = vmatpush.bf16.msra.mxu0 %v4633_v57  ;;  %v3833_v29 = vld [vmem:[%s4532_s17 + $0xc] sm:$0xf0]  ;;  %v3831_v31 = vld [vmem:[%s4532_s17 + $0x4] sm:$0xf]  ;;  %v3177_v32 = vor.u32 %v3836_v21, %v3174_v23  ;;  %v3150_v33 = vld [vmem:[%s4532_s17 + $0x10] sm:$0xf0] }
  0x7d   : > { %594 = vmatpush.bf16.msra.mxu1 %v4637_v58  ;;  %608 = vmatpush.bf16.msra.mxu2 %v4639_v59  ;;  %v3156_v36 = vld [vmem:[%s4532_s17 + $0x8] sm:$0xf]  ;;  %v3834_v37 = vld [vmem:[%s4532_s17 + $0x14] sm:$0xf0]  ;;  %v3832_v38 = vld [vmem:[%s4532_s17 + $0xc] sm:$0xf]  ;;  %v3149_v41 = vor.u32 %v3833_v29, %v3148_v28  ;;  %v3153_v42 = vor.u32 %v3831_v31, %v3150_v33 }
  0x7e   : > { %622 = vmatpush.bf16.msra.mxu3 %v4645_v63  ;;  %v3158_v40 = vld [vmem:[%s4532_s17 + $0x18] sm:$0xf0]  ;;  %v3157_v43 = vor.u32 %v3834_v37, %v3156_v36  ;;  %v3863_v48 = vld [vmem:[%s4525_s26] sm:$0xff]  ;;  %v406_v53 = vld [vmem:[#allocation2 + $0x8] sm:$0xff]  ;;  %p3280_p5 = scmp.ne.s32.totalorder %s4414_s5, 1 }
  0x7f   : > { %v3161_v44 = vor.u32 %v3832_v38, %v3158_v40  ;;  %v407_v54 = vld [vmem:[#allocation2 + $0x48] sm:$0xff]  ;;  %v650_v60 = vld [vmem:[#allocation2 + $0x20] sm:$0xff]  ;;  %v651_v1 = vld [vmem:[#allocation2 + $0x10] sm:$0xff] }
  0x80   : > { %581 = vmatpush.bf16.msra.mxu0 %v4653_v6  ;;  %v652_v2 = vld [vmem:[#allocation2 + $0x38] sm:$0xff]  ;;  %v653_v3 = vld [vmem:[#allocation2 + $0x60] sm:$0xff]  ;;  %v656_v20 = vld [vmem:[#allocation2 + $0x28] sm:$0xff] }
  0x81   : > { %595 = vmatpush.bf16.msra.mxu1 %v4657_v7  ;;  %609 = vmatpush.bf16.msra.mxu2 %v4659_v10  ;;  %v655_v19 = vld [vmem:[#allocation2 + $0x78] sm:$0xff] }
  0x82   : > { %623 = vmatpush.bf16.msra.mxu3 %v3193_v15 }
  0x84   : > { %582 = vmatpush.bf16.msra.mxu0 %v3165_v24 }
  0x85   : > { %596 = vmatpush.bf16.msra.mxu1 %v3169_v25  ;;  %610 = vmatpush.bf16.msra.mxu2 %v3173_v27 }
  0x86   : > { %624 = vmatpush.bf16.msra.mxu3 %v3177_v32 }
  0x88   : > { %583 = vmatpush.bf16.msra.mxu0 %v3149_v41 }
  0x89   : > { %597 = vmatpush.bf16.msra.mxu1 %v3153_v42  ;;  %611 = vmatpush.bf16.msra.mxu2 %v3157_v43 }
  0x8a   : > { %625 = vmatpush.bf16.msra.mxu3 %v3161_v44 }
  0x8b   : > { %584 = vmatmul.bf16.vlgmr.msra.gmra.mxu0 %v3863_v48 }
  0x8c   : > { %666 = vmatpush.bf16.msrb.mxu0 %v4551_v4  ;;  %612 = vmatmul.bf16.vlgmr.msra.gmra.mxu2 %v3863_v48  ;;  %v3864_v4 = vld [vmem:[%s4525_s26 + $0x8] sm:$0xff] }
  0x8d   : > { %680 = vmatpush.bf16.msrb.mxu1 %v4556_v8  ;;  %694 = vmatpush.bf16.msrb.mxu2 %v4558_v9  ;;  %v400_v8 = vld [vmem:[#allocation2 + $0x30] sm:$0xff]  ;;  %v401_v9 = vld [vmem:[#allocation2] sm:$0xff] }
  0x8e   : > { %708 = vmatpush.bf16.msrb.mxu3 %v4564_v13  ;;  %598 = vmatmul.bf16.vlgmr.msra.gmra.mxu1 %v3863_v48 }
  0x8f   : > { %626 = vmatmul.bf16.vlgmr.msra.gmra.mxu3 %v3863_v48 }
  0x90   : > { %667 = vmatpush.bf16.msrb.mxu0 %v4571_v17 }
  0x91   : > { %681 = vmatpush.bf16.msrb.mxu1 %v4573_v18  ;;  %695 = vmatpush.bf16.msrb.mxu2 %v4579_v22 }
  0x92   : > { %709 = vmatpush.bf16.msrb.mxu3 %v4584_v26  ;;  %v402_v26 = vld [vmem:[#allocation2 + $0x58] sm:$0xff] }
  0x94   : > { %668 = vmatpush.bf16.msrb.mxu0 %v4590_v30  ;;  %v403_v30 = vld [vmem:[#allocation2 + $0x18] sm:$0xff] }
  0x95   : > { %682 = vmatpush.bf16.msrb.mxu1 %v4597_v34  ;;  %696 = vmatpush.bf16.msrb.mxu2 %v4599_v35 }
  0x96   : > { %710 = vmatpush.bf16.msrb.mxu3 %v4605_v39 }
  0x98   : > { %669 = vmatpush.bf16.msrb.mxu0 %v4613_v45  ;;  %v404_v45 = vld [vmem:[#allocation2 + $0x50] sm:$0xff] }
  0x99   : > { %683 = vmatpush.bf16.msrb.mxu1 %v4617_v46  ;;  %697 = vmatpush.bf16.msrb.mxu2 %v4619_v47  ;;  %v405_v47 = vld [vmem:[#allocation2 + $0x68] sm:$0xff] }
  0x9a   : > { %711 = vmatpush.bf16.msrb.mxu3 %v4625_v51 }
  0x9c   : > { %670 = vmatpush.bf16.msrb.mxu0 %v4633_v57 }
  0x9d   : > { %684 = vmatpush.bf16.msrb.mxu1 %v4637_v58  ;;  %698 = vmatpush.bf16.msrb.mxu2 %v4639_v59  ;;  %v649_v59 = vld [vmem:[#allocation2 + $0x40] sm:$0xff] }
  0x9e   : > { %712 = vmatpush.bf16.msrb.mxu3 %v4645_v63 }
  0xa0   : > { %671 = vmatpush.bf16.msrb.mxu0 %v4653_v6  ;;  %v654_v6 = vld [vmem:[#allocation2 + $0x70] sm:$0xff] }
  0xa1   : > { %685 = vmatpush.bf16.msrb.mxu1 %v4657_v7  ;;  %699 = vmatpush.bf16.msrb.mxu2 %v4659_v10 }
  0xa2   : > { %713 = vmatpush.bf16.msrb.mxu3 %v3193_v15 }
  0xa4   : > { %672 = vmatpush.bf16.msrb.mxu0 %v3165_v24 }
  0xa5   : > { %686 = vmatpush.bf16.msrb.mxu1 %v3169_v25  ;;  %700 = vmatpush.bf16.msrb.mxu2 %v3173_v27 }
  0xa6   : > { %714 = vmatpush.bf16.msrb.mxu3 %v3177_v32 }
  0xa8   : > { %673 = vmatpush.bf16.msrb.mxu0 %v3149_v41 }
  0xa9   : > { %687 = vmatpush.bf16.msrb.mxu1 %v3153_v42  ;;  %701 = vmatpush.bf16.msrb.mxu2 %v3157_v43 }
  0xaa   : > { %715 = vmatpush.bf16.msrb.mxu3 %v3161_v44 }
  0xab   : > { %674 = vmatmul.bf16.vlgmr.msrb.gmra.mxu0 %v3864_v4 }
  0xac   : > { %688 = vmatmul.bf16.vlgmr.msrb.gmra.mxu1 %v3864_v4  ;;  %702 = vmatmul.bf16.vlgmr.msrb.gmra.mxu2 %v3864_v4 }
  0xad   : > { %716 = vmatmul.bf16.vlgmr.msrb.gmra.mxu3 %v3864_v4 }
 0x108   : > { %v585_v13 = vpop.f32.mrf.mxu0 }
 0x109   : > { %v632_v17 = vadd.f32 %v585_v13, %v400_v8 }
 0x10b   : > { %v599_v18 = vpop.f32.mrf.mxu1  ;;  %640 = vst [vmem:[#allocation2 + $0x30] sm:$0xff] %v632_v17 }
 0x10c   : > { %v633_v22 = vadd.f32 %v599_v18, %v401_v9 }
 0x10e   : > { %641 = vst [vmem:[#allocation2] sm:$0xff] %v633_v22 }
 0x10f   : > { %v613_v34 = vpop.f32.mrf.mxu2 }
 0x110   : > { %v634_v35 = vadd.f32 %v613_v34, %v402_v26  ;;  %v587_v49 = vpop.f32.mrf.mxu0 }
 0x111   : > { %v636_v50 = vadd.f32 %v587_v49, %v404_v45 }
 0x112   : > { %v627_v39 = vpop.f32.mrf.mxu3  ;;  %642 = vst [vmem:[#allocation2 + $0x58] sm:$0xff] %v634_v35 }
 0x113   : > { %v635_v46 = vadd.f32 %v627_v39, %v403_v30  ;;  %v601_v51 = vpop.f32.mrf.mxu1  ;;  %644 = vst [vmem:[#allocation2 + $0x50] sm:$0xff] %v636_v50 }
 0x114   : > { %v637_v52 = vadd.f32 %v601_v51, %v405_v47 }
 0x115   : > { %643 = vst [vmem:[#allocation2 + $0x18] sm:$0xff] %v635_v46 }
 0x116   : > { %645 = vst [vmem:[#allocation2 + $0x68] sm:$0xff] %v637_v52 }
 0x117   : > { %v615_v55 = vpop.f32.mrf.mxu2 }
 0x118   : > { %v638_v56 = vadd.f32 %v615_v55, %v406_v53 }
 0x11a   : > { %v629_v57 = vpop.f32.mrf.mxu3  ;;  %646 = vst [vmem:[#allocation2 + $0x8] sm:$0xff] %v638_v56 }
 0x11b   : > { %v639_v58 = vadd.f32 %v629_v57, %v407_v54 }
 0x11d   : > { %647 = vst [vmem:[#allocation2 + $0x48] sm:$0xff] %v639_v58 }
 0x128   : > { %v675_v61 = vpop.f32.mrf.mxu0 }
 0x129   : > { %v722_v62 = vadd.f32 %v675_v61, %v649_v59  ;;  %v689_v63 = vpop.f32.mrf.mxu1 }
 0x12a   : > { %v723_v0 = vadd.f32 %v689_v63, %v650_v60 }
 0x12b   : > { %730 = vst [vmem:[#allocation2 + $0x40] sm:$0xff] %v722_v62 }
 0x12c   : > { %731 = vst [vmem:[#allocation2 + $0x20] sm:$0xff] %v723_v0 }
 0x12f   : > { %v703_v5 = vpop.f32.mrf.mxu2 }
 0x130   : > { %v724_v7 = vadd.f32 %v703_v5, %v651_v1  ;;  %v717_v10 = vpop.f32.mrf.mxu3  ;;  %v677_v11 = vpop.f32.mrf.mxu0 }
 0x131   : > { %v725_v12 = vadd.f32 %v717_v10, %v652_v2  ;;  %v726_v14 = vadd.f32 %v677_v11, %v653_v3  ;;  %v691_v15 = vpop.f32.mrf.mxu1 }
 0x132   : > { %732 = vst [vmem:[#allocation2 + $0x10] sm:$0xff] %v724_v7  ;;  %v727_v16 = vadd.f32 %v691_v15, %v654_v6 }
 0x133   : > { %733 = vst [vmem:[#allocation2 + $0x38] sm:$0xff] %v725_v12 }
 0x134   : > { %734 = vst [vmem:[#allocation2 + $0x60] sm:$0xff] %v726_v14 }
 0x135   : > { %735 = vst [vmem:[#allocation2 + $0x70] sm:$0xff] %v727_v16 }
 0x137   : > { %v705_v21 = vpop.f32.mrf.mxu2  ;;  %741 = sbr.rel (%p3280_p5) target bundleno = 1817 (0x719), region = 72 }
 0x138   : > { %v728_v23 = vadd.f32 %v705_v21, %v655_v19  ;;  %v719_v24 = vpop.f32.mrf.mxu3 }
 0x139   : > { %v729_v25 = vadd.f32 %v719_v24, %v656_v20 }
 0x13a   : > { %736 = vst [vmem:[#allocation2 + $0x78] sm:$0xff] %v728_v23 }
 0x13b   : > { %737 = vst [vmem:[#allocation2 + $0x28] sm:$0xff] %v729_v25 }
 0x13c   : > { %v876_v27 = vld [vmem:[#allocation2 + $0x50] sm:$0xff]  ;;  %v877_v28 = vld [vmem:[#allocation2 + $0x68] sm:$0xff]  ;;  %v873_v33 = vld [vmem:[#allocation2] sm:$0xff]  ;;  %vm880_vm0 = vcmask 130048   ;;  %v5589_v38 = vmov 0.0625   ;;  %vm1111_vm13 = vcmask 1040384  }
 0x13d   : > { %v878_v29 = vld [vmem:[#allocation2 + $0x8] sm:$0xff]  ;;  %898 = vmatpush.msra.mxu0 %v876_v27  ;;  %918 = vmatpush.msra.mxu1 %v877_v28  ;;  %v872_v32 = vld [vmem:[#allocation2 + $0x30] sm:$0xff]  ;;  %v874_v36 = vld [vmem:[#allocation2 + $0x58] sm:$0xff]  ;;  %vm1113_vm14 = vcmask 1042434   ;;  %vm1115_vm15 = vcmask 1041408  }
 0x13e   : > { %v879_v31 = vld [vmem:[#allocation2 + $0x48] sm:$0xff]  ;;  %938 = vmatpush.msra.mxu2 %v878_v29  ;;  %v875_v37 = vld [vmem:[#allocation2 + $0x18] sm:$0xff] }
 0x13f   : > { %958 = vmatpush.msra.mxu3 %v879_v31  ;;  %899 = vmatpush.msra.mxu0 %v872_v32  ;;  %v3403_v9 = vld [vmem:[#allocation11 + $0xe0] sm:$0xf]  ;;  %v3895_v13 = vld [vmem:[#allocation11 + $0xec] sm:$0xf0] }
 0x140   : > { %919 = vmatpush.msra.mxu1 %v873_v33  ;;  %939 = vmatpush.msra.mxu2 %v874_v36  ;;  %v3531_v30 = vld [vmem:[#allocation11 + $0x1e0] sm:$0xf]  ;;  %v3927_v34 = vld [vmem:[#allocation11 + $0x1ec] sm:$0xf0]  ;;  %v4731_v45 = vor.u32 %v3895_v13, %v3403_v9 }
 0x141   : > { %959 = vmatpush.msra.mxu3 %v875_v37  ;;  %3281 = vmatmul.msk.f32.vlgmr.msra.gmra.mxu0 %vm880_vm0, %v5589_v38  ;;  %v4733_v49 = vor.u32 %v3927_v34, %v3531_v30  ;;  %v3387_v50 = vld [vmem:[#allocation11 + $0xc0] sm:$0xf]  ;;  %v3891_v51 = vld [vmem:[#allocation11 + $0xcc] sm:$0xf0] }
 0x142   : > { %3282 = vmatmul.msk.f32.vlgmr.msra.gmra.mxu1 %vm880_vm0, %v5589_v38  ;;  %3283 = vmatmul.msk.f32.vlgmr.msra.gmra.mxu2 %vm880_vm0, %v5589_v38  ;;  %v3659_v56 = vld [vmem:[#allocation11 + $0x2e0] sm:$0xf]  ;;  %v3959_v57 = vld [vmem:[#allocation11 + $0x2ec] sm:$0xf0]  ;;  %v4748_v60 = vor.u32 %v3891_v51, %v3387_v50 }
 0x143   : > { %3284 = vmatmul.msk.f32.vlgmr.msra.gmra.mxu3 %vm880_vm0, %v5589_v38  ;;  %v3787_v58 = vld [vmem:[#allocation11 + $0x3e0] sm:$0xf]  ;;  %v3991_v59 = vld [vmem:[#allocation11 + $0x3ec] sm:$0xf0]  ;;  %v4755_v3 = vor.u32 %v3959_v57, %v3659_v56 }
 0x144   : > { %v3515_v61 = vld [vmem:[#allocation11 + $0x1c0] sm:$0xf]  ;;  %v3923_v0 = vld [vmem:[#allocation11 + $0x1cc] sm:$0xf0]  ;;  %v4761_v7 = vor.u32 %v3991_v59, %v3787_v58 }
 0x145   : > { %v3371_v1 = vld [vmem:[#allocation11 + $0xa0] sm:$0xf]  ;;  %v3887_v2 = vld [vmem:[#allocation11 + $0xac] sm:$0xf0]  ;;  %v4764_v11 = vor.u32 %v3923_v0, %v3515_v61 }
 0x146   : > { %v3643_v10 = vld [vmem:[#allocation11 + $0x2c0] sm:$0xf]  ;;  %v3955_v12 = vld [vmem:[#allocation11 + $0x2cc] sm:$0xf0]  ;;  %v4766_v16 = vor.u32 %v3887_v2, %v3371_v1 }
 0x147   : > { %v3771_v14 = vld [vmem:[#allocation11 + $0x3c0] sm:$0xf]  ;;  %v3987_v15 = vld [vmem:[#allocation11 + $0x3cc] sm:$0xf0]  ;;  %v4774_v21 = vor.u32 %v3955_v12, %v3643_v10 }
 0x148   : > { %v3499_v19 = vld [vmem:[#allocation11 + $0x1a0] sm:$0xf]  ;;  %v3919_v20 = vld [vmem:[#allocation11 + $0x1ac] sm:$0xf0]  ;;  %v4776_v23 = vor.u32 %v3987_v15, %v3771_v14 }
 0x149   : > { %v3627_v24 = vld [vmem:[#allocation11 + $0x2a0] sm:$0xf]  ;;  %v4780_v25 = vor.u32 %v3919_v20, %v3499_v19  ;;  %v3879_v30 = vld [vmem:[#allocation11 + $0x6c] sm:$0xf0] }
 0x14a   : > { %5711 = vst [vmem:[#allocation18_spill] sm:$0xff] %v4776_v23  ;;  %v3467_v34 = vld [vmem:[#allocation11 + $0x160] sm:$0xf]  ;;  %v3975_v57 = vld [vmem:[#allocation11 + $0x36c] sm:$0xf0] }
 0x14b   : > { %v3723_v56 = vld [vmem:[#allocation11 + $0x360] sm:$0xf]  ;;  %v3875_v61 = vld [vmem:[#allocation11 + $0x4c] sm:$0xf0] }
 0x14c   : > { %v4810_v58 = vor.u32 %v3975_v57, %v3723_v56  ;;  %v3323_v59 = vld [vmem:[#allocation11 + $0x40] sm:$0xf]  ;;  %v3907_v0 = vld [vmem:[#allocation11 + $0x14c] sm:$0xf0] }
 0x14d   : > { %v3579_v1 = vld [vmem:[#allocation11 + $0x240] sm:$0xf]  ;;  %v3939_v2 = vld [vmem:[#allocation11 + $0x24c] sm:$0xf0] }
 0x14e   : > { %5714 = vst [vmem:[#allocation21_spill] sm:$0xff] %v4810_v58  ;;  %v3707_v10 = vld [vmem:[#allocation11 + $0x340] sm:$0xf]  ;;  %v3971_v12 = vld [vmem:[#allocation11 + $0x34c] sm:$0xf0] }
 0x14f   : > { %v4822_v14 = vor.u32 %v3971_v12, %v3707_v10  ;;  %v3307_v15 = vld [vmem:[#allocation11 + $0x20] sm:$0xf]  ;;  %v3871_v19 = vld [vmem:[#allocation11 + $0x2c] sm:$0xf0]  ;;  %v3957_v12 = vld [vmem:[#allocation11 + $0x2e4] sm:$0xf] }
 0x150   : > { %v3435_v20 = vld [vmem:[#allocation11 + $0x120] sm:$0xf]  ;;  %v3963_v57 = vld [vmem:[#allocation11 + $0x30c] sm:$0xf0] }
 0x151   : > { %5715 = vst [vmem:[#allocation22_spill] sm:$0xff] %v4822_v14  ;;  %v3675_v56 = vld [vmem:[#allocation11 + $0x300] sm:$0xf] }
 0x1be   : > { %v901_v40 = vpop.f32.mrf.mxu0 }
 0x1bf   : > { %v921_v41 = vpop.f32.mrf.mxu1  ;;  %v964_v42 = vperm.slane %v901_v40, 0 }
 0x1c0   : > { %v965_v43 = vperm.slane %v921_v41, 0  ;;  %v3915_v41 = vld [vmem:[#allocation11 + $0x18c] sm:$0xf0] }
 0x1c1   : > { %v4715_v44 = vsub.f32 %v872_v32, %v964_v42  ;;  %v4717_v48 = vsub.f32 %v876_v27, %v964_v42  ;;  %v3951_v27 = vld [vmem:[#allocation11 + $0x2ac] sm:$0xf0]  ;;  %v3611_v42 = vld [vmem:[#allocation11 + $0x280] sm:$0xf] }
 0x1c2   : > { %v4719_v4 = vsub.f32 %v873_v33, %v965_v43  ;;  %v4721_v8 = vsub.f32 %v877_v28, %v965_v43  ;;  %v3755_v28 = vld [vmem:[#allocation11 + $0x3a0] sm:$0xf]  ;;  %v3947_v43 = vld [vmem:[#allocation11 + $0x28c] sm:$0xf0] }
 0x1c3   : > { %v980_v17 = vmul.f32 %v4717_v48, %v4717_v48  ;;  %v976_v22 = vmul.f32 %v4715_v44, %v4715_v44  ;;  %v3355_v33 = vld [vmem:[#allocation11 + $0x80] sm:$0xf]  ;;  %v4795_v13 = vor.u32 %v3947_v43, %v3611_v42 }
 0x1c4   : > { %v981_v18 = vmul.f32 %v4721_v8, %v4721_v8  ;;  %v977_v26 = vmul.f32 %v4719_v4, %v4719_v4  ;;  %v3291_v43 = vld [vmem:[#allocation11] sm:$0xf] }
 0x1c5   : > { %v941_v35 = vpop.f32.mrf.mxu2  ;;  %998 = vmatpush.msrb.mxu0 %v980_v17  ;;  %v3739_v17 = vld [vmem:[#allocation11 + $0x380] sm:$0xf] }
 0x1c6   : > { %v961_v39 = vpop.f32.mrf.mxu3  ;;  %1018 = vmatpush.msrb.mxu1 %v981_v18  ;;  %v966_v46 = vperm.slane %v941_v35, 0  ;;  %v3979_v18 = vld [vmem:[#allocation11 + $0x38c] sm:$0xf0] }
 0x1c7   : > { %v967_v47 = vperm.slane %v961_v39, 0  ;;  %999 = vmatpush.msrb.mxu0 %v976_v22  ;;  %v4798_v22 = vor.u32 %v3979_v18, %v3739_v17  ;;  %v3911_v39 = vld [vmem:[#allocation11 + $0x16c] sm:$0xf0]  ;;  %v3419_v18 = vld [vmem:[#allocation11 + $0x100] sm:$0xf] }
 0x1c8   : > { %1019 = vmatpush.msrb.mxu1 %v977_v26  ;;  %v4735_v52 = vsub.f32 %v874_v36, %v966_v46  ;;  %v4737_v53 = vsub.f32 %v878_v29, %v966_v46  ;;  %3285 = vmatmul.msk.f32.vlgmr.msrb.gmra.mxu0 %vm880_vm0, %v5589_v38  ;;  %v3983_v29 = vld [vmem:[#allocation11 + $0x3ac] sm:$0xf0]  ;;  %v3339_v26 = vld [vmem:[#allocation11 + $0x60] sm:$0xf]  ;;  %v4805_v50 = vor.u32 %v3911_v39, %v3467_v34 }
 0x1c9   : > { %v4739_v54 = vsub.f32 %v875_v37, %v967_v47  ;;  %v4741_v55 = vsub.f32 %v879_v31, %v967_v47  ;;  %3286 = vmatmul.msk.f32.vlgmr.msrb.gmra.mxu1 %vm880_vm0, %v5589_v38  ;;  %1805 = vmatpush.bf16.msra.mxu0 %v4731_v45  ;;  %v4784_v31 = vor.u32 %v3951_v27, %v3627_v24  ;;  %v3883_v36 = vld [vmem:[#allocation11 + $0x8c] sm:$0xf0]  ;;  %v3483_v37 = vld [vmem:[#allocation11 + $0x180] sm:$0xf] }
 0x1ca   : > { %v982_v62 = vmul.f32 %v4737_v53, %v4737_v53  ;;  %1819 = vmatpush.bf16.msra.mxu1 %v4733_v49  ;;  %v978_v5 = vmul.f32 %v4735_v52, %v4735_v52  ;;  %v4786_v32 = vor.u32 %v3983_v29, %v3755_v28  ;;  %v4791_v40 = vor.u32 %v3883_v36, %v3355_v33  ;;  %v3595_v46 = vld [vmem:[#allocation11 + $0x260] sm:$0xf]  ;;  %v3943_v47 = vld [vmem:[#allocation11 + $0x26c] sm:$0xf0] }
 0x1cb   : > { %v983_v63 = vmul.f32 %v4741_v55, %v4741_v55  ;;  %v979_v6 = vmul.f32 %v4739_v54, %v4739_v54  ;;  %v4793_v9 = vor.u32 %v3915_v41, %v3483_v37  ;;  %5713 = vst [vmem:[#allocation20_spill] sm:$0xff] %v4798_v22  ;;  %v4803_v35 = vor.u32 %v3879_v30, %v3339_v26  ;;  %v3903_v27 = vld [vmem:[#allocation11 + $0x12c] sm:$0xf0]  ;;  %v3563_v28 = vld [vmem:[#allocation11 + $0x220] sm:$0xf] }
 0x1cc   : > { %1038 = vmatpush.msrb.mxu2 %v982_v62  ;;  %5712 = vst [vmem:[#allocation19_spill] sm:$0xff] %v4786_v32  ;;  %v4807_v51 = vor.u32 %v3943_v47, %v3595_v46  ;;  %v3451_v62 = vld [vmem:[#allocation11 + $0x140] sm:$0xf]  ;;  %v4827_v24 = vor.u32 %v3871_v19, %v3307_v15  ;;  %v3935_v29 = vld [vmem:[#allocation11 + $0x22c] sm:$0xf0]  ;;  %v4829_v33 = vor.u32 %v3903_v27, %v3435_v20 }
 0x1cd   : > { %1058 = vmatpush.msrb.mxu3 %v983_v63  ;;  %1806 = vmatpush.bf16.msra.mxu0 %v4748_v60  ;;  %v4815_v63 = vor.u32 %v3875_v61, %v3323_v59  ;;  %v4831_v36 = vor.u32 %v3935_v29, %v3563_v28  ;;  %v3691_v37 = vld [vmem:[#allocation11 + $0x320] sm:$0xf]  ;;  %v3967_v41 = vld [vmem:[#allocation11 + $0x32c] sm:$0xf0]  ;;  %v3893_v59 = vld [vmem:[#allocation11 + $0xe4] sm:$0xf]  ;;  %v4846_v61 = vor.u32 %v3963_v57, %v3675_v56 }
 0x1ce   : > { %1039 = vmatpush.msrb.mxu2 %v978_v5  ;;  %1820 = vmatpush.bf16.msra.mxu1 %v4764_v11  ;;  %v4817_v5 = vor.u32 %v3907_v0, %v3451_v62  ;;  %v4834_v42 = vor.u32 %v3967_v41, %v3691_v37  ;;  %v3867_v17 = vld [vmem:[#allocation11 + $0xc] sm:$0xf0]  ;;  %v3547_v34 = vld [vmem:[#allocation11 + $0x200] sm:$0xf]  ;;  %v3405_v62 = vld [vmem:[#allocation11 + $0xf0] sm:$0xf0] }
 0x1cf   : > { %1059 = vmatpush.msrb.mxu3 %v979_v6  ;;  %3287 = vmatmul.msk.f32.vlgmr.msrb.gmra.mxu2 %vm880_vm0, %v5589_v38  ;;  %v4819_v6 = vor.u32 %v3939_v2, %v3579_v1  ;;  %v4839_v26 = vor.u32 %v3867_v17, %v3291_v43  ;;  %v3899_v30 = vld [vmem:[#allocation11 + $0x10c] sm:$0xf0]  ;;  %5717 = vst [vmem:[#allocation24_spill] sm:$0xff] %v4846_v61  ;;  %v3925_v0 = vld [vmem:[#allocation11 + $0x1e4] sm:$0xf] }
 0x1d0   : > { %3288 = vmatmul.msk.f32.vlgmr.msrb.gmra.mxu3 %vm880_vm0, %v5589_v38  ;;  %1833 = vmatpush.bf16.msra.mxu2 %v4755_v3  ;;  %5716 = vst [vmem:[#allocation23_spill] sm:$0xff] %v4834_v42  ;;  %v3931_v39 = vld [vmem:[#allocation11 + $0x20c] sm:$0xf0]  ;;  %v4841_v46 = vor.u32 %v3899_v30, %v3419_v18  ;;  %v3533_v1 = vld [vmem:[#allocation11 + $0x1f0] sm:$0xf0]  ;;  %v4850_v2 = vor.u32 %v3893_v59, %v3405_v62 }
 0x1d1   : > { %1847 = vmatpush.bf16.msra.mxu3 %v4761_v7  ;;  %1807 = vmatpush.bf16.msra.mxu0 %v4766_v16  ;;  %v4843_v47 = vor.u32 %v3931_v39, %v3547_v34  ;;  %v4852_v10 = vor.u32 %v3925_v0, %v3533_v1  ;;  %v3661_v15 = vld [vmem:[#allocation11 + $0x2f0] sm:$0xf0]  ;;  %v3989_v20 = vld [vmem:[#allocation11 + $0x3e4] sm:$0xf] }
 0x1d2   : > { %1821 = vmatpush.bf16.msra.mxu1 %v4780_v25  ;;  %v4855_v19 = vor.u32 %v3957_v12, %v3661_v15  ;;  %v3789_v27 = vld [vmem:[#allocation11 + $0x3f0] sm:$0xf0]  ;;  %v3889_v28 = vld [vmem:[#allocation11 + $0xc4] sm:$0xf] }
 0x1d3   : > { %v4859_v29 = vor.u32 %v3989_v20, %v3789_v27  ;;  %v3389_v37 = vld [vmem:[#allocation11 + $0xd0] sm:$0xf0]  ;;  %v3921_v41 = vld [vmem:[#allocation11 + $0x1c4] sm:$0xf] }
 0x1d4   : > { %1834 = vmatpush.bf16.msra.mxu2 %v4774_v21  ;;  %5718 = vst [vmem:[#allocation25_spill] sm:$0xff] %v4855_v19  ;;  %v3517_v43 = vld [vmem:[#allocation11 + $0x1d0] sm:$0xf0]  ;;  %v4862_v17 = vor.u32 %v3889_v28, %v3389_v37  ;;  %v3953_v30 = vld [vmem:[#allocation11 + $0x2c4] sm:$0xf] }
 0x1d5   : > { %1848 = vmatpush.bf16.msra.mxu3 %v4776_v23  ;;  %1808 = vmatpush.bf16.msra.mxu0 %v4791_v40  ;;  %5719 = vst [vmem:[#allocation26_spill] sm:$0xff] %v4859_v29  ;;  %v4864_v18 = vor.u32 %v3921_v41, %v3517_v43  ;;  %v3645_v34 = vld [vmem:[#allocation11 + $0x2d0] sm:$0xf0]  ;;  %v3985_v39 = vld [vmem:[#allocation11 + $0x3c4] sm:$0xf] }
 0x1d6   : > { %1822 = vmatpush.bf16.msra.mxu1 %v4793_v9  ;;  %v4867_v56 = vor.u32 %v3953_v30, %v3645_v34  ;;  %v3773_v57 = vld [vmem:[#allocation11 + $0x3d0] sm:$0xf0]  ;;  %v3885_v62 = vld [vmem:[#allocation11 + $0xa4] sm:$0xf] }
 0x1d7   : > { %v4869_v59 = vor.u32 %v3985_v39, %v3773_v57  ;;  %v3373_v0 = vld [vmem:[#allocation11 + $0xb0] sm:$0xf0]  ;;  %v3917_v1 = vld [vmem:[#allocation11 + $0x1a4] sm:$0xf] }
 0x1d8   : > { %1835 = vmatpush.bf16.msra.mxu2 %v4784_v31  ;;  %5720 = vst [vmem:[#allocation27_spill] sm:$0xff] %v4867_v56  ;;  %v4873_v12 = vor.u32 %v3885_v62, %v3373_v0  ;;  %v3501_v15 = vld [vmem:[#allocation11 + $0x1b0] sm:$0xf0]  ;;  %v3949_v20 = vld [vmem:[#allocation11 + $0x2a4] sm:$0xf] }
 0x1d9   : > { %1849 = vmatpush.bf16.msra.mxu3 %v4786_v32  ;;  %1809 = vmatpush.bf16.msra.mxu0 %v4803_v35  ;;  %5721 = vst [vmem:[#allocation28_spill] sm:$0xff] %v4869_v59  ;;  %v3629_v27 = vld [vmem:[#allocation11 + $0x2b0] sm:$0xf0]  ;;  %v4876_v28 = vor.u32 %v3917_v1, %v3501_v15  ;;  %v3981_v41 = vld [vmem:[#allocation11 + $0x3a4] sm:$0xf] }
 0x1da   : > { %1823 = vmatpush.bf16.msra.mxu1 %v4805_v50  ;;  %5722 = vst [vmem:[#allocation29_spill] sm:$0xff] %v4873_v12  ;;  %v4878_v37 = vor.u32 %v3949_v20, %v3629_v27  ;;  %v3757_v43 = vld [vmem:[#allocation11 + $0x3b0] sm:$0xf0]  ;;  %v3881_v34 = vld [vmem:[#allocation11 + $0x84] sm:$0xf] }
 0x1db   : > { %v4881_v30 = vor.u32 %v3981_v41, %v3757_v43  ;;  %v3357_v39 = vld [vmem:[#allocation11 + $0x90] sm:$0xf0]  ;;  %v3913_v57 = vld [vmem:[#allocation11 + $0x184] sm:$0xf] }
 0x1dc   : > { %1836 = vmatpush.bf16.msra.mxu2 %v4795_v13  ;;  %5723 = vst [vmem:[#allocation30_spill] sm:$0xff] %v4878_v37  ;;  %v4885_v0 = vor.u32 %v3881_v34, %v3357_v39  ;;  %v3485_v1 = vld [vmem:[#allocation11 + $0x190] sm:$0xf0]  ;;  %v3945_v15 = vld [vmem:[#allocation11 + $0x284] sm:$0xf] }
 0x1dd   : > { %1850 = vmatpush.bf16.msra.mxu3 %v4798_v22  ;;  %1810 = vmatpush.bf16.msra.mxu0 %v4815_v63  ;;  %5724 = vst [vmem:[#allocation31_spill] sm:$0xff] %v4881_v30  ;;  %v3613_v20 = vld [vmem:[#allocation11 + $0x290] sm:$0xf0]  ;;  %v4888_v38 = vor.u32 %v3913_v57, %v3485_v1  ;;  %v3977_v43 = vld [vmem:[#allocation11 + $0x384] sm:$0xf] }
 0x1de   : > { %1824 = vmatpush.bf16.msra.mxu1 %v4817_v5  ;;  %5725 = vst [vmem:[#allocation32_spill] sm:$0xff] %v4885_v0  ;;  %v4890_v41 = vor.u32 %v3945_v15, %v3613_v20  ;;  %v3877_v39 = vld [vmem:[#allocation11 + $0x64] sm:$0xf]  ;;  %v3469_v15 = vld [vmem:[#allocation11 + $0x170] sm:$0xf0] }
 0x1df   : > { %5726 = vst [vmem:[#allocation33_spill] sm:$0xff] %v4888_v38  ;;  %v3909_v1 = vld [vmem:[#allocation11 + $0x164] sm:$0xf]  ;;  %v3581_v22 = vld [vmem:[#allocation11 + $0x250] sm:$0xf0] }
 0x1e0   : > { %1837 = vmatpush.bf16.msra.mxu2 %v4807_v51  ;;  %5727 = vst [vmem:[#allocation34_spill] sm:$0xff] %v4890_v41  ;;  %v3941_v20 = vld [vmem:[#allocation11 + $0x264] sm:$0xf]  ;;  %v3437_v32 = vld [vmem:[#allocation11 + $0x130] sm:$0xf0] }
 0x1e1   : > { %1851 = vmatpush.bf16.msra.mxu3 %v4810_v58  ;;  %1811 = vmatpush.bf16.msra.mxu0 %v4827_v24  ;;  %v3905_v58 = vld [vmem:[#allocation11 + $0x144] sm:$0xf] }
 0x1e2   : > { %1825 = vmatpush.bf16.msra.mxu1 %v4829_v33  ;;  %v3865_v23 = vld [vmem:[#allocation11 + $0x4] sm:$0xf] }
 0x1e4   : > { %1838 = vmatpush.bf16.msra.mxu2 %v4819_v6 }
 0x1e5   : > { %1852 = vmatpush.bf16.msra.mxu3 %v4822_v14  ;;  %1812 = vmatpush.bf16.msra.mxu0 %v4839_v26 }
 0x1e6   : > { %1826 = vmatpush.bf16.msra.mxu1 %v4841_v46 }
 0x1e8   : > { %1839 = vmatpush.bf16.msra.mxu2 %v4831_v36 }
 0x1e9   : > { %1853 = vmatpush.bf16.msra.mxu3 %v4834_v42  ;;  %1861 = vmatpush.bf16.msrb.mxu0 %v4850_v2  ;;  %v3341_v42 = vld [vmem:[#allocation11 + $0x70] sm:$0xf0] }
 0x1ea   : > { %1875 = vmatpush.bf16.msrb.mxu1 %v4852_v10  ;;  %v4902_v57 = vor.u32 %v3877_v39, %v3341_v42  ;;  %v3873_v42 = vld [vmem:[#allocation11 + $0x44] sm:$0xf]  ;;  %v3325_v39 = vld [vmem:[#allocation11 + $0x50] sm:$0xf0] }
 0x1ec   : > { %1840 = vmatpush.bf16.msra.mxu2 %v4843_v47  ;;  %5729 = vst [vmem:[#allocation36_spill] sm:$0xff] %v4902_v57 }
 0x1ed   : > { %1854 = vmatpush.bf16.msra.mxu3 %v4846_v61  ;;  %1862 = vmatpush.bf16.msrb.mxu0 %v4862_v17 }
 0x1ee   : > { %1876 = vmatpush.bf16.msrb.mxu1 %v4864_v18 }
 0x1f0   : > { %1889 = vmatpush.bf16.msrb.mxu2 %v4855_v19 }
 0x1f1   : > { %1903 = vmatpush.bf16.msrb.mxu3 %v4859_v29  ;;  %1863 = vmatpush.bf16.msrb.mxu0 %v4873_v12 }
 0x1f2   : > { %1877 = vmatpush.bf16.msrb.mxu1 %v4876_v28 }
 0x1f4   : > { %1890 = vmatpush.bf16.msrb.mxu2 %v4867_v56 }
 0x1f5   : > { %1904 = vmatpush.bf16.msrb.mxu3 %v4869_v59  ;;  %v3741_v59 = vld [vmem:[#allocation11 + $0x390] sm:$0xf0]  ;;  %1864 = vmatpush.bf16.msrb.mxu0 %v4885_v0 }
 0x1f6   : > { %v4895_v61 = vor.u32 %v3977_v43, %v3741_v59  ;;  %1878 = vmatpush.bf16.msrb.mxu1 %v4888_v38  ;;  %v3597_v59 = vld [vmem:[#allocation11 + $0x270] sm:$0xf0] }
 0x1f7   : > { %v4908_v43 = vor.u32 %v3941_v20, %v3597_v59  ;;  %v3293_v38 = vld [vmem:[#allocation11 + $0x10] sm:$0xf0] }
 0x1f8   : > { %1891 = vmatpush.bf16.msrb.mxu2 %v4878_v37  ;;  %5728 = vst [vmem:[#allocation35_spill] sm:$0xff] %v4895_v61 }
 0x1f9   : > { %1905 = vmatpush.bf16.msrb.mxu3 %v4881_v30  ;;  %5731 = vst [vmem:[#allocation38_spill] sm:$0xff] %v4908_v43  ;;  %v3725_v30 = vld [vmem:[#allocation11 + $0x370] sm:$0xf0]  ;;  %1865 = vmatpush.bf16.msrb.mxu0 %v4902_v57 }
 0x1fc   : > { %1892 = vmatpush.bf16.msrb.mxu2 %v4890_v41  ;;  %v3937_v41 = vld [vmem:[#allocation11 + $0x244] sm:$0xf] }
 0x1fd   : > { %1906 = vmatpush.bf16.msrb.mxu3 %v4895_v61  ;;  %v4920_v59 = vor.u32 %v3937_v41, %v3581_v22  ;;  %v3869_v61 = vld [vmem:[#allocation11 + $0x24] sm:$0xf] }
 0x1ff   : > { %5735 = vst [vmem:[#allocation42_spill] sm:$0xff] %v4920_v59 }
 0x200   : > { %1893 = vmatpush.bf16.msrb.mxu2 %v4908_v43  ;;  %v3933_v43 = vld [vmem:[#allocation11 + $0x224] sm:$0xf] }
 0x204   : > { %1894 = vmatpush.bf16.msrb.mxu2 %v4920_v59 }
 0x245   : > { %v1001_v62 = vpop.f32.mrf.mxu0 }
 0x246   : > { %v1021_v27 = vpop.f32.mrf.mxu1  ;;  %v4897_v34 = vadd.f32 1e-05, %v1001_v62  ;;  %v3973_v62 = vld [vmem:[#allocation11 + $0x364] sm:$0xf] }
 0x247   : > { %v4892_v29 = vadd.f32 1e-05, %v1021_v27  ;;  %v4905_v27 = vor.u32 %v3909_v1, %v3469_v15  ;;  %v4911_v14 = vor.u32 %v3973_v62, %v3725_v30  ;;  %v4915_v1 = vor.u32 %v3873_v42, %v3325_v39  ;;  %v3453_v15 = vld [vmem:[#allocation11 + $0x150] sm:$0xf0]  ;;  %v3969_v30 = vld [vmem:[#allocation11 + $0x344] sm:$0xf] }
 0x248   : > { %v4918_v20 = vor.u32 %v3905_v58, %v3453_v15  ;;  %v3709_v62 = vld [vmem:[#allocation11 + $0x350] sm:$0xf0]  ;;  %v3901_v39 = vld [vmem:[#allocation11 + $0x124] sm:$0xf]  ;;  %vm1070_vm3 = vweird.f32 %v4897_v34 }
 0x249   : > { %4084 = vrsqrt.f32 %v4892_v29  ;;  %5730 = vst [vmem:[#allocation37_spill] sm:$0xff] %v4905_v27  ;;  %1879 = vmatpush.bf16.msrb.mxu1 %v4905_v27  ;;  %1907 = vmatpush.bf16.msrb.mxu3 %v4911_v14  ;;  %v4925_v57 = vor.u32 %v3969_v30, %v3709_v62  ;;  %v3309_v42 = vld [vmem:[#allocation11 + $0x30] sm:$0xf0]  ;;  %v4933_v41 = vor.u32 %v3901_v39, %v3437_v32  ;;  %v3965_v15 = vld [vmem:[#allocation11 + $0x324] sm:$0xf]  ;;  %vm1080_vm1 = vweird.f32 %v4892_v29 }
 0x24a   : > { %4086 = vrsqrt.f32 %v4897_v34  ;;  %5732 = vst [vmem:[#allocation39_spill] sm:$0xff] %v4911_v14  ;;  %v3565_v58 = vld [vmem:[#allocation11 + $0x230] sm:$0xf0]  ;;  %1866 = vmatpush.bf16.msrb.mxu0 %v4915_v1  ;;  %v4931_v22 = vor.u32 %v3869_v61, %v3309_v42  ;;  %v3897_v61 = vld [vmem:[#allocation11 + $0x104] sm:$0xf] }
 0x24b   : > { %5733 = vst [vmem:[#allocation40_spill] sm:$0xff] %v4915_v1  ;;  %v3693_v14 = vld [vmem:[#allocation11 + $0x330] sm:$0xf0]  ;;  %v4938_v56 = vor.u32 %v3933_v43, %v3565_v58  ;;  %v3929_v39 = vld [vmem:[#allocation11 + $0x204] sm:$0xf]  ;;  %v4948_v43 = vor.u32 %v3865_v23, %v3293_v38 }
 0x24c   : > { %5734 = vst [vmem:[#allocation41_spill] sm:$0xff] %v4918_v20  ;;  %v4942_v32 = vor.u32 %v3965_v15, %v3693_v14  ;;  %v3421_v42 = vld [vmem:[#allocation11 + $0x110] sm:$0xf0]  ;;  %v3961_v58 = vld [vmem:[#allocation11 + $0x304] sm:$0xf] }
 0x24d   : > { %5736 = vst [vmem:[#allocation43_spill] sm:$0xff] %v4925_v57  ;;  %1880 = vmatpush.bf16.msrb.mxu1 %v4918_v20  ;;  %1908 = vmatpush.bf16.msrb.mxu3 %v4925_v57  ;;  %v4951_v14 = vor.u32 %v3897_v61, %v3421_v42  ;;  %v3677_v15 = vld [vmem:[#allocation11 + $0x310] sm:$0xf0] }
 0x24e   : > { %5737 = vst [vmem:[#allocation44_spill] sm:$0xff] %v4931_v22  ;;  %1867 = vmatpush.bf16.msrb.mxu0 %v4931_v22  ;;  %1895 = vmatpush.bf16.msrb.mxu2 %v4938_v56  ;;  %v4956_v57 = vor.u32 %v3961_v58, %v3677_v15 }
 0x24f   : > { %v4922_v37 = vpop.eup %4084  ;;  %5738 = vst [vmem:[#allocation45_spill] sm:$0xff] %v4933_v41 }
 0x250   : > { %v1075_v27 = vmul.f32 %v4922_v37, %v4892_v29  ;;  %v4935_v30 = vpop.eup %4086  ;;  %5739 = vst [vmem:[#allocation46_spill] sm:$0xff] %v4938_v56  ;;  %vm1081_vm2 = vweird.f32 %v4922_v37 }
 0x251   : > { %5740 = vst [vmem:[#allocation47_spill] sm:$0xff] %v4942_v32  ;;  %v1065_v19 = vmul.f32 %v4935_v30, %v4897_v34  ;;  %1881 = vmatpush.bf16.msrb.mxu1 %v4933_v41  ;;  %1909 = vmatpush.bf16.msrb.mxu3 %v4942_v32  ;;  %vm1071_vm4 = vweird.f32 %v4935_v30  ;;  %vm1082_vm5 = vmor %vm1080_vm1, %vm1081_vm2 }
 0x252   : > { %v1041_v62 = vpop.f32.mrf.mxu2  ;;  %v1076_v1 = vmul.f32 %v4922_v37, %v1075_v27  ;;  %5741 = vst [vmem:[#allocation48_spill] sm:$0xff] %v4948_v43  ;;  %v3549_v27 = vld [vmem:[#allocation11 + $0x210] sm:$0xf0]  ;;  %1868 = vmatpush.bf16.msrb.mxu0 %v4948_v43  ;;  %vm4969_vm8 = vmor %vm1070_vm3, %vm1071_vm4 }
 0x253   : > { %v1061_v0 = vpop.f32.mrf.mxu3  ;;  %v1042_v12 = vadd.f32 1e-05, %v1041_v62  ;;  %5742 = vst [vmem:[#allocation49_spill] sm:$0xff] %v4951_v14  ;;  %v1066_v59 = vmul.f32 %v4935_v30, %v1065_v19 }
 0x254   : > { %v1062_v20 = vadd.f32 1e-05, %v1061_v0  ;;  %v4953_v0 = vor.u32 %v3929_v39, %v3549_v27  ;;  %v1077_v62 = vmul.f32 0.5, %v1076_v1  ;;  %5744 = vst [vmem:[#allocation51_spill] sm:$0xff] %v4956_v57 }
 0x255   : > { %4088 = vrsqrt.f32 %v1042_v12  ;;  %1882 = vmatpush.bf16.msrb.mxu1 %v4951_v14  ;;  %1910 = vmatpush.bf16.msrb.mxu3 %v4956_v57  ;;  %v1067_v39 = vmul.f32 0.5, %v1066_v59  ;;  %vm1090_vm9 = vweird.f32 %v1042_v12 }
 0x256   : > { %4090 = vrsqrt.f32 %v1062_v20  ;;  %5743 = vst [vmem:[#allocation50_spill] sm:$0xff] %v4953_v0  ;;  %1896 = vmatpush.bf16.msrb.mxu2 %v4953_v0  ;;  %v1078_v23 = vsub.f32 1.5, %v1077_v62  ;;  %vm1100_vm11 = vweird.f32 %v1062_v20 }
 0x257   : > { %v1068_v32 = vsub.f32 1.5, %v1067_v39 }
 0x258   : > { %v1079_v58 = vmul.f32 %v4922_v37, %v1078_v23 }
 0x259   : > { %v1069_v39 = vmul.f32 %v4935_v30, %v1068_v32 }
 0x25a   : > { %v1083_v59 = vsel %vm1082_vm5, %v4922_v37, %v1079_v58 }
 0x25b   : > { %v4089_v38 = vpop.eup %4088  ;;  %v1073_v58 = vsel %vm4969_vm8, %v4935_v30, %v1069_v39 }
 0x25c   : > { %v4091_v61 = vpop.eup %4090  ;;  %v1085_v42 = vmul.f32 %v4089_v38, %v1042_v12  ;;  %vm1091_vm6 = vweird.f32 %v4089_v38 }
 0x25d   : > { %v1095_v1 = vmul.f32 %v4091_v61, %v1062_v20  ;;  %vm1101_vm7 = vweird.f32 %v4091_v61  ;;  %vm1092_vm10 = vmor %vm1090_vm9, %vm1091_vm6 }
 0x25e   : > { %v1086_v27 = vmul.f32 %v4089_v38, %v1085_v42  ;;  %vm1102_vm12 = vmor %vm1100_vm11, %vm1101_vm7 }
 0x25f   : > { %v1096_v19 = vmul.f32 %v4091_v61, %v1095_v1  ;;  %v1108_v1 = vrot.slane %v1083_v59, 7 }
 0x260   : > { %v1087_v15 = vmul.f32 0.5, %v1086_v27 }
 0x261   : > { %v1097_v62 = vmul.f32 0.5, %v1096_v19  ;;  %v1112_v12 = vsel %vm1111_vm13, %v1073_v58, %v1108_v1 }
 0x262   : > { %v1088_v57 = vsub.f32 1.5, %v1087_v15 }
 0x263   : > { %v1098_v42 = vsub.f32 1.5, %v1097_v62  ;;  %v871_v62 = vld [vmem:[#allocation9] sm:$0xf] }
 0x264   : > { %v1089_v29 = vmul.f32 %v4089_v38, %v1088_v57  ;;  %v870_v57 = vld [vmem:[#allocation8] sm:$0xf]  ;;  %v4980_v59 = vperm.slane %v871_v62, 0  ;;  %v4986_v30 = vperm.slane %v871_v62, 3 }
 0x265   : > { %v1099_v34 = vmul.f32 %v4091_v61, %v1098_v42  ;;  %v4982_v42 = vperm.slane %v871_v62, 1 }
 0x266   : > { %v1093_v27 = vsel %vm1092_vm10, %v4089_v38, %v1089_v29  ;;  %5747 = vst [vmem:[#allocation52_spill] sm:$0xff] %v4980_v59 }
 0x267   : > { %v1109_v19 = vrot.slane %v1093_v27, 6  ;;  %v1103_v15 = vsel %vm1102_vm12, %v4091_v61, %v1099_v34  ;;  %5748 = vst [vmem:[#allocation53_spill] sm:$0xff] %v4982_v42 }
 0x268   : > { %v1110_v37 = vrot.slane %v1103_v15, 5  ;;  %v4984_v15 = vperm.slane %v871_v62, 2  ;;  %5750 = vst [vmem:[#allocation55_spill] sm:$0xff] %v4986_v30 }
 0x26a   : > { %v1114_v32 = vsel %vm1113_vm14, %v1109_v19, %v1110_v37  ;;  %5749 = vst [vmem:[#allocation54_spill] sm:$0xff] %v4984_v15 }
 0x26b   : > { %v1116_v20 = vsel %vm1115_vm15, %v1112_v12, %v1114_v32  ;;  %v3411_v32 = vld [vmem:[#allocation11 + $0xe8] sm:$0xf] }
 0x26c   : > { %v1118_v38 = vmul.f32 %v1116_v20, %v870_v57 }
 0x26e   : > { %v1120_v61 = vperm.slane %v1118_v38, 0  ;;  %v1121_v29 = vperm.slane %v1118_v38, 1  ;;  %v1122_v34 = vperm.slane %v1118_v38, 2  ;;  %v1123_v27 = vperm.slane %v1118_v38, 3  ;;  %v3539_v38 = vld [vmem:[#allocation11 + $0x1e8] sm:$0xf] }
 0x270   : > { %v1128_v23 = vmul.f32 %v1120_v61, %v4715_v44  ;;  %v1132_v39 = vmul.f32 %v1120_v61, %v4717_v48  ;;  %v1129_v1 = vmul.f32 %v1121_v29, %v4719_v4  ;;  %v1133_v19 = vmul.f32 %v1121_v29, %v4721_v8  ;;  %v3896_v4 = vld [vmem:[#allocation11 + $0xf4] sm:$0xf0]  ;;  %v3667_v61 = vld [vmem:[#allocation11 + $0x2e8] sm:$0xf] }
 0x271   : > { %v1130_v37 = vmul.f32 %v1122_v34, %v4735_v52  ;;  %v1134_v58 = vmul.f32 %v1122_v34, %v4737_v53  ;;  %v1131_v57 = vmul.f32 %v1123_v27, %v4739_v54  ;;  %v1135_v12 = vmul.f32 %v1123_v27, %v4741_v55  ;;  %v3928_v8 = vld [vmem:[#allocation11 + $0x1f4] sm:$0xf0]  ;;  %v3795_v34 = vld [vmem:[#allocation11 + $0x3e8] sm:$0xf] }
 0x272   : > { %v1145_v62 = vadd.f32 %v4980_v59, %v1128_v23  ;;  %v1149_v20 = vadd.f32 %v4980_v59, %v1132_v39  ;;  %v1146_v44 = vadd.f32 %v4982_v42, %v1129_v1  ;;  %v1150_v48 = vadd.f32 %v4982_v42, %v1133_v19  ;;  %v3960_v29 = vld [vmem:[#allocation11 + $0x2f4] sm:$0xf0] }
 0x273   : > { %v1147_v52 = vadd.f32 %v4984_v15, %v1130_v37  ;;  %v1151_v53 = vadd.f32 %v4984_v15, %v1134_v58  ;;  %v1148_v54 = vadd.f32 %v4986_v30, %v1131_v57  ;;  %v1152_v55 = vadd.f32 %v4986_v30, %v1135_v12  ;;  %v3992_v59 = vld [vmem:[#allocation11 + $0x3f4] sm:$0xf0]  ;;  %v3395_v12 = vld [vmem:[#allocation11 + $0xc8] sm:$0xf] }
 0x274   : > { %v1153_v27 = vmax.f32 %v1145_v62, 0.0  ;;  %v1157_v23 = vmax.f32 %v1149_v20, 0.0  ;;  %v1154_v39 = vmax.f32 %v1146_v44, 0.0  ;;  %v1158_v1 = vmax.f32 %v1150_v48, 0.0  ;;  %v3892_v30 = vld [vmem:[#allocation11 + $0xd4] sm:$0xf0] }
 0x275   : > { %v1155_v19 = vmax.f32 %v1147_v52, 0.0  ;;  %v1159_v42 = vmax.f32 %v1151_v53, 0.0  ;;  %v1156_v0 = vmax.f32 %v1148_v54, 0.0  ;;  %v1160_v56 = vmax.f32 %v1152_v55, 0.0  ;;  %v3523_v48 = vld [vmem:[#allocation11 + $0x1c8] sm:$0xf] }
 0x276   : > { %v5004_v43 = vpack.c.bf16 %v1157_v23, %v1153_v27  ;;  %v5006_v37 = vpack.c.bf16 %v1158_v1, %v1154_v39  ;;  %v5008_v58 = vor.u32 %v3896_v4, %v3411_v32  ;;  %v5010_v57 = vor.u32 %v3928_v8, %v3539_v38  ;;  %v3924_v52 = vld [vmem:[#allocation11 + $0x1d4] sm:$0xf0]  ;;  %v3651_v53 = vld [vmem:[#allocation11 + $0x2c8] sm:$0xf] }
 0x277   : > { %v5012_v15 = vpack.c.bf16 %v1159_v42, %v1155_v19  ;;  %v5014_v62 = vpack.c.bf16 %v1160_v56, %v1156_v0  ;;  %v5016_v20 = vor.u32 %v3960_v29, %v3667_v61  ;;  %v5018_v44 = vor.u32 %v3992_v59, %v3795_v34  ;;  %v3956_v32 = vld [vmem:[#allocation11 + $0x2d4] sm:$0xf0]  ;;  %v3779_v4 = vld [vmem:[#allocation11 + $0x3c8] sm:$0xf] }
 0x278   : > { %5751 = vst [vmem:[#allocation56_spill] sm:$0xff] %v5008_v58  ;;  %1813 = vmatmul.bf16.vlgmr.msra.gmra.mxu0 %v5004_v43  ;;  %1827 = vmatmul.bf16.vlgmr.msra.gmra.mxu1 %v5006_v37  ;;  %v3988_v38 = vld [vmem:[#allocation11 + $0x3d4] sm:$0xf0]  ;;  %v5026_v56 = vor.u32 %v3892_v30, %v3395_v12  ;;  %v5028_v0 = vor.u32 %v3924_v52, %v3523_v48  ;;  %v3379_v59 = vld [vmem:[#allocation11 + $0xa8] sm:$0xf] }
 0x279   : > { %5752 = vst [vmem:[#allocation57_spill] sm:$0xff] %v5010_v57  ;;  %1841 = vmatmul.bf16.vlgmr.msra.gmra.mxu2 %v5012_v15  ;;  %1855 = vmatmul.bf16.vlgmr.msra.gmra.mxu3 %v5014_v62  ;;  %v3888_v42 = vld [vmem:[#allocation11 + $0xb4] sm:$0xf0]  ;;  %v5032_v8 = vor.u32 %v3956_v32, %v3651_v53  ;;  %v5034_v54 = vor.u32 %v3988_v38, %v3779_v4  ;;  %v3507_v55 = vld [vmem:[#allocation11 + $0x1a8] sm:$0xf] }
 0x27a   : > { %5753 = vst [vmem:[#allocation58_spill] sm:$0xff] %v5016_v20  ;;  %1917 = vmatpush.bf16.msra.mxu0 %v5008_v58  ;;  %1931 = vmatpush.bf16.msra.mxu1 %v5010_v57  ;;  %v3920_v61 = vld [vmem:[#allocation11 + $0x1b4] sm:$0xf0]  ;;  %v3635_v29 = vld [vmem:[#allocation11 + $0x2a8] sm:$0xf]  ;;  %v5038_v30 = vor.u32 %v3888_v42, %v3379_v59 }
 0x27b   : > { %5754 = vst [vmem:[#allocation59_spill] sm:$0xff] %v5018_v44  ;;  %1945 = vmatpush.bf16.msra.mxu2 %v5016_v20  ;;  %1959 = vmatpush.bf16.msra.mxu3 %v5018_v44  ;;  %v3952_v34 = vld [vmem:[#allocation11 + $0x2b4] sm:$0xf0]  ;;  %v3763_v27 = vld [vmem:[#allocation11 + $0x3a8] sm:$0xf]  ;;  %v5040_v39 = vor.u32 %v3920_v61, %v3507_v55 }
 0x27c   : > { %5755 = vst [vmem:[#allocation60_spill] sm:$0xff] %v5026_v56  ;;  %v3984_v23 = vld [vmem:[#allocation11 + $0x3b4] sm:$0xf0]  ;;  %v3363_v1 = vld [vmem:[#allocation11 + $0x88] sm:$0xf]  ;;  %v5044_v12 = vor.u32 %v3952_v34, %v3635_v29 }
 0x27d   : > { %5756 = vst [vmem:[#allocation61_spill] sm:$0xff] %v5028_v0  ;;  %v3884_v19 = vld [vmem:[#allocation11 + $0x94] sm:$0xf0]  ;;  %v5046_v48 = vor.u32 %v3984_v23, %v3763_v27  ;;  %v3491_v52 = vld [vmem:[#allocation11 + $0x188] sm:$0xf] }
 0x27e   : > { %5757 = vst [vmem:[#allocation62_spill] sm:$0xff] %v5032_v8  ;;  %1918 = vmatpush.bf16.msra.mxu0 %v5026_v56  ;;  %1932 = vmatpush.bf16.msra.mxu1 %v5028_v0  ;;  %v3916_v53 = vld [vmem:[#allocation11 + $0x194] sm:$0xf0]  ;;  %v3619_v32 = vld [vmem:[#allocation11 + $0x288] sm:$0xf]  ;;  %v5050_v59 = vor.u32 %v3884_v19, %v3363_v1 }
 0x27f   : > { %5758 = vst [vmem:[#allocation63_spill] sm:$0xff] %v5034_v54  ;;  %1946 = vmatpush.bf16.msra.mxu2 %v5032_v8  ;;  %1960 = vmatpush.bf16.msra.mxu3 %v5034_v54  ;;  %v3948_v4 = vld [vmem:[#allocation11 + $0x294] sm:$0xf0]  ;;  %v3747_v38 = vld [vmem:[#allocation11 + $0x388] sm:$0xf]  ;;  %v5052_v42 = vor.u32 %v3916_v53, %v3491_v52 }
 0x280   : > { %5759 = vst [vmem:[#allocation64_spill] sm:$0xff] %v5038_v30  ;;  %v3980_v0 = vld [vmem:[#allocation11 + $0x394] sm:$0xf0]  ;;  %v3347_v55 = vld [vmem:[#allocation11 + $0x68] sm:$0xf]  ;;  %v5056_v29 = vor.u32 %v3948_v4, %v3619_v32 }
 0x281   : > { %5760 = vst [vmem:[#allocation65_spill] sm:$0xff] %v5040_v39  ;;  %v3880_v61 = vld [vmem:[#allocation11 + $0x74] sm:$0xf0]  ;;  %v5058_v34 = vor.u32 %v3980_v0, %v3747_v38  ;;  %v3475_v27 = vld [vmem:[#allocation11 + $0x168] sm:$0xf] }
 0x282   : > { %5761 = vst [vmem:[#allocation66_spill] sm:$0xff] %v5044_v12  ;;  %1919 = vmatpush.bf16.msra.mxu0 %v5038_v30  ;;  %1933 = vmatpush.bf16.msra.mxu1 %v5040_v39  ;;  %v3912_v23 = vld [vmem:[#allocation11 + $0x174] sm:$0xf0]  ;;  %v3603_v54 = vld [vmem:[#allocation11 + $0x268] sm:$0xf]  ;;  %v5062_v1 = vor.u32 %v3880_v61, %v3347_v55 }
 0x283   : > { %5762 = vst [vmem:[#allocation67_spill] sm:$0xff] %v5046_v48  ;;  %1947 = vmatpush.bf16.msra.mxu2 %v5044_v12  ;;  %1961 = vmatpush.bf16.msra.mxu3 %v5046_v48  ;;  %v3944_v30 = vld [vmem:[#allocation11 + $0x274] sm:$0xf0]  ;;  %v3731_v8 = vld [vmem:[#allocation11 + $0x368] sm:$0xf]  ;;  %v5064_v19 = vor.u32 %v3912_v23, %v3475_v27 }
 0x284   : > { %5763 = vst [vmem:[#allocation68_spill] sm:$0xff] %v5050_v59  ;;  %v3976_v39 = vld [vmem:[#allocation11 + $0x374] sm:$0xf0]  ;;  %v3331_v52 = vld [vmem:[#allocation11 + $0x48] sm:$0xf]  ;;  %v5068_v0 = vor.u32 %v3944_v30, %v3603_v54 }
 0x285   : > { %5764 = vst [vmem:[#allocation69_spill] sm:$0xff] %v5052_v42  ;;  %v3876_v53 = vld [vmem:[#allocation11 + $0x54] sm:$0xf0]  ;;  %v5070_v32 = vor.u32 %v3976_v39, %v3731_v8  ;;  %v3459_v4 = vld [vmem:[#allocation11 + $0x148] sm:$0xf] }
 0x286   : > { %5765 = vst [vmem:[#allocation70_spill] sm:$0xff] %v5056_v29  ;;  %1920 = vmatpush.bf16.msra.mxu0 %v5050_v59  ;;  %1934 = vmatpush.bf16.msra.mxu1 %v5052_v42  ;;  %v3908_v38 = vld [vmem:[#allocation11 + $0x154] sm:$0xf0]  ;;  %v3587_v48 = vld [vmem:[#allocation11 + $0x248] sm:$0xf]  ;;  %v5078_v8 = vor.u32 %v3876_v53, %v3331_v52 }
 0x287   : > { %5766 = vst [vmem:[#allocation71_spill] sm:$0xff] %v5058_v34  ;;  %1948 = vmatpush.bf16.msra.mxu2 %v5056_v29  ;;  %1962 = vmatpush.bf16.msra.mxu3 %v5058_v34  ;;  %v3940_v55 = vld [vmem:[#allocation11 + $0x254] sm:$0xf0]  ;;  %v3715_v61 = vld [vmem:[#allocation11 + $0x348] sm:$0xf]  ;;  %v5080_v54 = vor.u32 %v3908_v38, %v3459_v4 }
 0x288   : > { %5767 = vst [vmem:[#allocation72_spill] sm:$0xff] %v5062_v1  ;;  %1869 = vmatmul.bf16.vlgmr.msrb.gmra.mxu0 %v5004_v43  ;;  %1883 = vmatmul.bf16.vlgmr.msrb.gmra.mxu1 %v5006_v37  ;;  %v3972_v27 = vld [vmem:[#allocation11 + $0x354] sm:$0xf0]  ;;  %v3315_v30 = vld [vmem:[#allocation11 + $0x28] sm:$0xf]  ;;  %v5084_v23 = vor.u32 %v3940_v55, %v3587_v48 }
 0x289   : > { %5768 = vst [vmem:[#allocation73_spill] sm:$0xff] %v5064_v19  ;;  %1897 = vmatmul.bf16.vlgmr.msrb.gmra.mxu2 %v5012_v15  ;;  %1911 = vmatmul.bf16.vlgmr.msrb.gmra.mxu3 %v5014_v62  ;;  %v3872_v39 = vld [vmem:[#allocation11 + $0x34] sm:$0xf0]  ;;  %v5086_v34 = vor.u32 %v3972_v27, %v3715_v61  ;;  %v3443_v29 = vld [vmem:[#allocation11 + $0x128] sm:$0xf] }
 0x28a   : > { %5769 = vst [vmem:[#allocation74_spill] sm:$0xff] %v5068_v0  ;;  %1921 = vmatpush.bf16.msra.mxu0 %v5062_v1  ;;  %1935 = vmatpush.bf16.msra.mxu1 %v5064_v19  ;;  %v3904_v42 = vld [vmem:[#allocation11 + $0x134] sm:$0xf0]  ;;  %v3571_v59 = vld [vmem:[#allocation11 + $0x228] sm:$0xf]  ;;  %v5090_v53 = vor.u32 %v3872_v39, %v3315_v30 }
 0x28b   : > { %5770 = vst [vmem:[#allocation75_spill] sm:$0xff] %v5070_v32  ;;  %1949 = vmatpush.bf16.msra.mxu2 %v5068_v0  ;;  %1963 = vmatpush.bf16.msra.mxu3 %v5070_v32  ;;  %v3936_v1 = vld [vmem:[#allocation11 + $0x234] sm:$0xf0]  ;;  %v3699_v12 = vld [vmem:[#allocation11 + $0x328] sm:$0xf]  ;;  %v5092_v4 = vor.u32 %v3904_v42, %v3443_v29 }
 0x28c   : > { %5771 = vst [vmem:[#allocation76_spill] sm:$0xff] %v5078_v8  ;;  %v3968_v19 = vld [vmem:[#allocation11 + $0x334] sm:$0xf0]  ;;  %v3299_v52 = vld [vmem:[#allocation11 + $0x8] sm:$0xf]  ;;  %v5096_v61 = vor.u32 %v3936_v1, %v3571_v59 }
 0x28d   : > { %5772 = vst [vmem:[#allocation77_spill] sm:$0xff] %v5080_v54  ;;  %v3868_v38 = vld [vmem:[#allocation11 + $0x14] sm:$0xf0]  ;;  %v3427_v48 = vld [vmem:[#allocation11 + $0x108] sm:$0xf]  ;;  %v5098_v27 = vor.u32 %v3968_v19, %v3699_v12 }
 0x28e   : > { %5773 = vst [vmem:[#allocation78_spill] sm:$0xff] %v5084_v23  ;;  %1922 = vmatpush.bf16.msra.mxu0 %v5078_v8  ;;  %1936 = vmatpush.bf16.msra.mxu1 %v5080_v54  ;;  %v3900_v55 = vld [vmem:[#allocation11 + $0x114] sm:$0xf0]  ;;  %v3555_v32 = vld [vmem:[#allocation11 + $0x208] sm:$0xf] }
 0x28f   : > { %5774 = vst [vmem:[#allocation79_spill] sm:$0xff] %v5086_v34  ;;  %1950 = vmatpush.bf16.msra.mxu2 %v5084_v23  ;;  %1964 = vmatpush.bf16.msra.mxu3 %v5086_v34  ;;  %v3932_v0 = vld [vmem:[#allocation11 + $0x214] sm:$0xf0]  ;;  %v3683_v8 = vld [vmem:[#allocation11 + $0x308] sm:$0xf]  ;;  %v5102_v23 = vor.u32 %v3868_v38, %v3299_v52  ;;  %v5104_v34 = vor.u32 %v3900_v55, %v3427_v48 }
 0x290   : > { %5775 = vst [vmem:[#allocation80_spill] sm:$0xff] %v5090_v53  ;;  %v3964_v56 = vld [vmem:[#allocation11 + $0x314] sm:$0xf0]  ;;  %v3894_v54 = vld [vmem:[#allocation11 + $0xec] sm:$0xf]  ;;  %v5108_v19 = vor.u32 %v3932_v0, %v3555_v32 }
 0x291   : > { %5776 = vst [vmem:[#allocation81_spill] sm:$0xff] %v5092_v4  ;;  %v3413_v30 = vld [vmem:[#allocation11 + $0xf8] sm:$0xf0]  ;;  %v3926_v39 = vld [vmem:[#allocation11 + $0x1ec] sm:$0xf]  ;;  %v5110_v44 = vor.u32 %v3964_v56, %v3683_v8 }
 0x292   : > { %5777 = vst [vmem:[#allocation82_spill] sm:$0xff] %v5096_v61  ;;  %v3541_v42 = vld [vmem:[#allocation11 + $0x1f8] sm:$0xf0]  ;;  %v3958_v29 = vld [vmem:[#allocation11 + $0x2ec] sm:$0xf]  ;;  %1923 = vmatpush.bf16.msra.mxu0 %v5090_v53  ;;  %1937 = vmatpush.bf16.msra.mxu1 %v5092_v4  ;;  %v5112_v20 = vor.u32 %v3894_v54, %v3413_v30 }
 0x293   : > { %5778 = vst [vmem:[#allocation83_spill] sm:$0xff] %v5098_v27  ;;  %v3669_v59 = vld [vmem:[#allocation11 + $0x2f8] sm:$0xf0]  ;;  %v3990_v12 = vld [vmem:[#allocation11 + $0x3ec] sm:$0xf]  ;;  %1951 = vmatpush.bf16.msra.mxu2 %v5096_v61  ;;  %1965 = vmatpush.bf16.msra.mxu3 %v5098_v27  ;;  %v5114_v53 = vor.u32 %v3926_v39, %v3541_v42 }
 0x294   : > { %5779 = vst [vmem:[#allocation84_spill] sm:$0xff] %v5102_v23  ;;  %v3797_v1 = vld [vmem:[#allocation11 + $0x3f8] sm:$0xf0]  ;;  %v3890_v4 = vld [vmem:[#allocation11 + $0xcc] sm:$0xf]  ;;  %v5116_v38 = vor.u32 %v3958_v29, %v3669_v59 }
 0x295   : > { %5780 = vst [vmem:[#allocation85_spill] sm:$0xff] %v5104_v34  ;;  %v3397_v52 = vld [vmem:[#allocation11 + $0xd8] sm:$0xf0]  ;;  %v5118_v48 = vor.u32 %v3990_v12, %v3797_v1  ;;  %v3922_v55 = vld [vmem:[#allocation11 + $0x1cc] sm:$0xf] }
 0x296   : > { %5781 = vst [vmem:[#allocation86_spill] sm:$0xff] %v5108_v19  ;;  %v3525_v57 = vld [vmem:[#allocation11 + $0x1d8] sm:$0xf0]  ;;  %v3954_v58 = vld [vmem:[#allocation11 + $0x2cc] sm:$0xf]  ;;  %1924 = vmatpush.bf16.msra.mxu0 %v5102_v23  ;;  %1938 = vmatpush.bf16.msra.mxu1 %v5104_v34  ;;  %v5126_v8 = vor.u32 %v3890_v4, %v3397_v52 }
 0x297   : > { %5782 = vst [vmem:[#allocation87_spill] sm:$0xff] %v5110_v44  ;;  %v3653_v0 = vld [vmem:[#allocation11 + $0x2d8] sm:$0xf0]  ;;  %v3986_v56 = vld [vmem:[#allocation11 + $0x3cc] sm:$0xf]  ;;  %1952 = vmatpush.bf16.msra.mxu2 %v5108_v19  ;;  %1966 = vmatpush.bf16.msra.mxu3 %v5110_v44  ;;  %v5128_v54 = vor.u32 %v3922_v55, %v3525_v57 }
 0x298   : > { %5783 = vst [vmem:[#allocation88_spill] sm:$0xff] %v5112_v20  ;;  %v3781_v32 = vld [vmem:[#allocation11 + $0x3d8] sm:$0xf0]  ;;  %v3886_v30 = vld [vmem:[#allocation11 + $0xac] sm:$0xf]  ;;  %v5132_v42 = vor.u32 %v3954_v58, %v3653_v0 }
 0x299   : > { %5784 = vst [vmem:[#allocation89_spill] sm:$0xff] %v5114_v53  ;;  %v3381_v39 = vld [vmem:[#allocation11 + $0xb8] sm:$0xf0]  ;;  %v5134_v29 = vor.u32 %v3986_v56, %v3781_v32  ;;  %v3918_v59 = vld [vmem:[#allocation11 + $0x1ac] sm:$0xf]  ;;  %1925 = vmatmul.bf16.vlgmr.msra.gmra.mxu0 %v5004_v43  ;;  %1939 = vmatmul.bf16.vlgmr.msra.gmra.mxu1 %v5006_v37 }
 0x29a   : > { %5785 = vst [vmem:[#allocation90_spill] sm:$0xff] %v5116_v38  ;;  %1973 = vmatpush.bf16.msrb.mxu0 %v5112_v20  ;;  %1987 = vmatpush.bf16.msrb.mxu1 %v5114_v53  ;;  %v3509_v12 = vld [vmem:[#allocation11 + $0x1b8] sm:$0xf0]  ;;  %v3950_v1 = vld [vmem:[#allocation11 + $0x2ac] sm:$0xf]  ;;  %v5142_v58 = vor.u32 %v3886_v30, %v3381_v39 }
 0x29b   : > { %5786 = vst [vmem:[#allocation91_spill] sm:$0xff] %v5118_v48  ;;  %2001 = vmatpush.bf16.msrb.mxu2 %v5116_v38  ;;  %2015 = vmatpush.bf16.msrb.mxu3 %v5118_v48  ;;  %v3637_v4 = vld [vmem:[#allocation11 + $0x2b8] sm:$0xf0]  ;;  %v3982_v57 = vld [vmem:[#allocation11 + $0x3ac] sm:$0xf]  ;;  %v5144_v55 = vor.u32 %v3918_v59, %v3509_v12 }
 0x29c   : > { %5787 = vst [vmem:[#allocation92_spill] sm:$0xff] %v5126_v8  ;;  %v3765_v52 = vld [vmem:[#allocation11 + $0x3b8] sm:$0xf0]  ;;  %1953 = vmatmul.bf16.vlgmr.msra.gmra.mxu2 %v5012_v15  ;;  %1967 = vmatmul.bf16.vlgmr.msra.gmra.mxu3 %v5014_v62  ;;  %v3882_v0 = vld [vmem:[#allocation11 + $0x8c] sm:$0xf]  ;;  %v5148_v32 = vor.u32 %v3950_v1, %v3637_v4 }
 0x29d   : > { %5788 = vst [vmem:[#allocation93_spill] sm:$0xff] %v5128_v54  ;;  %v3365_v56 = vld [vmem:[#allocation11 + $0x98] sm:$0xf0]  ;;  %v5150_v48 = vor.u32 %v3982_v57, %v3765_v52  ;;  %v3914_v38 = vld [vmem:[#allocation11 + $0x18c] sm:$0xf] }
 0x29e   : > { %5789 = vst [vmem:[#allocation94_spill] sm:$0xff] %v5132_v42  ;;  %1974 = vmatpush.bf16.msrb.mxu0 %v5126_v8  ;;  %1988 = vmatpush.bf16.msrb.mxu1 %v5128_v54  ;;  %v3493_v53 = vld [vmem:[#allocation11 + $0x198] sm:$0xf0]  ;;  %v3946_v20 = vld [vmem:[#allocation11 + $0x28c] sm:$0xf]  ;;  %v5154_v30 = vor.u32 %v3882_v0, %v3365_v56 }
 0x29f   : > { %5790 = vst [vmem:[#allocation95_spill] sm:$0xff] %v5134_v29  ;;  %2002 = vmatpush.bf16.msrb.mxu2 %v5132_v42  ;;  %2016 = vmatpush.bf16.msrb.mxu3 %v5134_v29  ;;  %v3621_v8 = vld [vmem:[#allocation11 + $0x298] sm:$0xf0]  ;;  %v3978_v44 = vld [vmem:[#allocation11 + $0x38c] sm:$0xf]  ;;  %v5156_v39 = vor.u32 %v3914_v38, %v3493_v53 }
 0x2a0   : > { %5791 = vst [vmem:[#allocation96_spill] sm:$0xff] %v5142_v58  ;;  %v3749_v54 = vld [vmem:[#allocation11 + $0x398] sm:$0xf0]  ;;  %v3878_v59 = vld [vmem:[#allocation11 + $0x6c] sm:$0xf]  ;;  %v5160_v1 = vor.u32 %v3946_v20, %v3621_v8 }
 0x2a1   : > { %5792 = vst [vmem:[#allocation97_spill] sm:$0xff] %v5144_v55  ;;  %v3349_v12 = vld [vmem:[#allocation11 + $0x78] sm:$0xf0]  ;;  %v5162_v4 = vor.u32 %v3978_v44, %v3749_v54  ;;  %v3910_v57 = vld [vmem:[#allocation11 + $0x16c] sm:$0xf] }
 0x2a2   : > { %5793 = vst [vmem:[#allocation98_spill] sm:$0xff] %v5148_v32  ;;  %1975 = vmatpush.bf16.msrb.mxu0 %v5142_v58  ;;  %1989 = vmatpush.bf16.msrb.mxu1 %v5144_v55  ;;  %v3477_v52 = vld [vmem:[#allocation11 + $0x178] sm:$0xf0]  ;;  %v3942_v29 = vld [vmem:[#allocation11 + $0x26c] sm:$0xf]  ;;  %v5166_v53 = vor.u32 %v3878_v59, %v3349_v12 }
 0x2a3   : > { %5794 = vst [vmem:[#allocation99_spill] sm:$0xff] %v5150_v48  ;;  %2003 = vmatpush.bf16.msrb.mxu2 %v5148_v32  ;;  %2017 = vmatpush.bf16.msrb.mxu3 %v5150_v48  ;;  %v3605_v58 = vld [vmem:[#allocation11 + $0x278] sm:$0xf0]  ;;  %v3974_v42 = vld [vmem:[#allocation11 + $0x36c] sm:$0xf]  ;;  %v5168_v38 = vor.u32 %v3910_v57, %v3477_v52 }
 0x2a4   : > { %5795 = vst [vmem:[#allocation100_spill] sm:$0xff] %v5154_v30  ;;  %v3733_v55 = vld [vmem:[#allocation11 + $0x378] sm:$0xf0]  ;;  %v3874_v0 = vld [vmem:[#allocation11 + $0x4c] sm:$0xf]  ;;  %v5172_v20 = vor.u32 %v3942_v29, %v3605_v58 }
 0x2a5   : > { %5796 = vst [vmem:[#allocation101_spill] sm:$0xff] %v5156_v39  ;;  %v3333_v56 = vld [vmem:[#allocation11 + $0x58] sm:$0xf0]  ;;  %v5174_v44 = vor.u32 %v3974_v42, %v3733_v55  ;;  %v3906_v8 = vld [vmem:[#allocation11 + $0x14c] sm:$0xf] }
 0x2a6   : > { %5797 = vst [vmem:[#allocation102_spill] sm:$0xff] %v5160_v1  ;;  %1976 = vmatpush.bf16.msrb.mxu0 %v5154_v30  ;;  %1990 = vmatpush.bf16.msrb.mxu1 %v5156_v39  ;;  %v3461_v54 = vld [vmem:[#allocation11 + $0x158] sm:$0xf0]  ;;  %v3938_v48 = vld [vmem:[#allocation11 + $0x24c] sm:$0xf]  ;;  %v5178_v59 = vor.u32 %v3874_v0, %v3333_v56 }
 0x2a7   : > { %5798 = vst [vmem:[#allocation103_spill] sm:$0xff] %v5162_v4  ;;  %2004 = vmatpush.bf16.msrb.mxu2 %v5160_v1  ;;  %2018 = vmatpush.bf16.msrb.mxu3 %v5162_v4  ;;  %v3589_v30 = vld [vmem:[#allocation11 + $0x258] sm:$0xf0]  ;;  %v3970_v32 = vld [vmem:[#allocation11 + $0x34c] sm:$0xf]  ;;  %v5180_v12 = vor.u32 %v3906_v8, %v3461_v54 }
 0x2a8   : > { %5799 = vst [vmem:[#allocation104_spill] sm:$0xff] %v5166_v53  ;;  %v3717_v39 = vld [vmem:[#allocation11 + $0x358] sm:$0xf0]  ;;  %v3870_v57 = vld [vmem:[#allocation11 + $0x2c] sm:$0xf]  ;;  %v5184_v42 = vor.u32 %v3938_v48, %v3589_v30 }
 0x2a9   : > { %5800 = vst [vmem:[#allocation105_spill] sm:$0xff] %v5168_v38  ;;  %v3317_v52 = vld [vmem:[#allocation11 + $0x38] sm:$0xf0]  ;;  %v5186_v29 = vor.u32 %v3970_v32, %v3717_v39  ;;  %v3902_v58 = vld [vmem:[#allocation11 + $0x12c] sm:$0xf] }
 0x2aa   : > { %5801 = vst [vmem:[#allocation106_spill] sm:$0xff] %v5172_v20  ;;  %1977 = vmatpush.bf16.msrb.mxu0 %v5166_v53  ;;  %1991 = vmatpush.bf16.msrb.mxu1 %v5168_v38  ;;  %v3445_v55 = vld [vmem:[#allocation11 + $0x138] sm:$0xf0]  ;;  %v3934_v4 = vld [vmem:[#allocation11 + $0x22c] sm:$0xf]  ;;  %v5190_v0 = vor.u32 %v3870_v57, %v3317_v52 }
 0x2ab   : > { %5802 = vst [vmem:[#allocation107_spill] sm:$0xff] %v5174_v44  ;;  %2005 = vmatpush.bf16.msrb.mxu2 %v5172_v20  ;;  %2019 = vmatpush.bf16.msrb.mxu3 %v5174_v44  ;;  %v3573_v53 = vld [vmem:[#allocation11 + $0x238] sm:$0xf0]  ;;  %v3966_v1 = vld [vmem:[#allocation11 + $0x32c] sm:$0xf]  ;;  %v5192_v56 = vor.u32 %v3902_v58, %v3445_v55 }
 0x2ac   : > { %5803 = vst [vmem:[#allocation108_spill] sm:$0xff] %v5178_v59  ;;  %v3701_v38 = vld [vmem:[#allocation11 + $0x338] sm:$0xf0]  ;;  %v3866_v8 = vld [vmem:[#allocation11 + $0xc] sm:$0xf]  ;;  %v5196_v48 = vor.u32 %v3934_v4, %v3573_v53 }
 0x2ad   : > { %5804 = vst [vmem:[#allocation109_spill] sm:$0xff] %v5180_v12  ;;  %v3301_v54 = vld [vmem:[#allocation11 + $0x18] sm:$0xf0]  ;;  %v5198_v32 = vor.u32 %v3966_v1, %v3701_v38  ;;  %v3898_v30 = vld [vmem:[#allocation11 + $0x10c] sm:$0xf] }
 0x2ae   : > { %5805 = vst [vmem:[#allocation110_spill] sm:$0xff] %v5184_v42  ;;  %1978 = vmatpush.bf16.msrb.mxu0 %v5178_v59  ;;  %1992 = vmatpush.bf16.msrb.mxu1 %v5180_v12  ;;  %v3429_v39 = vld [vmem:[#allocation11 + $0x118] sm:$0xf0]  ;;  %v3930_v44 = vld [vmem:[#allocation11 + $0x20c] sm:$0xf]  ;;  %v5202_v57 = vor.u32 %v3866_v8, %v3301_v54 }
 0x2af   : > { %5806 = vst [vmem:[#allocation111_spill] sm:$0xff] %v5186_v29  ;;  %2006 = vmatpush.bf16.msrb.mxu2 %v5184_v42  ;;  %2020 = vmatpush.bf16.msrb.mxu3 %v5186_v29  ;;  %v3557_v59 = vld [vmem:[#allocation11 + $0x218] sm:$0xf0]  ;;  %v3962_v20 = vld [vmem:[#allocation11 + $0x30c] sm:$0xf]  ;;  %v5204_v52 = vor.u32 %v3898_v30, %v3429_v39 }
 0x2b0   : > { %5807 = vst [vmem:[#allocation112_spill] sm:$0xff] %v5190_v0  ;;  %v3685_v12 = vld [vmem:[#allocation11 + $0x318] sm:$0xf0]  ;;  %v5208_v1 = vor.u32 %v3930_v44, %v3557_v59 }
 0x2b1   : > { %5808 = vst [vmem:[#allocation113_spill] sm:$0xff] %v5192_v56  ;;  %v5210_v4 = vor.u32 %v3962_v20, %v3685_v12 }
 0x2b2   : > { %5809 = vst [vmem:[#allocation114_spill] sm:$0xff] %v5196_v48  ;;  %1979 = vmatpush.bf16.msrb.mxu0 %v5190_v0  ;;  %1993 = vmatpush.bf16.msrb.mxu1 %v5192_v56 }
 0x2b3   : > { %5810 = vst [vmem:[#allocation115_spill] sm:$0xff] %v5198_v32  ;;  %2007 = vmatpush.bf16.msrb.mxu2 %v5196_v48  ;;  %2021 = vmatpush.bf16.msrb.mxu3 %v5198_v32 }
 0x2b4   : > { %5811 = vst [vmem:[#allocation116_spill] sm:$0xff] %v5202_v57 }
 0x2b5   : > { %5812 = vst [vmem:[#allocation117_spill] sm:$0xff] %v5204_v52 }
 0x2b6   : > { %5813 = vst [vmem:[#allocation118_spill] sm:$0xff] %v5208_v1  ;;  %1980 = vmatpush.bf16.msrb.mxu0 %v5202_v57  ;;  %1994 = vmatpush.bf16.msrb.mxu1 %v5204_v52  ;;  %v5815_v52 = vmov 0.0625  }
 0x2b7   : > { %5814 = vst [vmem:[#allocation119_spill] sm:$0xff] %v5210_v4  ;;  %2008 = vmatpush.bf16.msrb.mxu2 %v5208_v1  ;;  %2022 = vmatpush.bf16.msrb.mxu3 %v5210_v4 }
 0x2b9   : > { %1981 = vmatmul.bf16.vlgmr.msrb.gmra.mxu0 %v5004_v43  ;;  %1995 = vmatmul.bf16.vlgmr.msrb.gmra.mxu1 %v5006_v37 }
 0x2ba   : > { %2009 = vmatmul.bf16.vlgmr.msrb.gmra.mxu2 %v5012_v15  ;;  %2023 = vmatmul.bf16.vlgmr.msrb.gmra.mxu3 %v5014_v62 }
 0x2f5   : > { %v1814_v53 = vpop.f32.mrf.mxu0  ;;  %v1828_v38 = vpop.f32.mrf.mxu1 }
 0x2f6   : > { %v1829_v58 = vadd.f32 %v1828_v38, %v1814_v53 }
 0x2fc   : > { %v1842_v20 = vpop.f32.mrf.mxu2  ;;  %v1856_v44 = vpop.f32.mrf.mxu3 }
 0x2fd   : > { %v1816_v59 = vpop.f32.mrf.mxu0  ;;  %v1830_v12 = vpop.f32.mrf.mxu1  ;;  %v1843_v30 = vadd.f32 %v1842_v20, %v1829_v58 }
 0x2fe   : > { %v1831_v55 = vadd.f32 %v1830_v12, %v1816_v59 }
 0x2ff   : > { %v1857_v37 = vadd.f32 %v1856_v44, %v1843_v30 }
 0x304   : > { %v1844_v8 = vpop.f32.mrf.mxu2  ;;  %v1858_v54 = vpop.f32.mrf.mxu3 }
 0x305   : > { %v1845_v39 = vadd.f32 %v1844_v8, %v1831_v55  ;;  %v1870_v4 = vpop.f32.mrf.mxu0  ;;  %v1884_v43 = vpop.f32.mrf.mxu1 }
 0x306   : > { %v1885_v48 = vadd.f32 %v1884_v43, %v1870_v4 }
 0x307   : > { %v1859_v1 = vadd.f32 %v1858_v54, %v1845_v39 }
 0x309   : > { %2043 = vmatpush.msra.mxu0 %v1859_v1 }
 0x30b   : > { %2044 = vmatpush.msra.mxu0 %v1857_v37 }
 0x30c   : > { %v1898_v15 = vpop.f32.mrf.mxu2  ;;  %v1912_v62 = vpop.f32.mrf.mxu3  ;;  %3801 = vmatmul.msk.f32.vlgmr.msra.gmra.mxu0 %vm880_vm0, %v5815_v52 }
 0x30d   : > { %v1872_v57 = vpop.f32.mrf.mxu0  ;;  %v1886_v32 = vpop.f32.mrf.mxu1  ;;  %v1899_v12 = vadd.f32 %v1898_v15, %v1885_v48 }
 0x30e   : > { %v1887_v53 = vadd.f32 %v1886_v32, %v1872_v57 }
 0x30f   : > { %v1913_v54 = vadd.f32 %v1912_v62, %v1899_v12 }
 0x314   : > { %v1900_v38 = vpop.f32.mrf.mxu2  ;;  %v1914_v59 = vpop.f32.mrf.mxu3 }
 0x315   : > { %v1901_v20 = vadd.f32 %v1900_v38, %v1887_v53 }
 0x316   : > { %v1926_v55 = vpop.f32.mrf.mxu0  ;;  %v1940_v8 = vpop.f32.mrf.mxu1 }
 0x317   : > { %v1915_v58 = vadd.f32 %v1914_v59, %v1901_v20  ;;  %v1941_v0 = vadd.f32 %v1940_v8, %v1926_v55 }
 0x319   : > { %2063 = vmatpush.msra.mxu1 %v1915_v58 }
 0x31b   : > { %2064 = vmatpush.msra.mxu1 %v1913_v54 }
 0x31c   : > { %3802 = vmatmul.msk.f32.vlgmr.msra.gmra.mxu1 %vm880_vm0, %v5815_v52 }
 0x31e   : > { %v1928_v39 = vpop.f32.mrf.mxu0  ;;  %v1942_v56 = vpop.f32.mrf.mxu1 }
 0x31f   : > { %v1954_v44 = vpop.f32.mrf.mxu2  ;;  %v1968_v30 = vpop.f32.mrf.mxu3  ;;  %v1943_v4 = vadd.f32 %v1942_v56, %v1928_v39 }
 0x320   : > { %v1955_v57 = vadd.f32 %v1954_v44, %v1941_v0 }
 0x322   : > { %v1969_v53 = vadd.f32 %v1968_v30, %v1955_v57 }
 0x327   : > { %v1956_v32 = vpop.f32.mrf.mxu2  ;;  %v1970_v48 = vpop.f32.mrf.mxu3 }
 0x328   : > { %v1957_v43 = vadd.f32 %v1956_v32, %v1943_v4 }
 0x32a   : > { %v1971_v15 = vadd.f32 %v1970_v48, %v1957_v43 }
 0x32c   : > { %2083 = vmatpush.msra.mxu2 %v1971_v15 }
 0x32e   : > { %2084 = vmatpush.msra.mxu2 %v1969_v53 }
 0x32f   : > { %3803 = vmatmul.msk.f32.vlgmr.msra.gmra.mxu2 %vm880_vm0, %v5815_v52 }
 0x336   : > { %v1982_v62 = vpop.f32.mrf.mxu0  ;;  %v1996_v38 = vpop.f32.mrf.mxu1 }
 0x337   : > { %v1997_v42 = vadd.f32 %v1996_v38, %v1982_v62 }
 0x33d   : > { %v2010_v59 = vpop.f32.mrf.mxu2  ;;  %v2024_v12 = vpop.f32.mrf.mxu3 }
 0x33e   : > { %v1984_v20 = vpop.f32.mrf.mxu0  ;;  %v1998_v29 = vpop.f32.mrf.mxu1  ;;  %v2011_v8 = vadd.f32 %v2010_v59, %v1997_v42 }
 0x33f   : > { %v1999_v55 = vadd.f32 %v1998_v29, %v1984_v20 }
 0x340   : > { %v2025_v4 = vadd.f32 %v2024_v12, %v2011_v8  ;;  %v5256_v8 = vld [vmem:[#allocation2 + $0x70] sm:$0xff] }
 0x345   : > { %v2012_v56 = vpop.f32.mrf.mxu2  ;;  %v2026_v44 = vpop.f32.mrf.mxu3 }
 0x346   : > { %v2013_v0 = vadd.f32 %v2012_v56, %v1999_v55 }
 0x348   : > { %v2027_v39 = vadd.f32 %v2026_v44, %v2013_v0  ;;  %v5258_v0 = vld [vmem:[#allocation2 + $0x60] sm:$0xff] }
 0x349   : > { %v5260_v44 = vld [vmem:[#allocation2 + $0x20] sm:$0xff] }
 0x34a   : > { %2103 = vmatpush.msra.mxu3 %v2027_v39 }
 0x34c   : > { %2104 = vmatpush.msra.mxu3 %v2025_v4 }
 0x34d   : > { %3804 = vmatmul.msk.f32.vlgmr.msra.gmra.mxu3 %vm880_vm0, %v5815_v52 }
 0x389   : > { %v2046_v30 = vpop.f32.mrf.mxu0 }
 0x38a   : > { %v2109_v32 = vperm.slane %v2046_v30, 0  ;;  %v5262_v30 = vld [vmem:[#allocation2 + $0x78] sm:$0xff] }
 0x38c   : > { %v5228_v57 = vsub.f32 %v1857_v37, %v2109_v32  ;;  %v5230_v43 = vsub.f32 %v1859_v1, %v2109_v32 }
 0x38e   : > { %v2125_v29 = vmul.f32 %v5230_v43, %v5230_v43  ;;  %v2121_v42 = vmul.f32 %v5228_v57, %v5228_v57 }
 0x390   : > { %2143 = vmatpush.msrb.mxu0 %v2125_v29 }
 0x392   : > { %2144 = vmatpush.msrb.mxu0 %v2121_v42 }
 0x393   : > { %3805 = vmatmul.msk.f32.vlgmr.msrb.gmra.mxu0 %vm880_vm0, %v5815_v52 }
 0x394   : > { %2291 = vmatpush.msra.mxu0 %v5258_v0 }
 0x399   : > { %v2066_v48 = vpop.f32.mrf.mxu1 }
 0x39a   : > { %v2110_v62 = vperm.slane %v2066_v48, 0 }
 0x39c   : > { %v5238_v38 = vsub.f32 %v1913_v54, %v2110_v62  ;;  %v5240_v59 = vsub.f32 %v1915_v58, %v2110_v62 }
 0x39e   : > { %v2126_v1 = vmul.f32 %v5240_v59, %v5240_v59  ;;  %v2122_v37 = vmul.f32 %v5238_v38, %v5238_v38 }
 0x3a0   : > { %2163 = vmatpush.msrb.mxu1 %v2126_v1 }
 0x3a2   : > { %2164 = vmatpush.msrb.mxu1 %v2122_v37  ;;  %v5290_v37 = vld [vmem:[#allocation2 + $0x28] sm:$0xff] }
 0x3a3   : > { %3806 = vmatmul.msk.f32.vlgmr.msrb.gmra.mxu1 %vm880_vm0, %v5815_v52 }
 0x3a4   : > { %2311 = vmatpush.msra.mxu1 %v5256_v8 }
 0x3a6   : > { %2312 = vmatpush.msra.mxu1 %v5260_v44 }
 0x3ab   : > { %3810 = vmatmul.msk.f32.vlgmr.msra.gmra.mxu1 %vm880_vm0, %v5815_v52 }
 0x3b2   : > { %v2086_v12 = vpop.f32.mrf.mxu2 }
 0x3b3   : > { %v2111_v20 = vperm.slane %v2086_v12, 0  ;;  %v5294_v12 = vld [vmem:[#allocation2 + $0x38] sm:$0xff] }
 0x3b5   : > { %v5248_v55 = vsub.f32 %v1969_v53, %v2111_v20  ;;  %v5250_v56 = vsub.f32 %v1971_v15, %v2111_v20  ;;  %v5266_v15 = vld [vmem:[#allocation2 + $0x40] sm:$0xff]  ;;  %v5270_v53 = vld [vmem:[#allocation2 + $0x10] sm:$0xff] }
 0x3b6   : > { %2292 = vmatpush.msra.mxu0 %v5266_v15 }
 0x3b7   : > { %v2127_v58 = vmul.f32 %v5250_v56, %v5250_v56  ;;  %v2123_v54 = vmul.f32 %v5248_v55, %v5248_v55  ;;  %3809 = vmatmul.msk.f32.vlgmr.msra.gmra.mxu0 %vm880_vm0, %v5815_v52 }
 0x3b9   : > { %2183 = vmatpush.msrb.mxu2 %v2127_v58 }
 0x3bb   : > { %2184 = vmatpush.msrb.mxu2 %v2123_v54 }
 0x3bc   : > { %3807 = vmatmul.msk.f32.vlgmr.msrb.gmra.mxu2 %vm880_vm0, %v5815_v52 }
 0x3bd   : > { %2331 = vmatpush.msra.mxu2 %v5262_v30 }
 0x3bf   : > { %2332 = vmatpush.msra.mxu2 %v5270_v53 }
 0x3c4   : > { %3811 = vmatmul.msk.f32.vlgmr.msra.gmra.mxu2 %vm880_vm0, %v5815_v52 }
 0x3d0   : > { %v2106_v32 = vpop.f32.mrf.mxu3 }
 0x3d1   : > { %v2112_v29 = vperm.slane %v2106_v32, 0 }
 0x3d3   : > { %v5282_v42 = vsub.f32 %v2025_v4, %v2112_v29  ;;  %v5284_v48 = vsub.f32 %v2027_v39, %v2112_v29 }
 0x3d5   : > { %5816 = vst [vmem:[#allocation120_spill] sm:$0xff] %v5284_v48  ;;  %v2128_v62 = vmul.f32 %v5284_v48, %v5284_v48  ;;  %v2124_v1 = vmul.f32 %v5282_v42, %v5282_v42 }
 0x3d7   : > { %2203 = vmatpush.msrb.mxu3 %v2128_v62 }
 0x3d9   : > { %2204 = vmatpush.msrb.mxu3 %v2124_v1 }
 0x3da   : > { %3808 = vmatmul.msk.f32.vlgmr.msrb.gmra.mxu3 %vm880_vm0, %v5815_v52 }
 0x3db   : > { %2351 = vmatpush.msra.mxu3 %v5290_v37 }
 0x3dd   : > { %2352 = vmatpush.msra.mxu3 %v5294_v12 }
 0x3e2   : > { %3812 = vmatmul.msk.f32.vlgmr.msra.gmra.mxu3 %vm880_vm0, %v5815_v52 }
 0x410   : > { %v2146_v39 = vpop.f32.mrf.mxu0 }
 0x411   : > { %v2147_v4 = vadd.f32 1e-05, %v2146_v39 }
 0x413   : > { %4092 = vrsqrt.f32 %v2147_v4  ;;  %vm2215_vm1 = vweird.f32 %v2147_v4 }
 0x419   : > { %v4093_v20 = vpop.eup %4092 }
 0x41a   : > { %v2210_v58 = vmul.f32 %v4093_v20, %v2147_v4  ;;  %vm2216_vm2 = vweird.f32 %v4093_v20 }
 0x41b   : > { %vm2217_vm3 = vmor %vm2215_vm1, %vm2216_vm2 }
 0x41c   : > { %v2211_v54 = vmul.f32 %v4093_v20, %v2210_v58 }
 0x41e   : > { %v2212_v62 = vmul.f32 0.5, %v2211_v54 }
 0x420   : > { %v2166_v32 = vpop.f32.mrf.mxu1  ;;  %v2213_v1 = vsub.f32 1.5, %v2212_v62 }
 0x421   : > { %v2167_v29 = vadd.f32 1e-05, %v2166_v32 }
 0x422   : > { %v2214_v23 = vmul.f32 %v4093_v20, %v2213_v1 }
 0x423   : > { %4094 = vrsqrt.f32 %v2167_v29  ;;  %vm2225_vm4 = vweird.f32 %v2167_v29 }
 0x424   : > { %v2218_v39 = vsel %vm2217_vm3, %v4093_v20, %v2214_v23 }
 0x425   : > { %v2249_v58 = vperm.slane %v2218_v39, 0 }
 0x427   : > { %v2253_v54 = vmul.f32 %v2249_v58, %v5228_v57  ;;  %v2257_v62 = vmul.f32 %v2249_v58, %v5230_v43 }
 0x429   : > { %v4095_v19 = vpop.eup %4094 }
 0x42a   : > { %v2220_v34 = vmul.f32 %v4095_v19, %v2167_v29  ;;  %vm2226_vm5 = vweird.f32 %v4095_v19 }
 0x42b   : > { %vm2227_vm6 = vmor %vm2225_vm4, %vm2226_vm5 }
 0x42c   : > { %v2221_v27 = vmul.f32 %v4095_v19, %v2220_v34 }
 0x42e   : > { %v2222_v61 = vmul.f32 0.5, %v2221_v27  ;;  %v2314_v27 = vpop.f32.mrf.mxu1 }
 0x42f   : > { %v2358_v29 = vperm.slane %v2314_v27, 0  ;;  %v5830_v27 = vld [vmem:[#allocation34_spill] sm:$0xff] }
 0x430   : > { %v2223_v14 = vsub.f32 1.5, %v2222_v61 }
 0x431   : > { %v5305_v23 = vsub.f32 %v5256_v8, %v2358_v29 }
 0x432   : > { %v2224_v22 = vmul.f32 %v4095_v19, %v2223_v14 }
 0x433   : > { %v2374_v61 = vmul.f32 %v5305_v23, %v5305_v23 }
 0x434   : > { %v2228_v41 = vsel %vm2227_vm6, %v4095_v19, %v2224_v22  ;;  %v2294_v14 = vpop.f32.mrf.mxu0 }
 0x435   : > { %v2250_v32 = vperm.slane %v2228_v41, 0  ;;  %v5308_v41 = vsub.f32 %v5260_v44, %v2358_v29  ;;  %v2357_v19 = vperm.slane %v2294_v14, 0  ;;  %2411 = vmatpush.msrb.mxu1 %v2374_v61  ;;  %v5831_v29 = vld [vmem:[#allocation40_spill] sm:$0xff]  ;;  %v5832_v14 = vld [vmem:[#allocation45_spill] sm:$0xff]  ;;  %v5834_v61 = vld [vmem:[#allocation38_spill] sm:$0xff] }
 0x437   : > { %v2254_v4 = vmul.f32 %v2250_v32, %v5238_v38  ;;  %v2258_v1 = vmul.f32 %v2250_v32, %v5240_v59  ;;  %v5313_v57 = vsub.f32 %v5258_v0, %v2357_v19  ;;  %v5316_v43 = vsub.f32 %v5266_v15, %v2357_v19  ;;  %v5822_v32 = vld [vmem:[#allocation27_spill] sm:$0xff]  ;;  %v5835_v19 = vld [vmem:[#allocation44_spill] sm:$0xff] }
 0x438   : > { %v2370_v59 = vmul.f32 %v5308_v41, %v5308_v41 }
 0x439   : > { %v2261_v34 = vpack.c.bf16 %v2254_v4, %v2253_v54  ;;  %v2263_v48 = vpack.c.bf16 %v2258_v1, %v2257_v62  ;;  %v2373_v38 = vmul.f32 %v5313_v57, %v5313_v57  ;;  %v2369_v8 = vmul.f32 %v5316_v43, %v5316_v43  ;;  %v5824_v54 = vld [vmem:[#allocation37_spill] sm:$0xff]  ;;  %v5825_v1 = vld [vmem:[#allocation19_spill] sm:$0xff] }
 0x43a   : > { %2412 = vmatpush.msrb.mxu1 %v2370_v59  ;;  %v5837_v59 = vld [vmem:[#allocation22_spill] sm:$0xff] }
 0x43b   : > { %2265 = vst [vmem:[#allocation12] sm:$0xff] %v2261_v34  ;;  %2391 = vmatpush.msrb.mxu0 %v2373_v38  ;;  %3814 = vmatmul.msk.f32.vlgmr.msrb.gmra.mxu1 %vm880_vm0, %v5815_v52  ;;  %v5829_v34 = vld [vmem:[#allocation20_spill] sm:$0xff]  ;;  %v5836_v38 = vld [vmem:[#allocation49_spill] sm:$0xff] }
 0x43c   : > { %2267 = vst [vmem:[#allocation12 + $0x10] sm:$0xff] %v2263_v48  ;;  %2560 = vmatpush.bf16.msra.mxu1 %v4733_v49 }
 0x43d   : > { %2392 = vmatpush.msrb.mxu0 %v2369_v8  ;;  %v5838_v8 = vld [vmem:[#allocation42_spill] sm:$0xff] }
 0x43e   : > { %3813 = vmatmul.msk.f32.vlgmr.msrb.gmra.mxu0 %vm880_vm0, %v5815_v52 }
 0x43f   : > { %v2186_v22 = vpop.f32.mrf.mxu2  ;;  %2546 = vmatpush.bf16.msra.mxu0 %v4731_v45 }
 0x440   : > { %v2187_v15 = vadd.f32 1e-05, %v2186_v22  ;;  %2561 = vmatpush.bf16.msra.mxu1 %v4764_v11  ;;  %v5833_v22 = vld [vmem:[#allocation21_spill] sm:$0xff] }
 0x442   : > { %4096 = vrsqrt.f32 %v2187_v15  ;;  %vm2235_vm7 = vweird.f32 %v2187_v15 }
 0x443   : > { %2547 = vmatpush.bf16.msra.mxu0 %v4748_v60 }
 0x444   : > { %2562 = vmatpush.bf16.msra.mxu1 %v4780_v25 }
 0x447   : > { %v2334_v0 = vpop.f32.mrf.mxu2  ;;  %2548 = vmatpush.bf16.msra.mxu0 %v4766_v16 }
 0x448   : > { %v2359_v44 = vperm.slane %v2334_v0, 0  ;;  %2563 = vmatpush.bf16.msra.mxu1 %v4793_v9  ;;  %v4097_v45 = vpop.eup %4096  ;;  %v5839_v0 = vld [vmem:[#allocation48_spill] sm:$0xff] }
 0x449   : > { %v2230_v60 = vmul.f32 %v4097_v45, %v2187_v15  ;;  %vm2236_vm8 = vweird.f32 %v4097_v45  ;;  %v5841_v15 = vld [vmem:[#allocation46_spill] sm:$0xff] }
 0x44a   : > { %v5331_v48 = vsub.f32 %v5270_v53, %v2359_v44  ;;  %v5334_v20 = vsub.f32 %v5262_v30, %v2359_v44  ;;  %vm2237_vm9 = vmor %vm2235_vm7, %vm2236_vm8  ;;  %v5840_v44 = vld [vmem:[#allocation23_spill] sm:$0xff] }
 0x44b   : > { %2549 = vmatpush.bf16.msra.mxu0 %v4791_v40  ;;  %v2231_v11 = vmul.f32 %v4097_v45, %v2230_v60  ;;  %v5845_v60 = vld [vmem:[#allocation28_spill] sm:$0xff] }
 0x44c   : > { %v2375_v39 = vmul.f32 %v5334_v20, %v5334_v20  ;;  %v2371_v49 = vmul.f32 %v5331_v48, %v5331_v48  ;;  %2564 = vmatpush.bf16.msra.mxu1 %v4805_v50 }
 0x44e   : > { %2431 = vmatpush.msrb.mxu2 %v2375_v39  ;;  %v5842_v39 = vld [vmem:[#allocation24_spill] sm:$0xff] }
 0x44f   : > { %2550 = vmatpush.bf16.msra.mxu0 %v4803_v35 }
 0x450   : > { %2432 = vmatpush.msrb.mxu2 %v2371_v49  ;;  %2565 = vmatpush.bf16.msra.mxu1 %v4817_v5  ;;  %v5843_v49 = vld [vmem:[#allocation50_spill] sm:$0xff] }
 0x451   : > { %3815 = vmatmul.msk.f32.vlgmr.msrb.gmra.mxu2 %vm880_vm0, %v5815_v52 }
 0x452   : > { %2574 = vmatpush.bf16.msra.mxu2 %v4755_v3  ;;  %v2232_v3 = vmul.f32 0.5, %v2231_v11  ;;  %v5846_v11 = vld [vmem:[#allocation31_spill] sm:$0xff] }
 0x453   : > { %2551 = vmatpush.bf16.msra.mxu0 %v4815_v63 }
 0x454   : > { %2566 = vmatpush.bf16.msra.mxu1 %v4829_v33 }
 0x456   : > { %2575 = vmatpush.bf16.msra.mxu2 %v4774_v21  ;;  %v2233_v21 = vsub.f32 1.5, %v2232_v3  ;;  %v5849_v3 = vld [vmem:[#allocation43_spill] sm:$0xff] }
 0x457   : > { %2552 = vmatpush.bf16.msra.mxu0 %v4827_v24 }
 0x458   : > { %2567 = vmatpush.bf16.msra.mxu1 %v4841_v46  ;;  %v2234_v35 = vmul.f32 %v4097_v45, %v2233_v21  ;;  %v5850_v21 = vld [vmem:[#allocation47_spill] sm:$0xff] }
 0x45a   : > { %2576 = vmatpush.bf16.msra.mxu2 %v4784_v31 }
 0x45b   : > { %2553 = vmatpush.bf16.msra.mxu0 %v4839_v26 }
 0x45c   : > { %2616 = vmatpush.bf16.msrb.mxu1 %v4852_v10 }
 0x45d   : > { %v2206_v16 = vpop.f32.mrf.mxu3 }
 0x45e   : > { %v2207_v25 = vadd.f32 1e-05, %v2206_v16  ;;  %2577 = vmatpush.bf16.msra.mxu2 %v4795_v13  ;;  %v5847_v16 = vld [vmem:[#allocation35_spill] sm:$0xff] }
 0x45f   : > { %2602 = vmatpush.bf16.msrb.mxu0 %v4850_v2 }
 0x460   : > { %4098 = vrsqrt.f32 %v2207_v25  ;;  %2617 = vmatpush.bf16.msrb.mxu1 %v4864_v18  ;;  %vm2245_vm11 = vweird.f32 %v2207_v25  ;;  %v5819_v18 = vld [vmem:[#allocation33_spill] sm:$0xff] }
 0x462   : > { %2578 = vmatpush.bf16.msra.mxu2 %v4807_v51 }
 0x463   : > { %2603 = vmatpush.bf16.msrb.mxu0 %v4862_v17  ;;  %v5818_v17 = vld [vmem:[#allocation29_spill] sm:$0xff] }
 0x464   : > { %2618 = vmatpush.bf16.msrb.mxu1 %v4876_v28 }
 0x465   : > { %v2354_v31 = vpop.f32.mrf.mxu3 }
 0x466   : > { %v4099_v40 = vpop.eup %4098  ;;  %v2360_v9 = vperm.slane %v2354_v31, 0  ;;  %2579 = vmatpush.bf16.msra.mxu2 %v4819_v6  ;;  %v2238_v6 = vsel %vm2237_vm9, %v4097_v45, %v2234_v35  ;;  %v5844_v45 = vld [vmem:[#allocation26_spill] sm:$0xff]  ;;  %v5851_v31 = vld [vmem:[#allocation51_spill] sm:$0xff] }
 0x467   : > { %v2240_v13 = vmul.f32 %v4099_v40, %v2207_v25  ;;  %vm2246_vm10 = vweird.f32 %v4099_v40  ;;  %v2251_v46 = vperm.slane %v2238_v6, 0  ;;  %2604 = vmatpush.bf16.msrb.mxu0 %v5818_v17  ;;  %v5848_v25 = vld [vmem:[#allocation39_spill] sm:$0xff] }
 0x468   : > { %v5365_v50 = vsub.f32 %v5294_v12, %v2360_v9  ;;  %v5368_v51 = vsub.f32 %v5290_v37, %v2360_v9  ;;  %vm2247_vm12 = vmor %vm2245_vm11, %vm2246_vm10  ;;  %2619 = vmatpush.bf16.msrb.mxu1 %v5819_v18  ;;  %v5820_v12 = vld [vmem:[#allocation120_spill] sm:$0xff] }
 0x469   : > { %v2241_v63 = vmul.f32 %v4099_v40, %v2240_v13  ;;  %v2255_v30 = vmul.f32 %v2251_v46, %v5248_v55  ;;  %v2259_v53 = vmul.f32 %v2251_v46, %v5250_v56  ;;  %v5826_v55 = vld [vmem:[#allocation30_spill] sm:$0xff]  ;;  %v5827_v56 = vld [vmem:[#allocation36_spill] sm:$0xff] }
 0x46a   : > { %v2376_v5 = vmul.f32 %v5368_v51, %v5368_v51  ;;  %2580 = vmatpush.bf16.msra.mxu2 %v4831_v36  ;;  %v2372_v33 = vmul.f32 %v5365_v50, %v5365_v50  ;;  %v5817_v36 = vld [vmem:[#allocation25_spill] sm:$0xff] }
 0x46b   : > { %v2242_v24 = vmul.f32 0.5, %v2241_v63 }
 0x46c   : > { %2451 = vmatpush.msrb.mxu3 %v2376_v5  ;;  %2620 = vmatpush.bf16.msrb.mxu1 %v5824_v54 }
 0x46d   : > { %v2243_v26 = vsub.f32 1.5, %v2242_v24 }
 0x46e   : > { %2452 = vmatpush.msrb.mxu3 %v2372_v33  ;;  %2581 = vmatpush.bf16.msra.mxu2 %v4843_v47  ;;  %v5821_v47 = vld [vmem:[#allocation18_spill] sm:$0xff] }
 0x46f   : > { %v2244_v2 = vmul.f32 %v4099_v40, %v2243_v26  ;;  %3816 = vmatmul.msk.f32.vlgmr.msrb.gmra.mxu3 %vm880_vm0, %v5815_v52 }
 0x470   : > { %2588 = vmatpush.bf16.msra.mxu3 %v4761_v7  ;;  %v5823_v7 = vld [vmem:[#allocation32_spill] sm:$0xff] }
 0x471   : > { %v2248_v10 = vsel %vm2247_vm12, %v4099_v40, %v2244_v2  ;;  %2605 = vmatpush.bf16.msrb.mxu0 %v5823_v7 }
 0x472   : > { %2630 = vmatpush.bf16.msrb.mxu2 %v5817_v36  ;;  %v2252_v28 = vperm.slane %v2248_v10, 0 }
 0x474   : > { %v2256_v37 = vmul.f32 %v2252_v28, %v5282_v42  ;;  %v2260_v58 = vmul.f32 %v2252_v28, %v5820_v12  ;;  %2589 = vmatpush.bf16.msra.mxu3 %v5821_v47  ;;  %v5828_v42 = vld [vmem:[#allocation41_spill] sm:$0xff] }
 0x475   : > { %2606 = vmatpush.bf16.msrb.mxu0 %v5827_v56  ;;  %2621 = vmatpush.bf16.msrb.mxu1 %v5828_v42 }
 0x476   : > { %2631 = vmatpush.bf16.msrb.mxu2 %v5822_v32  ;;  %v2262_v62 = vpack.c.bf16 %v2256_v37, %v2255_v30  ;;  %v2264_v4 = vpack.c.bf16 %v2260_v58, %v2259_v53 }
 0x478   : > { %2266 = vst [vmem:[#allocation12 + $0x8] sm:$0xff] %v2262_v62  ;;  %2590 = vmatpush.bf16.msra.mxu3 %v5825_v1 }
 0x479   : > { %2268 = vst [vmem:[#allocation12 + $0x18] sm:$0xff] %v2264_v4  ;;  %2607 = vmatpush.bf16.msrb.mxu0 %v5831_v29  ;;  %2622 = vmatpush.bf16.msrb.mxu1 %v5832_v14 }
 0x47a   : > { %2632 = vmatpush.bf16.msrb.mxu2 %v5826_v55 }
 0x47c   : > { %2591 = vmatpush.bf16.msra.mxu3 %v5829_v34 }
 0x47d   : > { %2608 = vmatpush.bf16.msrb.mxu0 %v5835_v19  ;;  %2623 = vmatpush.bf16.msrb.mxu1 %v5836_v38 }
 0x47e   : > { %2633 = vmatpush.bf16.msrb.mxu2 %v5830_v27 }
 0x480   : > { %2592 = vmatpush.bf16.msra.mxu3 %v5833_v22 }
 0x481   : > { %2609 = vmatpush.bf16.msrb.mxu0 %v5839_v0  ;;  %v4116_v0 = vld [vmem:[#allocation8] sm:$0xf] }
 0x482   : > { %2634 = vmatpush.bf16.msrb.mxu2 %v5834_v61 }
 0x484   : > { %2593 = vmatpush.bf16.msra.mxu3 %v5837_v59 }
 0x486   : > { %2635 = vmatpush.bf16.msrb.mxu2 %v5838_v8 }
 0x488   : > { %2594 = vmatpush.bf16.msra.mxu3 %v5840_v44 }
 0x48a   : > { %2636 = vmatpush.bf16.msrb.mxu2 %v5841_v15 }
 0x48c   : > { %2595 = vmatpush.bf16.msra.mxu3 %v5842_v39 }
 0x48e   : > { %2637 = vmatpush.bf16.msrb.mxu2 %v5843_v49 }
 0x490   : > { %2644 = vmatpush.bf16.msrb.mxu3 %v5844_v45 }
 0x494   : > { %2645 = vmatpush.bf16.msrb.mxu3 %v5845_v60 }
 0x498   : > { %2646 = vmatpush.bf16.msrb.mxu3 %v5846_v11 }
 0x49c   : > { %2647 = vmatpush.bf16.msrb.mxu3 %v5847_v16 }
 0x4a0   : > { %2648 = vmatpush.bf16.msrb.mxu3 %v5848_v25 }
 0x4a4   : > { %2649 = vmatpush.bf16.msrb.mxu3 %v5849_v3 }
 0x4a8   : > { %2650 = vmatpush.bf16.msrb.mxu3 %v5850_v21 }
 0x4ac   : > { %2651 = vmatpush.bf16.msrb.mxu3 %v5851_v31 }
 0x4b8   : > { %v2414_v40 = vpop.f32.mrf.mxu1 }
 0x4b9   : > { %v2415_v9 = vadd.f32 1e-05, %v2414_v40 }
 0x4bb   : > { %v2394_v35 = vpop.f32.mrf.mxu0  ;;  %4100 = vrsqrt.f32 %v2415_v9  ;;  %vm2473_vm1 = vweird.f32 %v2415_v9 }
 0x4bc   : > { %v2395_v5 = vadd.f32 1e-05, %v2394_v35 }
 0x4be   : > { %vm2463_vm6 = vweird.f32 %v2395_v5 }
 0x4c1   : > { %v4101_v24 = vpop.eup %4100 }
 0x4c2   : > { %v2468_v33 = vmul.f32 %v4101_v24, %v2415_v9  ;;  %vm2474_vm2 = vweird.f32 %v4101_v24  ;;  %v5852_v9 = vld [vmem:[#allocation52_spill] sm:$0xff] }
 0x4c3   : > { %vm2475_vm5 = vmor %vm2473_vm1, %vm2474_vm2 }
 0x4c4   : > { %v2469_v2 = vmul.f32 %v4101_v24, %v2468_v33 }
 0x4c6   : > { %v2470_v28 = vmul.f32 0.5, %v2469_v2 }
 0x4c8   : > { %v2471_v37 = vsub.f32 1.5, %v2470_v28 }
 0x4ca   : > { %v2472_v7 = vmul.f32 %v4101_v24, %v2471_v37  ;;  %v5858_v37 = vld [vmem:[#allocation58_spill] sm:$0xff] }
 0x4cc   : > { %v2476_v55 = vsel %vm2475_vm5, %v4101_v24, %v2472_v7  ;;  %v5855_v24 = vld [vmem:[#allocation55_spill] sm:$0xff] }
 0x4cd   : > { %v2501_v29 = vrot.slane %v2476_v55, 7  ;;  %v5863_v7 = vld [vmem:[#allocation63_spill] sm:$0xff]  ;;  %v5868_v55 = vld [vmem:[#allocation68_spill] sm:$0xff] }
 0x4d4   : > { %v2434_v13 = vpop.f32.mrf.mxu2 }
 0x4d5   : > { %v2435_v63 = vadd.f32 1e-05, %v2434_v13 }
 0x4d7   : > { %4102 = vrsqrt.f32 %v2435_v63  ;;  %vm2483_vm3 = vweird.f32 %v2435_v63 }
 0x4d8   : > { %4104 = vrsqrt.f32 %v2395_v5 }
 0x4dd   : > { %v4103_v6 = vpop.eup %4102 }
 0x4de   : > { %v4105_v26 = vpop.eup %4104  ;;  %v2478_v46 = vmul.f32 %v4103_v6, %v2435_v63  ;;  %vm2484_vm4 = vweird.f32 %v4103_v6  ;;  %v5853_v63 = vld [vmem:[#allocation53_spill] sm:$0xff] }
 0x4df   : > { %v2458_v36 = vmul.f32 %v4105_v26, %v2395_v5  ;;  %vm2464_vm7 = vweird.f32 %v4105_v26  ;;  %vm2485_vm8 = vmor %vm2483_vm3, %vm2484_vm4  ;;  %v5854_v5 = vld [vmem:[#allocation54_spill] sm:$0xff] }
 0x4e0   : > { %v2479_v18 = vmul.f32 %v4103_v6, %v2478_v46  ;;  %vm2465_vm10 = vmor %vm2463_vm6, %vm2464_vm7 }
 0x4e1   : > { %v2459_v30 = vmul.f32 %v4105_v26, %v2458_v36 }
 0x4e2   : > { %v2480_v53 = vmul.f32 0.5, %v2479_v18 }
 0x4e3   : > { %v2460_v12 = vmul.f32 0.5, %v2459_v30  ;;  %v5856_v30 = vld [vmem:[#allocation56_spill] sm:$0xff] }
 0x4e4   : > { %v2481_v47 = vsub.f32 1.5, %v2480_v53  ;;  %v5857_v53 = vld [vmem:[#allocation57_spill] sm:$0xff] }
 0x4e5   : > { %v2461_v54 = vsub.f32 1.5, %v2460_v12  ;;  %v5859_v12 = vld [vmem:[#allocation59_spill] sm:$0xff] }
 0x4e6   : > { %v2482_v4 = vmul.f32 %v4103_v6, %v2481_v47  ;;  %v5861_v47 = vld [vmem:[#allocation61_spill] sm:$0xff] }
 0x4e7   : > { %v2462_v56 = vmul.f32 %v4105_v26, %v2461_v54  ;;  %v5864_v54 = vld [vmem:[#allocation64_spill] sm:$0xff] }
 0x4e8   : > { %v2486_v34 = vsel %vm2485_vm8, %v4103_v6, %v2482_v4  ;;  %v5866_v4 = vld [vmem:[#allocation66_spill] sm:$0xff] }
 0x4e9   : > { %v2466_v14 = vsel %vm2465_vm10, %v4105_v26, %v2462_v56  ;;  %v2502_v61 = vrot.slane %v2486_v34, 6  ;;  %v5869_v56 = vld [vmem:[#allocation69_spill] sm:$0xff]  ;;  %v5871_v34 = vld [vmem:[#allocation71_spill] sm:$0xff] }
 0x4ea   : > { %v2504_v38 = vsel %vm1111_vm13, %v2466_v14, %v2501_v29  ;;  %v5873_v29 = vld [vmem:[#allocation73_spill] sm:$0xff]  ;;  %v5874_v14 = vld [vmem:[#allocation74_spill] sm:$0xff] }
 0x4f2   : > { %v2454_v10 = vpop.f32.mrf.mxu3 }
 0x4f3   : > { %v2455_v17 = vadd.f32 1e-05, %v2454_v10 }
 0x4f5   : > { %4106 = vrsqrt.f32 %v2455_v17  ;;  %vm2493_vm11 = vweird.f32 %v2455_v17 }
 0x4fb   : > { %v4107_v58 = vpop.eup %4106 }
 0x4fc   : > { %v2488_v32 = vmul.f32 %v4107_v58, %v2455_v17  ;;  %vm2494_vm9 = vweird.f32 %v4107_v58 }
 0x4fd   : > { %vm2495_vm12 = vmor %vm2493_vm11, %vm2494_vm9 }
 0x4fe   : > { %v2489_v62 = vmul.f32 %v4107_v58, %v2488_v32  ;;  %v5862_v32 = vld [vmem:[#allocation62_spill] sm:$0xff] }
 0x500   : > { %v2490_v1 = vmul.f32 0.5, %v2489_v62  ;;  %v5865_v62 = vld [vmem:[#allocation65_spill] sm:$0xff] }
 0x502   : > { %v2491_v42 = vsub.f32 1.5, %v2490_v1  ;;  %v5867_v1 = vld [vmem:[#allocation67_spill] sm:$0xff] }
 0x504   : > { %v2492_v27 = vmul.f32 %v4107_v58, %v2491_v42  ;;  %v5870_v42 = vld [vmem:[#allocation70_spill] sm:$0xff] }
 0x506   : > { %v2496_v22 = vsel %vm2495_vm12, %v4107_v58, %v2492_v27  ;;  %v5860_v58 = vld [vmem:[#allocation60_spill] sm:$0xff] }
 0x507   : > { %v2503_v19 = vrot.slane %v2496_v22, 5  ;;  %v5872_v27 = vld [vmem:[#allocation72_spill] sm:$0xff]  ;;  %v5875_v22 = vld [vmem:[#allocation75_spill] sm:$0xff] }
 0x509   : > { %v2505_v59 = vsel %vm1113_vm14, %v2502_v61, %v2503_v19  ;;  %v5876_v61 = vld [vmem:[#allocation76_spill] sm:$0xff]  ;;  %v5877_v19 = vld [vmem:[#allocation77_spill] sm:$0xff] }
 0x50a   : > { %v2506_v8 = vsel %vm1115_vm15, %v2504_v38, %v2505_v59  ;;  %v5878_v38 = vld [vmem:[#allocation78_spill] sm:$0xff]  ;;  %v5879_v59 = vld [vmem:[#allocation79_spill] sm:$0xff] }
 0x50b   : > { %v2508_v44 = vmul.f32 %v4116_v0, %v2506_v8  ;;  %v5880_v8 = vld [vmem:[#allocation80_spill] sm:$0xff]  ;;  %v5881_v0 = vld [vmem:[#allocation81_spill] sm:$0xff] }
 0x50d   : > { %v2510_v15 = vperm.slane %v2508_v44, 0  ;;  %v2511_v39 = vperm.slane %v2508_v44, 1  ;;  %v2512_v49 = vperm.slane %v2508_v44, 2  ;;  %v2513_v45 = vperm.slane %v2508_v44, 3  ;;  %v5882_v44 = vld [vmem:[#allocation82_spill] sm:$0xff] }
 0x50f   : > { %v2518_v60 = vmul.f32 %v2510_v15, %v5316_v43  ;;  %v2522_v11 = vmul.f32 %v2510_v15, %v5313_v57  ;;  %v2519_v16 = vmul.f32 %v2511_v39, %v5308_v41  ;;  %v2523_v25 = vmul.f32 %v2511_v39, %v5305_v23  ;;  %v5883_v15 = vld [vmem:[#allocation83_spill] sm:$0xff]  ;;  %v5884_v39 = vld [vmem:[#allocation84_spill] sm:$0xff] }
 0x510   : > { %v2520_v3 = vmul.f32 %v2512_v49, %v5331_v48  ;;  %v2524_v21 = vmul.f32 %v2512_v49, %v5334_v20  ;;  %v2521_v31 = vmul.f32 %v2513_v45, %v5365_v50  ;;  %v2525_v40 = vmul.f32 %v2513_v45, %v5368_v51  ;;  %v5885_v49 = vld [vmem:[#allocation85_spill] sm:$0xff]  ;;  %v5886_v45 = vld [vmem:[#allocation86_spill] sm:$0xff] }
 0x511   : > { %v2526_v13 = vadd.f32 %v2518_v60, %v5852_v9  ;;  %v2530_v35 = vadd.f32 %v2522_v11, %v5852_v9  ;;  %v2527_v43 = vadd.f32 %v2519_v16, %v5853_v63  ;;  %v2531_v57 = vadd.f32 %v2523_v25, %v5853_v63  ;;  %v5887_v60 = vld [vmem:[#allocation87_spill] sm:$0xff]  ;;  %v5888_v11 = vld [vmem:[#allocation88_spill] sm:$0xff]  ;;  %v5889_v16 = vld [vmem:[#allocation89_spill] sm:$0xff] }
 0x512   : > { %v2528_v41 = vadd.f32 %v2520_v3, %v5854_v5  ;;  %v2532_v23 = vadd.f32 %v2524_v21, %v5854_v5  ;;  %v2529_v48 = vadd.f32 %v2521_v31, %v5855_v24  ;;  %v2533_v20 = vadd.f32 %v2525_v40, %v5855_v24  ;;  %v5890_v25 = vld [vmem:[#allocation90_spill] sm:$0xff]  ;;  %v5891_v3 = vld [vmem:[#allocation91_spill] sm:$0xff]  ;;  %v5892_v21 = vld [vmem:[#allocation92_spill] sm:$0xff] }
 0x513   : > { %v2534_v6 = vmax.f32 %v2526_v13, 0.0  ;;  %v2538_v50 = vmax.f32 %v2530_v35, 0.0  ;;  %v2535_v33 = vmax.f32 %v2527_v43, 0.0  ;;  %v2539_v51 = vmax.f32 %v2531_v57, 0.0  ;;  %v5893_v31 = vld [vmem:[#allocation93_spill] sm:$0xff]  ;;  %v5894_v40 = vld [vmem:[#allocation94_spill] sm:$0xff] }
 0x514   : > { %v2536_v26 = vmax.f32 %v2528_v41, 0.0  ;;  %v2540_v46 = vmax.f32 %v2532_v23, 0.0  ;;  %v2537_v2 = vmax.f32 %v2529_v48, 0.0  ;;  %v2541_v36 = vmax.f32 %v2533_v20, 0.0  ;;  %v5895_v9 = vld [vmem:[#allocation95_spill] sm:$0xff]  ;;  %v5896_v13 = vld [vmem:[#allocation96_spill] sm:$0xff] }
 0x515   : > { %v5439_v10 = vpack.c.bf16 %v2538_v50, %v2534_v6  ;;  %v5441_v17 = vpack.c.bf16 %v2539_v51, %v2535_v33  ;;  %v5897_v35 = vld [vmem:[#allocation97_spill] sm:$0xff]  ;;  %v5898_v63 = vld [vmem:[#allocation98_spill] sm:$0xff]  ;;  %v5899_v43 = vld [vmem:[#allocation99_spill] sm:$0xff] }
 0x516   : > { %v5443_v18 = vpack.c.bf16 %v2540_v46, %v2536_v26  ;;  %v5445_v28 = vpack.c.bf16 %v2541_v36, %v2537_v2  ;;  %v5900_v57 = vld [vmem:[#allocation100_spill] sm:$0xff]  ;;  %v5901_v5 = vld [vmem:[#allocation101_spill] sm:$0xff]  ;;  %v5902_v41 = vld [vmem:[#allocation102_spill] sm:$0xff] }
 0x517   : > { %2554 = vmatmul.bf16.vlgmr.msra.gmra.mxu0 %v5439_v10  ;;  %2568 = vmatmul.bf16.vlgmr.msra.gmra.mxu1 %v5441_v17  ;;  %v5903_v23 = vld [vmem:[#allocation103_spill] sm:$0xff]  ;;  %v5904_v24 = vld [vmem:[#allocation104_spill] sm:$0xff]  ;;  %v5905_v48 = vld [vmem:[#allocation105_spill] sm:$0xff] }
 0x518   : > { %2582 = vmatmul.bf16.vlgmr.msra.gmra.mxu2 %v5443_v18  ;;  %2596 = vmatmul.bf16.vlgmr.msra.gmra.mxu3 %v5445_v28  ;;  %v5906_v20 = vld [vmem:[#allocation106_spill] sm:$0xff]  ;;  %v5907_v6 = vld [vmem:[#allocation107_spill] sm:$0xff]  ;;  %v5908_v50 = vld [vmem:[#allocation108_spill] sm:$0xff] }
 0x519   : > { %2658 = vmatpush.bf16.msra.mxu0 %v5856_v30  ;;  %2672 = vmatpush.bf16.msra.mxu1 %v5857_v53  ;;  %v5909_v33 = vld [vmem:[#allocation109_spill] sm:$0xff]  ;;  %v5910_v51 = vld [vmem:[#allocation110_spill] sm:$0xff]  ;;  %v5911_v26 = vld [vmem:[#allocation111_spill] sm:$0xff] }
 0x51a   : > { %2686 = vmatpush.bf16.msra.mxu2 %v5858_v37  ;;  %2700 = vmatpush.bf16.msra.mxu3 %v5859_v12  ;;  %v5912_v46 = vld [vmem:[#allocation112_spill] sm:$0xff]  ;;  %v5913_v2 = vld [vmem:[#allocation113_spill] sm:$0xff]  ;;  %v5914_v36 = vld [vmem:[#allocation114_spill] sm:$0xff] }
 0x51b   : > { %v5915_v30 = vld [vmem:[#allocation115_spill] sm:$0xff]  ;;  %v5916_v53 = vld [vmem:[#allocation116_spill] sm:$0xff]  ;;  %v5917_v37 = vld [vmem:[#allocation117_spill] sm:$0xff] }
 0x51c   : > { %v5918_v12 = vld [vmem:[#allocation118_spill] sm:$0xff] }
 0x51d   : > { %2659 = vmatpush.bf16.msra.mxu0 %v5860_v58  ;;  %2673 = vmatpush.bf16.msra.mxu1 %v5861_v47  ;;  %v5919_v58 = vld [vmem:[#allocation119_spill] sm:$0xff] }
 0x51e   : > { %2687 = vmatpush.bf16.msra.mxu2 %v5862_v32  ;;  %2701 = vmatpush.bf16.msra.mxu3 %v5863_v7 }
 0x521   : > { %2660 = vmatpush.bf16.msra.mxu0 %v5864_v54  ;;  %2674 = vmatpush.bf16.msra.mxu1 %v5865_v62 }
 0x522   : > { %2688 = vmatpush.bf16.msra.mxu2 %v5866_v4  ;;  %2702 = vmatpush.bf16.msra.mxu3 %v5867_v1 }
 0x525   : > { %2661 = vmatpush.bf16.msra.mxu0 %v5868_v55  ;;  %2675 = vmatpush.bf16.msra.mxu1 %v5869_v56 }
 0x526   : > { %2689 = vmatpush.bf16.msra.mxu2 %v5870_v42  ;;  %2703 = vmatpush.bf16.msra.mxu3 %v5871_v34 }
 0x527   : > { %2610 = vmatmul.bf16.vlgmr.msrb.gmra.mxu0 %v5439_v10  ;;  %2624 = vmatmul.bf16.vlgmr.msrb.gmra.mxu1 %v5441_v17 }
 0x528   : > { %2638 = vmatmul.bf16.vlgmr.msrb.gmra.mxu2 %v5443_v18  ;;  %2652 = vmatmul.bf16.vlgmr.msrb.gmra.mxu3 %v5445_v28 }
 0x529   : > { %2662 = vmatpush.bf16.msra.mxu0 %v5872_v27  ;;  %2676 = vmatpush.bf16.msra.mxu1 %v5873_v29 }
 0x52a   : > { %2690 = vmatpush.bf16.msra.mxu2 %v5874_v14  ;;  %2704 = vmatpush.bf16.msra.mxu3 %v5875_v22 }
 0x52d   : > { %2663 = vmatpush.bf16.msra.mxu0 %v5876_v61  ;;  %2677 = vmatpush.bf16.msra.mxu1 %v5877_v19 }
 0x52e   : > { %2691 = vmatpush.bf16.msra.mxu2 %v5878_v38  ;;  %2705 = vmatpush.bf16.msra.mxu3 %v5879_v59 }
 0x531   : > { %2664 = vmatpush.bf16.msra.mxu0 %v5880_v8  ;;  %2678 = vmatpush.bf16.msra.mxu1 %v5881_v0 }
 0x532   : > { %2692 = vmatpush.bf16.msra.mxu2 %v5882_v44  ;;  %2706 = vmatpush.bf16.msra.mxu3 %v5883_v15 }
 0x535   : > { %2665 = vmatpush.bf16.msra.mxu0 %v5884_v39  ;;  %2679 = vmatpush.bf16.msra.mxu1 %v5885_v49 }
 0x536   : > { %2693 = vmatpush.bf16.msra.mxu2 %v5886_v45  ;;  %2707 = vmatpush.bf16.msra.mxu3 %v5887_v60 }
 0x538   : > { %2666 = vmatmul.bf16.vlgmr.msra.gmra.mxu0 %v5439_v10  ;;  %2680 = vmatmul.bf16.vlgmr.msra.gmra.mxu1 %v5441_v17 }
 0x539   : > { %2714 = vmatpush.bf16.msrb.mxu0 %v5888_v11  ;;  %2728 = vmatpush.bf16.msrb.mxu1 %v5889_v16 }
 0x53a   : > { %2742 = vmatpush.bf16.msrb.mxu2 %v5890_v25  ;;  %2756 = vmatpush.bf16.msrb.mxu3 %v5891_v3 }
 0x53b   : > { %2694 = vmatmul.bf16.vlgmr.msra.gmra.mxu2 %v5443_v18  ;;  %2708 = vmatmul.bf16.vlgmr.msra.gmra.mxu3 %v5445_v28 }
 0x53d   : > { %2715 = vmatpush.bf16.msrb.mxu0 %v5892_v21  ;;  %2729 = vmatpush.bf16.msrb.mxu1 %v5893_v31 }
 0x53e   : > { %2743 = vmatpush.bf16.msrb.mxu2 %v5894_v40  ;;  %2757 = vmatpush.bf16.msrb.mxu3 %v5895_v9 }
 0x541   : > { %2716 = vmatpush.bf16.msrb.mxu0 %v5896_v13  ;;  %2730 = vmatpush.bf16.msrb.mxu1 %v5897_v35 }
 0x542   : > { %2744 = vmatpush.bf16.msrb.mxu2 %v5898_v63  ;;  %2758 = vmatpush.bf16.msrb.mxu3 %v5899_v43 }
 0x545   : > { %2717 = vmatpush.bf16.msrb.mxu0 %v5900_v57  ;;  %2731 = vmatpush.bf16.msrb.mxu1 %v5901_v5 }
 0x546   : > { %2745 = vmatpush.bf16.msrb.mxu2 %v5902_v41  ;;  %2759 = vmatpush.bf16.msrb.mxu3 %v5903_v23 }
 0x549   : > { %2718 = vmatpush.bf16.msrb.mxu0 %v5904_v24  ;;  %2732 = vmatpush.bf16.msrb.mxu1 %v5905_v48 }
 0x54a   : > { %2746 = vmatpush.bf16.msrb.mxu2 %v5906_v20  ;;  %2760 = vmatpush.bf16.msrb.mxu3 %v5907_v6 }
 0x54d   : > { %2719 = vmatpush.bf16.msrb.mxu0 %v5908_v50  ;;  %2733 = vmatpush.bf16.msrb.mxu1 %v5909_v33 }
 0x54e   : > { %2747 = vmatpush.bf16.msrb.mxu2 %v5910_v51  ;;  %2761 = vmatpush.bf16.msrb.mxu3 %v5911_v26 }
 0x551   : > { %2720 = vmatpush.bf16.msrb.mxu0 %v5912_v46  ;;  %2734 = vmatpush.bf16.msrb.mxu1 %v5913_v2 }
 0x552   : > { %2748 = vmatpush.bf16.msrb.mxu2 %v5914_v36  ;;  %2762 = vmatpush.bf16.msrb.mxu3 %v5915_v30 }
 0x555   : > { %2721 = vmatpush.bf16.msrb.mxu0 %v5916_v53  ;;  %2735 = vmatpush.bf16.msrb.mxu1 %v5917_v37 }
 0x556   : > { %2749 = vmatpush.bf16.msrb.mxu2 %v5918_v12  ;;  %2763 = vmatpush.bf16.msrb.mxu3 %v5919_v58 }
 0x558   : > { %2722 = vmatmul.bf16.vlgmr.msrb.gmra.mxu0 %v5439_v10  ;;  %2736 = vmatmul.bf16.vlgmr.msrb.gmra.mxu1 %v5441_v17 }
 0x559   : > { %2750 = vmatmul.bf16.vlgmr.msrb.gmra.mxu2 %v5443_v18  ;;  %2764 = vmatmul.bf16.vlgmr.msrb.gmra.mxu3 %v5445_v28 }
 0x594   : > { %v2555_v47 = vpop.f32.mrf.mxu0  ;;  %v2569_v32 = vpop.f32.mrf.mxu1 }
 0x595   : > { %v2570_v1 = vadd.f32 %v2569_v32, %v2555_v47 }
 0x59b   : > { %v2583_v7 = vpop.f32.mrf.mxu2  ;;  %v2597_v54 = vpop.f32.mrf.mxu3 }
 0x59c   : > { %v2557_v62 = vpop.f32.mrf.mxu0  ;;  %v2571_v4 = vpop.f32.mrf.mxu1  ;;  %v2584_v34 = vadd.f32 %v2583_v7, %v2570_v1 }
 0x59d   : > { %v2572_v55 = vadd.f32 %v2571_v4, %v2557_v62 }
 0x59e   : > { %v2598_v17 = vadd.f32 %v2597_v54, %v2584_v34 }
 0x5a3   : > { %v2585_v56 = vpop.f32.mrf.mxu2  ;;  %v2599_v42 = vpop.f32.mrf.mxu3 }
 0x5a4   : > { %v2586_v27 = vadd.f32 %v2585_v56, %v2572_v55  ;;  %v2611_v29 = vpop.f32.mrf.mxu0  ;;  %v2625_v10 = vpop.f32.mrf.mxu1 }
 0x5a5   : > { %v2626_v19 = vadd.f32 %v2625_v10, %v2611_v29 }
 0x5a6   : > { %v2600_v14 = vadd.f32 %v2599_v42, %v2586_v27 }
 0x5a8   : > { %2784 = vmatpush.msra.mxu0 %v2600_v14 }
 0x5aa   : > { %2785 = vmatpush.msra.mxu0 %v2598_v17 }
 0x5ab   : > { %v2639_v18 = vpop.f32.mrf.mxu2  ;;  %v2653_v28 = vpop.f32.mrf.mxu3  ;;  %3817 = vmatmul.msk.f32.vlgmr.msra.gmra.mxu0 %vm880_vm0, %v5815_v52 }
 0x5ac   : > { %v2613_v22 = vpop.f32.mrf.mxu0  ;;  %v2627_v61 = vpop.f32.mrf.mxu1  ;;  %v2640_v0 = vadd.f32 %v2639_v18, %v2626_v19 }
 0x5ad   : > { %v2628_v38 = vadd.f32 %v2627_v61, %v2613_v22 }
 0x5ae   : > { %v2654_v45 = vadd.f32 %v2653_v28, %v2640_v0 }
 0x5b3   : > { %v2641_v59 = vpop.f32.mrf.mxu2  ;;  %v2655_v8 = vpop.f32.mrf.mxu3 }
 0x5b4   : > { %v2642_v44 = vadd.f32 %v2641_v59, %v2628_v38 }
 0x5b5   : > { %v2667_v39 = vpop.f32.mrf.mxu0  ;;  %v2681_v49 = vpop.f32.mrf.mxu1 }
 0x5b6   : > { %v2656_v15 = vadd.f32 %v2655_v8, %v2642_v44  ;;  %v2682_v3 = vadd.f32 %v2681_v49, %v2667_v39 }
 0x5b8   : > { %2804 = vmatpush.msra.mxu1 %v2656_v15 }
 0x5ba   : > { %2805 = vmatpush.msra.mxu1 %v2654_v45 }
 0x5bb   : > { %3818 = vmatmul.msk.f32.vlgmr.msra.gmra.mxu1 %vm880_vm0, %v5815_v52 }
 0x5bd   : > { %v2669_v16 = vpop.f32.mrf.mxu0  ;;  %v2683_v25 = vpop.f32.mrf.mxu1 }
 0x5be   : > { %v2695_v60 = vpop.f32.mrf.mxu2  ;;  %v2709_v11 = vpop.f32.mrf.mxu3  ;;  %v2684_v21 = vadd.f32 %v2683_v25, %v2669_v16 }
 0x5bf   : > { %v2696_v40 = vadd.f32 %v2695_v60, %v2682_v3 }
 0x5c1   : > { %v2710_v63 = vadd.f32 %v2709_v11, %v2696_v40 }
 0x5c6   : > { %v2697_v31 = vpop.f32.mrf.mxu2  ;;  %v2711_v13 = vpop.f32.mrf.mxu3 }
 0x5c7   : > { %v2698_v9 = vadd.f32 %v2697_v31, %v2684_v21 }
 0x5c9   : > { %v2712_v35 = vadd.f32 %v2711_v13, %v2698_v9 }
 0x5cb   : > { %2824 = vmatpush.msra.mxu2 %v2712_v35 }
 0x5cd   : > { %2825 = vmatpush.msra.mxu2 %v2710_v63 }
 0x5ce   : > { %3819 = vmatmul.msk.f32.vlgmr.msra.gmra.mxu2 %vm880_vm0, %v5815_v52 }
 0x5d5   : > { %v2723_v43 = vpop.f32.mrf.mxu0  ;;  %v2737_v57 = vpop.f32.mrf.mxu1 }
 0x5d6   : > { %v2738_v48 = vadd.f32 %v2737_v57, %v2723_v43 }
 0x5dc   : > { %v2751_v5 = vpop.f32.mrf.mxu2  ;;  %v2765_v41 = vpop.f32.mrf.mxu3 }
 0x5dd   : > { %v2725_v23 = vpop.f32.mrf.mxu0  ;;  %v2739_v24 = vpop.f32.mrf.mxu1  ;;  %v2752_v50 = vadd.f32 %v2751_v5, %v2738_v48 }
 0x5de   : > { %v2740_v20 = vadd.f32 %v2739_v24, %v2725_v23 }
 0x5df   : > { %v2766_v46 = vadd.f32 %v2765_v41, %v2752_v50 }
 0x5e4   : > { %v2753_v6 = vpop.f32.mrf.mxu2  ;;  %v2767_v51 = vpop.f32.mrf.mxu3 }
 0x5e5   : > { %v2754_v33 = vadd.f32 %v2753_v6, %v2740_v20 }
 0x5e7   : > { %v2768_v26 = vadd.f32 %v2767_v51, %v2754_v33 }
 0x5e9   : > { %2844 = vmatpush.msra.mxu3 %v2768_v26 }
 0x5eb   : > { %2845 = vmatpush.msra.mxu3 %v2766_v46 }
 0x5ec   : > { %3820 = vmatmul.msk.f32.vlgmr.msra.gmra.mxu3 %vm880_vm0, %v5815_v52 }
 0x628   : > { %v2787_v2 = vpop.f32.mrf.mxu0 }
 0x629   : > { %v2850_v36 = vperm.slane %v2787_v2, 0 }
 0x62b   : > { %v2854_v30 = vsub.f32 %v2598_v17, %v2850_v36  ;;  %v2858_v53 = vsub.f32 %v2600_v14, %v2850_v36 }
 0x62d   : > { %v2866_v37 = vmul.f32 %v2858_v53, %v2858_v53  ;;  %v2862_v12 = vmul.f32 %v2854_v30, %v2854_v30 }
 0x62f   : > { %2884 = vmatpush.msrb.mxu0 %v2866_v37 }
 0x631   : > { %2885 = vmatpush.msrb.mxu0 %v2862_v12 }
 0x632   : > { %3821 = vmatmul.msk.f32.vlgmr.msrb.gmra.mxu0 %vm880_vm0, %v5815_v52 }
 0x638   : > { %v2807_v58 = vpop.f32.mrf.mxu1 }
 0x639   : > { %v2851_v47 = vperm.slane %v2807_v58, 0 }
 0x63b   : > { %v2855_v32 = vsub.f32 %v2654_v45, %v2851_v47  ;;  %v2859_v7 = vsub.f32 %v2656_v15, %v2851_v47 }
 0x63d   : > { %v2867_v54 = vmul.f32 %v2859_v7, %v2859_v7  ;;  %v2863_v62 = vmul.f32 %v2855_v32, %v2855_v32 }
 0x63f   : > { %2904 = vmatpush.msrb.mxu1 %v2867_v54 }
 0x641   : > { %2905 = vmatpush.msrb.mxu1 %v2863_v62 }
 0x642   : > { %3822 = vmatmul.msk.f32.vlgmr.msrb.gmra.mxu1 %vm880_vm0, %v5815_v52 }
 0x651   : > { %v2827_v4 = vpop.f32.mrf.mxu2 }
 0x652   : > { %v2852_v1 = vperm.slane %v2827_v4, 0 }
 0x654   : > { %v5539_v55 = vsub.f32 %v2710_v63, %v2852_v1  ;;  %v5541_v56 = vsub.f32 %v2712_v35, %v2852_v1 }
 0x656   : > { %v2868_v42 = vmul.f32 %v5541_v56, %v5541_v56  ;;  %v2864_v34 = vmul.f32 %v5539_v55, %v5539_v55 }
 0x658   : > { %2924 = vmatpush.msrb.mxu2 %v2868_v42 }
 0x65a   : > { %2925 = vmatpush.msrb.mxu2 %v2864_v34 }
 0x65b   : > { %3823 = vmatmul.msk.f32.vlgmr.msrb.gmra.mxu2 %vm880_vm0, %v5815_v52 }
 0x66f   : > { %v2847_v27 = vpop.f32.mrf.mxu3 }
 0x670   : > { %v2853_v29 = vperm.slane %v2847_v27, 0 }
 0x672   : > { %v5549_v10 = vsub.f32 %v2766_v46, %v2853_v29  ;;  %v5551_v14 = vsub.f32 %v2768_v26, %v2853_v29 }
 0x674   : > { %v2869_v17 = vmul.f32 %v5551_v14, %v5551_v14  ;;  %v2865_v18 = vmul.f32 %v5549_v10, %v5549_v10 }
 0x676   : > { %2944 = vmatpush.msrb.mxu3 %v2869_v17 }
 0x678   : > { %2945 = vmatpush.msrb.mxu3 %v2865_v18 }
 0x679   : > { %3824 = vmatmul.msk.f32.vlgmr.msrb.gmra.mxu3 %vm880_vm0, %v5815_v52 }
 0x6af   : > { %v2887_v28 = vpop.f32.mrf.mxu0 }
 0x6b0   : > { %v2888_v22 = vadd.f32 1e-05, %v2887_v28 }
 0x6b2   : > { %4108 = vrsqrt.f32 %v2888_v22  ;;  %vm2956_vm13 = vweird.f32 %v2888_v22 }
 0x6b8   : > { %v4109_v61 = vpop.eup %4108 }
 0x6b9   : > { %v2951_v19 = vmul.f32 %v4109_v61, %v2888_v22  ;;  %vm2957_vm14 = vweird.f32 %v4109_v61 }
 0x6ba   : > { %vm2958_vm15 = vmor %vm2956_vm13, %vm2957_vm14 }
 0x6bb   : > { %v2952_v38 = vmul.f32 %v4109_v61, %v2951_v19 }
 0x6bd   : > { %v2953_v0 = vmul.f32 0.5, %v2952_v38 }
 0x6bf   : > { %v2907_v59 = vpop.f32.mrf.mxu1  ;;  %v2954_v44 = vsub.f32 1.5, %v2953_v0 }
 0x6c0   : > { %v2908_v8 = vadd.f32 1e-05, %v2907_v59 }
 0x6c1   : > { %v2955_v49 = vmul.f32 %v4109_v61, %v2954_v44 }
 0x6c2   : > { %4110 = vrsqrt.f32 %v2908_v8  ;;  %vm2966_vm0 = vweird.f32 %v2908_v8 }
 0x6c3   : > { %v2959_v52 = vsel %vm2958_vm15, %v4109_v61, %v2955_v49 }
 0x6c4   : > { %v2990_v25 = vperm.slane %v2959_v52, 0 }
 0x6c6   : > { %v2994_v31 = vmul.f32 %v2990_v25, %v2854_v30  ;;  %v2998_v40 = vmul.f32 %v2990_v25, %v2858_v53 }
 0x6c8   : > { %v4111_v15 = vpop.eup %4110 }
 0x6c9   : > { %v2961_v39 = vmul.f32 %v4111_v15, %v2908_v8  ;;  %vm2967_vm1 = vweird.f32 %v4111_v15 }
 0x6ca   : > { %vm2968_vm2 = vmor %vm2966_vm0, %vm2967_vm1 }
 0x6cb   : > { %v2962_v45 = vmul.f32 %v4111_v15, %v2961_v39 }
 0x6cd   : > { %v2963_v60 = vmul.f32 0.5, %v2962_v45 }
 0x6cf   : > { %v2964_v11 = vsub.f32 1.5, %v2963_v60 }
 0x6d1   : > { %v2965_v16 = vmul.f32 %v4111_v15, %v2964_v11 }
 0x6d3   : > { %v2969_v3 = vsel %vm2968_vm2, %v4111_v15, %v2965_v16 }
 0x6d4   : > { %v2991_v21 = vperm.slane %v2969_v3, 0 }
 0x6d6   : > { %v2995_v9 = vmul.f32 %v2991_v21, %v2855_v32  ;;  %v2999_v13 = vmul.f32 %v2991_v21, %v2859_v7 }
 0x6d8   : > { %v3002_v35 = vpack.c.bf16 %v2995_v9, %v2994_v31  ;;  %v3004_v63 = vpack.c.bf16 %v2999_v13, %v2998_v40 }
 0x6da   : > { %3007 = vst [vmem:[#allocation12 + $0x20] sm:$0xff] %v3002_v35 }
 0x6db   : > { %3009 = vst [vmem:[#allocation12 + $0x30] sm:$0xff] %v3004_v63 }
 0x6de   : > { %v2927_v43 = vpop.f32.mrf.mxu2 }
 0x6df   : > { %v2928_v57 = vadd.f32 1e-05, %v2927_v43 }
 0x6e1   : > { %4112 = vrsqrt.f32 %v2928_v57  ;;  %vm2976_vm3 = vweird.f32 %v2928_v57 }
 0x6e7   : > { %v4113_v5 = vpop.eup %4112 }
 0x6e8   : > { %v2971_v41 = vmul.f32 %v4113_v5, %v2928_v57  ;;  %vm2977_vm4 = vweird.f32 %v4113_v5 }
 0x6e9   : > { %vm2978_vm5 = vmor %vm2976_vm3, %vm2977_vm4 }
 0x6ea   : > { %v2972_v23 = vmul.f32 %v4113_v5, %v2971_v41 }
 0x6ec   : > { %v2973_v20 = vmul.f32 0.5, %v2972_v23 }
 0x6ee   : > { %v2974_v6 = vsub.f32 1.5, %v2973_v20 }
 0x6f0   : > { %v2975_v51 = vmul.f32 %v4113_v5, %v2974_v6 }
 0x6f2   : > { %v2979_v2 = vsel %vm2978_vm5, %v4113_v5, %v2975_v51 }
 0x6f3   : > { %v2992_v53 = vperm.slane %v2979_v2, 0 }
 0x6f5   : > { %v2996_v58 = vmul.f32 %v2992_v53, %v5539_v55  ;;  %v3000_v47 = vmul.f32 %v2992_v53, %v5541_v56 }
 0x6fc   : > { %v2947_v24 = vpop.f32.mrf.mxu3 }
 0x6fd   : > { %v2948_v48 = vadd.f32 1e-05, %v2947_v24 }
 0x6ff   : > { %4114 = vrsqrt.f32 %v2948_v48  ;;  %vm2986_vm7 = vweird.f32 %v2948_v48 }
 0x705   : > { %v4115_v50 = vpop.eup %4114 }
 0x706   : > { %v2981_v33 = vmul.f32 %v4115_v50, %v2948_v48  ;;  %vm2987_vm6 = vweird.f32 %v4115_v50 }
 0x707   : > { %vm2988_vm8 = vmor %vm2986_vm7, %vm2987_vm6 }
 0x708   : > { %v2982_v26 = vmul.f32 %v4115_v50, %v2981_v33 }
 0x70a   : > { %v2983_v46 = vmul.f32 0.5, %v2982_v26 }
 0x70c   : > { %v2984_v36 = vsub.f32 1.5, %v2983_v46 }
 0x70e   : > { %v2985_v30 = vmul.f32 %v4115_v50, %v2984_v36 }
 0x710   : > { %v2989_v37 = vsel %vm2988_vm8, %v4115_v50, %v2985_v30 }
 0x711   : > { %v2993_v12 = vperm.slane %v2989_v37, 0 }
 0x713   : > { %v2997_v32 = vmul.f32 %v2993_v12, %v5549_v10  ;;  %v3001_v7 = vmul.f32 %v2993_v12, %v5551_v14 }
 0x715   : > { %v3003_v54 = vpack.c.bf16 %v2997_v32, %v2996_v58  ;;  %v3005_v62 = vpack.c.bf16 %v3001_v7, %v3000_v47 }
 0x717   : > { %3008 = vst [vmem:[#allocation12 + $0x28] sm:$0xff] %v3003_v54 }
 0x718   : > { %3010 = vst [vmem:[#allocation12 + $0x38] sm:$0xff] %v3005_v62 }
 0x719 PF: > { %p4037_p8 = scmp.eq.s32.totalorder %s4414_s5, 1  ;;  %s4357_s30 = smov [#allocation12]  }
 0x71a   : > { %s3016_s7 = sshll.u32 %s4357_s30, 4  ;;  %s3018_s27 = sshll.u32 %s5586_s6, 4  ;;  %s3017_s7 = int_to_ptr.vmem [resolvable:$true] %s3016_s7  ;;  %s3019_s27 = int_to_ptr.hbm [resolvable:$true] %s3018_s27 }
 0x71b   : > { %s4358_s13 = smov 256   ;;  %s4359_s12 = smov 16  }
 0x71c   : > { %4010 = dma.vmem_to_hbm [thread:$0]  (%p4037_p8), %s3017_s7, 1024, %s3019_s27, [#allocation5], %s4358_s13, %s4358_s13, %s4359_s12  }
 0x71d   : > { %4328 = dma.done.wait (%p4037_p8), [#allocation5], 1024  }
 0x71e   : > { %4330 = vsyncadd (%p4037_p8), [#allocation5], 4294966272 }
 0x71f PF: > { %p21_p9 = scmp.ge.s32.totalorder %s4417_s25, 4   ;;  %s5920_s21 = smov %s4337_s22 }
 0x720   : > { %s5921_s22 = smov %s4341_s23  ;;  %s5922_s23 = smov %s4427_s28 }
 0x721   : > { %s5923_s24 = smov %s4417_s25  ;;  %23 = sbr.rel (!%p21_p9) target bundleno = 11 (0xb), region = 117 }
 0x726   :  { %3035 = vsyncpa [#allocation4], 1 }
 0x727   :  { %3037 = vsyncpa [#allocation4 + $0x1], 1 }
 0x728   :  { %3038 = vsyncpa [#allocation7], 1 }
 0x729   :  { %3040 = vsyncpa [#allocation7 + $0x1], 1 }
 0x72a   :  { %3041 = vsyncpa [#allocation10], 1 }
 0x72b   :  { %3042 = vsyncpa [#allocation5], 1 }
 0x72c   :  { %3044 = vsyncpa [#allocation5 + $0x1], 1 }

</bundles_post_ra>
